<compile_context>
chip_gen: v7x
topology: tpu7x:2x2x1
jax: 0.10.0
libtpu: 0.0.40
codegen_flags: <defaults>
</compile_context>

<pallas_src>
import math
import jax
import jax.numpy as jnp
from jax.experimental import pallas as pl
from jax.experimental.pallas import tpu as pltpu

# ---- model config (small synthetic BERT) ----
VOCAB = 100
MAX_POS = 16
TYPE_VOCAB = 2
HIDDEN = 32
HEADS = 4
HEAD_DIM = HIDDEN // HEADS
INTER = 64
LAYERS = 2
NUM_LABELS = 3
LN_EPS = 1e-12
LOGIT_PAD = 128      # lane-dense padded width of the classifier output


def _layer_norm(x, gamma, beta, eps=LN_EPS):
    mu = jnp.mean(x, axis=-1, keepdims=True)
    var = jnp.mean((x - mu) ** 2, axis=-1, keepdims=True)
    return (x - mu) * jax.lax.rsqrt(var + eps) * gamma + beta


# ---------------------------- fused Pallas kernel ----------------------------

def _make_fused_kernel(B, S):
    scale = 1.0 / math.sqrt(HEAD_DIM)

    def kernel(emb_ref, bias_ref, emb_g_ref, emb_b_ref,
               wq_ref, bq_ref, wk_ref, bk_ref, wv_ref, bv_ref,
               wo_ref, bo_ref, g1_ref, bn1_ref,
               wi_ref, bi_ref, wo2_ref, bo2_ref, g2_ref, bn2_ref,
               wp_ref, bp_ref, wc_ref, bc_ref,
               out_ref):
        # Whole forward is VMEM-resident; activations are (B*S, H) with batch folded
        # into the sublane axis.
        h = _layer_norm(emb_ref[...], emb_g_ref[...], emb_b_ref[...])      # (B*S, H)
        # Additive attention bias, hoisted: computed once per forward in the wrapper,
        # reused unchanged by every layer.
        bias = bias_ref[...]                                               # (B*HEADS, 1, S)

        def split_heads(t):   # (B*S, H) -> (B*HEADS, S, HEAD_DIM)
            return (t.reshape(B, S, HEADS, HEAD_DIM)
                     .transpose(0, 2, 1, 3)
                     .reshape(B * HEADS, S, HEAD_DIM))

        def merge_heads(t):   # (B*HEADS, S, HEAD_DIM) -> (B*S, H)
            return (t.reshape(B, HEADS, S, HEAD_DIM)
                     .transpose(0, 2, 1, 3)
                     .reshape(B * S, HIDDEN))

        for l in range(LAYERS):   # static unroll; per-layer weights stacked on axis 0
            q = jnp.dot(h, wq_ref[l], preferred_element_type=jnp.float32) + bq_ref[l]
            k = jnp.dot(h, wk_ref[l], preferred_element_type=jnp.float32) + bk_ref[l]
            v = jnp.dot(h, wv_ref[l], preferred_element_type=jnp.float32) + bv_ref[l]

            # Batched multi-head attention: one contraction over all (batch, head)
            # pairs and a single softmax — no per-head loop / concatenate.
            qh, kh, vh = split_heads(q), split_heads(k), split_heads(v)
            s = jnp.einsum('nqd,nkd->nqk', qh, kh,
                           preferred_element_type=jnp.float32) * scale + bias
            p = jax.nn.softmax(s, axis=-1)
            ctx = merge_heads(jnp.einsum('nqk,nkd->nqd', p, vh,
                                         preferred_element_type=jnp.float32))

            attn = jnp.dot(ctx, wo_ref[l], preferred_element_type=jnp.float32) + bo_ref[l]
            h1 = _layer_norm(h + attn, g1_ref[l], bn1_ref[l])

            ff = jnp.dot(h1, wi_ref[l], preferred_element_type=jnp.float32) + bi_ref[l]
            # TODO(synk): HF BERT uses exact (erf) GELU; tanh approximation kept for robust Mosaic lowering.
            ff = jax.nn.gelu(ff, approximate=True)
            ff = jnp.dot(ff, wo2_ref[l], preferred_element_type=jnp.float32) + bo2_ref[l]
            h = _layer_norm(h1 + ff, g2_ref[l], bn2_ref[l])

        # BERT pooler on the CLS token, dropout is identity at inference, then the
        # classifier head (zero-padded to 128 lanes for an unmasked, lane-dense store).
        cls = h.reshape(B, S, HIDDEN)[:, 0, :]                              # (B, H)
        pooled = jnp.tanh(jnp.dot(cls, wp_ref[...],
                                  preferred_element_type=jnp.float32) + bp_ref[...])
        logits = jnp.dot(pooled, wc_ref[...],
                         preferred_element_type=jnp.float32) + bc_ref[...]  # (B, 128)
        out_ref[...] = logits.astype(out_ref.dtype)

    return kernel


# ---------------------------- params & forward ----------------------------

def init_params(key):
    keys = iter(jax.random.split(key, 64))

    def w(shape, scale=0.02):
        return (scale * jax.random.normal(next(keys), shape)).astype(jnp.float32)

    def zeros(shape):
        return jnp.zeros(shape, jnp.float32)

    def ones(shape):
        return jnp.ones(shape, jnp.float32)

    return {
        "word_emb": w((VOCAB, HIDDEN)),
        "pos_emb": w((MAX_POS, HIDDEN)),
        "type_emb": w((TYPE_VOCAB, HIDDEN)),
        "emb_g": ones((1, HIDDEN)), "emb_b": zeros((1, HIDDEN)),
        # per-layer weights stacked along a leading LAYERS axis
        "wq": w((LAYERS, HIDDEN, HIDDEN)), "bq": zeros((LAYERS, 1, HIDDEN)),
        "wk": w((LAYERS, HIDDEN, HIDDEN)), "bk": zeros((LAYERS, 1, HIDDEN)),
        "wv": w((LAYERS, HIDDEN, HIDDEN)), "bv": zeros((LAYERS, 1, HIDDEN)),
        "wo": w((LAYERS, HIDDEN, HIDDEN)), "bo": zeros((LAYERS, 1, HIDDEN)),
        "g1": jnp.ones((LAYERS, 1, HIDDEN), jnp.float32),
        "bn1": zeros((LAYERS, 1, HIDDEN)),
        "wi": w((LAYERS, HIDDEN, INTER)), "bi": zeros((LAYERS, 1, INTER)),
        "wo2": w((LAYERS, INTER, HIDDEN)), "bo2": zeros((LAYERS, 1, HIDDEN)),
        "g2": jnp.ones((LAYERS, 1, HIDDEN), jnp.float32),
        "bn2": zeros((LAYERS, 1, HIDDEN)),
        "wp": w((HIDDEN, HIDDEN)), "bp": zeros((1, HIDDEN)),           # BERT pooler
        "wc": w((HIDDEN, NUM_LABELS)), "bc": zeros((1, NUM_LABELS)),   # nn.Linear(hidden, num_labels)
    }


def base_classifier_forward(params, input_ids, attention_mask):
    B, S = input_ids.shape

    # Embedding-table gathers are glue (tiny, data-dependent) — plain JAX.
    pos_ids = jnp.arange(S)
    emb = (params["word_emb"][input_ids]
           + params["pos_emb"][pos_ids][None, :, :]
           + params["type_emb"][0][None, None, :]).astype(jnp.float32)
    emb = emb.reshape(B * S, HIDDEN)          # fold batch into the sublane axis

    # Hoisted additive attention bias: 0 where mask==1, -1e9 where mask==0,
    # broadcast per head; computed once per forward and reused by all layers.
    neg = (1.0 - attention_mask.astype(jnp.float32)) * -1e9               # (B, S)
    bias = jnp.broadcast_to(neg[:, None, None, :],
                            (B, HEADS, 1, S)).reshape(B * HEADS, 1, S)

    # Zero-pad the classifier to a lane-dense 128-wide output; slice back afterwards.
    wc_pad = jnp.zeros((HIDDEN, LOGIT_PAD), jnp.float32).at[:, :NUM_LABELS].set(params["wc"])
    bc_pad = jnp.zeros((1, LOGIT_PAD), jnp.float32).at[:, :NUM_LABELS].set(params["bc"])

    args = (emb, bias, params["emb_g"], params["emb_b"],
            params["wq"], params["bq"], params["wk"], params["bk"],
            params["wv"], params["bv"], params["wo"], params["bo"],
            params["g1"], params["bn1"], params["wi"], params["bi"],
            params["wo2"], params["bo2"], params["g2"], params["bn2"],
            params["wp"], params["bp"], wc_pad, bc_pad)

    logits_pad = pl.pallas_call(
        _make_fused_kernel(B, S),
        out_shape=jax.ShapeDtypeStruct((B, LOGIT_PAD), jnp.float32),
        in_specs=[pl.BlockSpec(memory_space=pltpu.MemorySpace.VMEM)] * len(args),
        out_specs=pl.BlockSpec(memory_space=pltpu.MemorySpace.VMEM),
    )(*args)
    return logits_pad[:, :NUM_LABELS]


if __name__ == "__main__":
    key = jax.random.PRNGKey(0)
    pkey, ikey = jax.random.split(key)
    params = init_params(pkey)

    B, S = 2, 8
    input_ids = jax.random.randint(ikey, (B, S), 0, VOCAB, dtype=jnp.int32)
    attention_mask = jnp.array([[1, 1, 1, 1, 1, 1, 1, 1],
                                [1, 1, 1, 1, 1, 1, 0, 0]], dtype=jnp.int32)

    forward = jax.jit(base_classifier_forward)
    logits = forward(params, input_ids, attention_mask)
    jax.block_until_ready(logits)
    assert logits.shape == (B, NUM_LABELS)
    assert bool(jnp.all(jnp.isfinite(logits)))
    print("KERNEL_OK")
</pallas_src>

<mosaic_0001>
module attributes {stable_mosaic.version = 11 : i64} {
  func.func @kernel(%arg0: memref<16x32xf32, #tpu.memory_space<vmem>>, %arg1: memref<8x1x8xf32, #tpu.memory_space<vmem>>, %arg2: memref<1x32xf32, #tpu.memory_space<vmem>>, %arg3: memref<1x32xf32, #tpu.memory_space<vmem>>, %arg4: memref<2x32x32xf32, #tpu.memory_space<vmem>>, %arg5: memref<2x1x32xf32, #tpu.memory_space<vmem>>, %arg6: memref<2x32x32xf32, #tpu.memory_space<vmem>>, %arg7: memref<2x1x32xf32, #tpu.memory_space<vmem>>, %arg8: memref<2x32x32xf32, #tpu.memory_space<vmem>>, %arg9: memref<2x1x32xf32, #tpu.memory_space<vmem>>, %arg10: memref<2x32x32xf32, #tpu.memory_space<vmem>>, %arg11: memref<2x1x32xf32, #tpu.memory_space<vmem>>, %arg12: memref<2x1x32xf32, #tpu.memory_space<vmem>>, %arg13: memref<2x1x32xf32, #tpu.memory_space<vmem>>, %arg14: memref<2x32x64xf32, #tpu.memory_space<vmem>>, %arg15: memref<2x1x64xf32, #tpu.memory_space<vmem>>, %arg16: memref<2x64x32xf32, #tpu.memory_space<vmem>>, %arg17: memref<2x1x32xf32, #tpu.memory_space<vmem>>, %arg18: memref<2x1x32xf32, #tpu.memory_space<vmem>>, %arg19: memref<2x1x32xf32, #tpu.memory_space<vmem>>, %arg20: memref<32x32xf32, #tpu.memory_space<vmem>>, %arg21: memref<1x32xf32, #tpu.memory_space<vmem>>, %arg22: memref<32x128xf32, #tpu.memory_space<vmem>>, %arg23: memref<1x128xf32, #tpu.memory_space<vmem>>, %arg24: memref<2x128xf32, #tpu.memory_space<vmem>>) attributes {dimension_semantics = [], scalar_prefetch = 0 : i64, scratch_operands = 0 : i64, tpu.core_type = #tpu.core_type<tc>} {
    %c0 = arith.constant 0 : index
    %c0_0 = arith.constant 0 : index
    %0 = vector.load %arg0[%c0, %c0_0] : memref<16x32xf32, #tpu.memory_space<vmem>>, vector<16x32xf32>
    %c0_1 = arith.constant 0 : index
    %c0_2 = arith.constant 0 : index
    %1 = vector.load %arg2[%c0_1, %c0_2] : memref<1x32xf32, #tpu.memory_space<vmem>>, vector<1x32xf32>
    %c0_3 = arith.constant 0 : index
    %c0_4 = arith.constant 0 : index
    %2 = vector.load %arg3[%c0_3, %c0_4] : memref<1x32xf32, #tpu.memory_space<vmem>>, vector<1x32xf32>
    %cst = arith.constant dense<0.000000e+00> : vector<16xf32>
    %3 = vector.multi_reduction <add>, %0, %cst [1] : vector<16x32xf32> to vector<16xf32>
    %4 = vector.shape_cast %3 : vector<16xf32> to vector<16x1xf32>
    %cst_5 = arith.constant 3.200000e+01 : f32
    %5 = vector.broadcast %cst_5 : f32 to vector<16x1xf32>
    %6 = arith.divf %4, %5 : vector<16x1xf32>
    %7 = vector.broadcast %6 : vector<16x1xf32> to vector<16x32xf32>
    %8 = arith.subf %0, %7 : vector<16x32xf32>
    %9 = arith.mulf %8, %8 : vector<16x32xf32>
    %cst_6 = arith.constant dense<0.000000e+00> : vector<16xf32>
    %10 = vector.multi_reduction <add>, %9, %cst_6 [1] : vector<16x32xf32> to vector<16xf32>
    %11 = vector.shape_cast %10 : vector<16xf32> to vector<16x1xf32>
    %cst_7 = arith.constant 3.200000e+01 : f32
    %12 = vector.broadcast %cst_7 : f32 to vector<16x1xf32>
    %13 = arith.divf %11, %12 : vector<16x1xf32>
    %14 = vector.broadcast %6 : vector<16x1xf32> to vector<16x32xf32>
    %15 = arith.subf %0, %14 : vector<16x32xf32>
    %cst_8 = arith.constant 9.99999996E-13 : f32
    %16 = vector.broadcast %cst_8 : f32 to vector<16x1xf32>
    %17 = arith.addf %13, %16 : vector<16x1xf32>
    %18 = math.rsqrt %17 : vector<16x1xf32>
    %19 = vector.broadcast %18 : vector<16x1xf32> to vector<16x32xf32>
    %20 = arith.mulf %15, %19 : vector<16x32xf32>
    %21 = vector.broadcast %1 : vector<1x32xf32> to vector<16x32xf32>
    %22 = arith.mulf %20, %21 : vector<16x32xf32>
    %23 = vector.broadcast %2 : vector<1x32xf32> to vector<16x32xf32>
    %24 = arith.addf %22, %23 : vector<16x32xf32>
    %c0_9 = arith.constant 0 : index
    %c0_10 = arith.constant 0 : index
    %c0_11 = arith.constant 0 : index
    %25 = vector.load %arg1[%c0_9, %c0_10, %c0_11] : memref<8x1x8xf32, #tpu.memory_space<vmem>>, vector<8x1x8xf32>
    %c0_12 = arith.constant 0 : index
    %c0_13 = arith.constant 0 : index
    %c0_14 = arith.constant 0 : index
    %26 = vector.load %arg4[%c0_12, %c0_13, %c0_14] : memref<2x32x32xf32, #tpu.memory_space<vmem>>, vector<1x32x32xf32>
    %27 = vector.shape_cast %26 : vector<1x32x32xf32> to vector<32x32xf32>
    %cst_15 = arith.constant dense<0.000000e+00> : vector<16x32xf32>
    %28 = tpu.matmul %24, %27, %cst_15 {dimension_numbers = #tpu.dot_dimension_numbers<[1], [0], [0], [1], [0, 0, 1, 1], [], []>} : vector<16x32xf32>, vector<32x32xf32>, vector<16x32xf32> -> vector<16x32xf32>
    %c0_16 = arith.constant 0 : index
    %c0_17 = arith.constant 0 : index
    %c0_18 = arith.constant 0 : index
    %29 = vector.load %arg5[%c0_16, %c0_17, %c0_18] : memref<2x1x32xf32, #tpu.memory_space<vmem>>, vector<1x1x32xf32>
    %30 = vector.shape_cast %29 : vector<1x1x32xf32> to vector<1x32xf32>
    %31 = vector.broadcast %30 : vector<1x32xf32> to vector<16x32xf32>
    %32 = arith.addf %28, %31 : vector<16x32xf32>
    %c0_19 = arith.constant 0 : index
    %c0_20 = arith.constant 0 : index
    %c0_21 = arith.constant 0 : index
    %33 = vector.load %arg6[%c0_19, %c0_20, %c0_21] : memref<2x32x32xf32, #tpu.memory_space<vmem>>, vector<1x32x32xf32>
    %34 = vector.shape_cast %33 : vector<1x32x32xf32> to vector<32x32xf32>
    %cst_22 = arith.constant dense<0.000000e+00> : vector<16x32xf32>
    %35 = tpu.matmul %24, %34, %cst_22 {dimension_numbers = #tpu.dot_dimension_numbers<[1], [0], [0], [1], [0, 0, 1, 1], [], []>} : vector<16x32xf32>, vector<32x32xf32>, vector<16x32xf32> -> vector<16x32xf32>
    %c0_23 = arith.constant 0 : index
    %c0_24 = arith.constant 0 : index
    %c0_25 = arith.constant 0 : index
    %36 = vector.load %arg7[%c0_23, %c0_24, %c0_25] : memref<2x1x32xf32, #tpu.memory_space<vmem>>, vector<1x1x32xf32>
    %37 = vector.shape_cast %36 : vector<1x1x32xf32> to vector<1x32xf32>
    %38 = vector.broadcast %37 : vector<1x32xf32> to vector<16x32xf32>
    %39 = arith.addf %35, %38 : vector<16x32xf32>
    %c0_26 = arith.constant 0 : index
    %c0_27 = arith.constant 0 : index
    %c0_28 = arith.constant 0 : index
    %40 = vector.load %arg8[%c0_26, %c0_27, %c0_28] : memref<2x32x32xf32, #tpu.memory_space<vmem>>, vector<1x32x32xf32>
    %41 = vector.shape_cast %40 : vector<1x32x32xf32> to vector<32x32xf32>
    %cst_29 = arith.constant dense<0.000000e+00> : vector<16x32xf32>
    %42 = tpu.matmul %24, %41, %cst_29 {dimension_numbers = #tpu.dot_dimension_numbers<[1], [0], [0], [1], [0, 0, 1, 1], [], []>} : vector<16x32xf32>, vector<32x32xf32>, vector<16x32xf32> -> vector<16x32xf32>
    %c0_30 = arith.constant 0 : index
    %c0_31 = arith.constant 0 : index
    %c0_32 = arith.constant 0 : index
    %43 = vector.load %arg9[%c0_30, %c0_31, %c0_32] : memref<2x1x32xf32, #tpu.memory_space<vmem>>, vector<1x1x32xf32>
    %44 = vector.shape_cast %43 : vector<1x1x32xf32> to vector<1x32xf32>
    %45 = vector.broadcast %44 : vector<1x32xf32> to vector<16x32xf32>
    %46 = arith.addf %42, %45 : vector<16x32xf32>
    %47 = vector.shape_cast %32 : vector<16x32xf32> to vector<2x8x4x8xf32>
    %48 = tpu.transpose %47, [0, 2, 1, 3] : vector<2x8x4x8xf32> -> vector<2x4x8x8xf32>
    %49 = vector.shape_cast %48 : vector<2x4x8x8xf32> to vector<8x8x8xf32>
    %50 = vector.shape_cast %39 : vector<16x32xf32> to vector<2x8x4x8xf32>
    %51 = tpu.transpose %50, [0, 2, 1, 3] : vector<2x8x4x8xf32> -> vector<2x4x8x8xf32>
    %52 = vector.shape_cast %51 : vector<2x4x8x8xf32> to vector<8x8x8xf32>
    %53 = vector.shape_cast %46 : vector<16x32xf32> to vector<2x8x4x8xf32>
    %54 = tpu.transpose %53, [0, 2, 1, 3] : vector<2x8x4x8xf32> -> vector<2x4x8x8xf32>
    %55 = vector.shape_cast %54 : vector<2x4x8x8xf32> to vector<8x8x8xf32>
    "tpu.trace_start"() <{level = 10 : i32, message = "nqd,nkd->nqk"}> : () -> ()
    %cst_33 = arith.constant dense<0.000000e+00> : vector<8x8x8xf32>
    %56 = tpu.matmul %49, %52, %cst_33 {dimension_numbers = #tpu.dot_dimension_numbers<[2], [2], [1], [1], [0, 0, 0, 1, 1, 1], [0], [0]>} : vector<8x8x8xf32>, vector<8x8x8xf32>, vector<8x8x8xf32> -> vector<8x8x8xf32>
    "tpu.trace_stop"() : () -> ()
    %cst_34 = arith.constant 0.353553385 : f32
    %57 = vector.broadcast %cst_34 : f32 to vector<8x8x8xf32>
    %58 = arith.mulf %56, %57 : vector<8x8x8xf32>
    %59 = vector.broadcast %25 : vector<8x1x8xf32> to vector<8x8x8xf32>
    %60 = arith.addf %58, %59 : vector<8x8x8xf32>
    %cst_35 = arith.constant dense<0xFF800000> : vector<8x8xf32>
    %61 = vector.multi_reduction <maximumf>, %60, %cst_35 [2] : vector<8x8x8xf32> to vector<8x8xf32>
    %cst_36 = arith.constant 0xFF800000 : f32
    %62 = vector.broadcast %cst_36 : f32 to vector<8x8xf32>
    %63 = arith.maximumf %62, %61 : vector<8x8xf32>
    %64 = vector.shape_cast %63 : vector<8x8xf32> to vector<8x8x1xf32>
    %65 = vector.broadcast %64 : vector<8x8x1xf32> to vector<8x8x8xf32>
    %66 = arith.subf %60, %65 : vector<8x8x8xf32>
    %67 = math.exp %66 : vector<8x8x8xf32>
    %cst_37 = arith.constant dense<0.000000e+00> : vector<8x8xf32>
    %68 = vector.multi_reduction <add>, %67, %cst_37 [2] : vector<8x8x8xf32> to vector<8x8xf32>
    %69 = vector.shape_cast %68 : vector<8x8xf32> to vector<8x8x1xf32>
    %70 = vector.broadcast %69 : vector<8x8x1xf32> to vector<8x8x8xf32>
    %71 = arith.divf %67, %70 : vector<8x8x8xf32>
    "tpu.trace_start"() <{level = 10 : i32, message = "nqk,nkd->nqd"}> : () -> ()
    %cst_38 = arith.constant dense<0.000000e+00> : vector<8x8x8xf32>
    %72 = tpu.matmul %71, %55, %cst_38 {dimension_numbers = #tpu.dot_dimension_numbers<[2], [1], [1], [2], [0, 0, 0, 1, 1, 2], [0], [0]>} : vector<8x8x8xf32>, vector<8x8x8xf32>, vector<8x8x8xf32> -> vector<8x8x8xf32>
    "tpu.trace_stop"() : () -> ()
    %73 = vector.shape_cast %72 : vector<8x8x8xf32> to vector<2x4x8x8xf32>
    %74 = tpu.transpose %73, [0, 2, 1, 3] : vector<2x4x8x8xf32> -> vector<2x8x4x8xf32>
    %75 = vector.shape_cast %74 : vector<2x8x4x8xf32> to vector<16x32xf32>
    %c0_39 = arith.constant 0 : index
    %c0_40 = arith.constant 0 : index
    %c0_41 = arith.constant 0 : index
    %76 = vector.load %arg10[%c0_39, %c0_40, %c0_41] : memref<2x32x32xf32, #tpu.memory_space<vmem>>, vector<1x32x32xf32>
    %77 = vector.shape_cast %76 : vector<1x32x32xf32> to vector<32x32xf32>
    %cst_42 = arith.constant dense<0.000000e+00> : vector<16x32xf32>
    %78 = tpu.matmul %75, %77, %cst_42 {dimension_numbers = #tpu.dot_dimension_numbers<[1], [0], [0], [1], [0, 0, 1, 1], [], []>} : vector<16x32xf32>, vector<32x32xf32>, vector<16x32xf32> -> vector<16x32xf32>
    %c0_43 = arith.constant 0 : index
    %c0_44 = arith.constant 0 : index
    %c0_45 = arith.constant 0 : index
    %79 = vector.load %arg11[%c0_43, %c0_44, %c0_45] : memref<2x1x32xf32, #tpu.memory_space<vmem>>, vector<1x1x32xf32>
    %80 = vector.shape_cast %79 : vector<1x1x32xf32> to vector<1x32xf32>
    %81 = vector.broadcast %80 : vector<1x32xf32> to vector<16x32xf32>
    %82 = arith.addf %78, %81 : vector<16x32xf32>
    %83 = arith.addf %24, %82 : vector<16x32xf32>
    %c0_46 = arith.constant 0 : index
    %c0_47 = arith.constant 0 : index
    %c0_48 = arith.constant 0 : index
    %84 = vector.load %arg12[%c0_46, %c0_47, %c0_48] : memref<2x1x32xf32, #tpu.memory_space<vmem>>, vector<1x1x32xf32>
    %85 = vector.shape_cast %84 : vector<1x1x32xf32> to vector<1x32xf32>
    %c0_49 = arith.constant 0 : index
    %c0_50 = arith.constant 0 : index
    %c0_51 = arith.constant 0 : index
    %86 = vector.load %arg13[%c0_49, %c0_50, %c0_51] : memref<2x1x32xf32, #tpu.memory_space<vmem>>, vector<1x1x32xf32>
    %87 = vector.shape_cast %86 : vector<1x1x32xf32> to vector<1x32xf32>
    %cst_52 = arith.constant dense<0.000000e+00> : vector<16xf32>
    %88 = vector.multi_reduction <add>, %83, %cst_52 [1] : vector<16x32xf32> to vector<16xf32>
    %89 = vector.shape_cast %88 : vector<16xf32> to vector<16x1xf32>
    %cst_53 = arith.constant 3.200000e+01 : f32
    %90 = vector.broadcast %cst_53 : f32 to vector<16x1xf32>
    %91 = arith.divf %89, %90 : vector<16x1xf32>
    %92 = vector.broadcast %91 : vector<16x1xf32> to vector<16x32xf32>
    %93 = arith.subf %83, %92 : vector<16x32xf32>
    %94 = arith.mulf %93, %93 : vector<16x32xf32>
    %cst_54 = arith.constant dense<0.000000e+00> : vector<16xf32>
    %95 = vector.multi_reduction <add>, %94, %cst_54 [1] : vector<16x32xf32> to vector<16xf32>
    %96 = vector.shape_cast %95 : vector<16xf32> to vector<16x1xf32>
    %cst_55 = arith.constant 3.200000e+01 : f32
    %97 = vector.broadcast %cst_55 : f32 to vector<16x1xf32>
    %98 = arith.divf %96, %97 : vector<16x1xf32>
    %99 = vector.broadcast %91 : vector<16x1xf32> to vector<16x32xf32>
    %100 = arith.subf %83, %99 : vector<16x32xf32>
    %cst_56 = arith.constant 9.99999996E-13 : f32
    %101 = vector.broadcast %cst_56 : f32 to vector<16x1xf32>
    %102 = arith.addf %98, %101 : vector<16x1xf32>
    %103 = math.rsqrt %102 : vector<16x1xf32>
    %104 = vector.broadcast %103 : vector<16x1xf32> to vector<16x32xf32>
    %105 = arith.mulf %100, %104 : vector<16x32xf32>
    %106 = vector.broadcast %85 : vector<1x32xf32> to vector<16x32xf32>
    %107 = arith.mulf %105, %106 : vector<16x32xf32>
    %108 = vector.broadcast %87 : vector<1x32xf32> to vector<16x32xf32>
    %109 = arith.addf %107, %108 : vector<16x32xf32>
    %c0_57 = arith.constant 0 : index
    %c0_58 = arith.constant 0 : index
    %c0_59 = arith.constant 0 : index
    %110 = vector.load %arg14[%c0_57, %c0_58, %c0_59] : memref<2x32x64xf32, #tpu.memory_space<vmem>>, vector<1x32x64xf32>
    %111 = vector.shape_cast %110 : vector<1x32x64xf32> to vector<32x64xf32>
    %cst_60 = arith.constant dense<0.000000e+00> : vector<16x64xf32>
    %112 = tpu.matmul %109, %111, %cst_60 {dimension_numbers = #tpu.dot_dimension_numbers<[1], [0], [0], [1], [0, 0, 1, 1], [], []>} : vector<16x32xf32>, vector<32x64xf32>, vector<16x64xf32> -> vector<16x64xf32>
    %c0_61 = arith.constant 0 : index
    %c0_62 = arith.constant 0 : index
    %c0_63 = arith.constant 0 : index
    %113 = vector.load %arg15[%c0_61, %c0_62, %c0_63] : memref<2x1x64xf32, #tpu.memory_space<vmem>>, vector<1x1x64xf32>
    %114 = vector.shape_cast %113 : vector<1x1x64xf32> to vector<1x64xf32>
    %115 = vector.broadcast %114 : vector<1x64xf32> to vector<16x64xf32>
    %116 = arith.addf %112, %115 : vector<16x64xf32>
    %117 = arith.mulf %116, %116 : vector<16x64xf32>
    %118 = arith.mulf %116, %117 : vector<16x64xf32>
    %cst_64 = arith.constant 4.471500e-02 : f32
    %119 = vector.broadcast %cst_64 : f32 to vector<16x64xf32>
    %120 = arith.mulf %119, %118 : vector<16x64xf32>
    %121 = arith.addf %116, %120 : vector<16x64xf32>
    %cst_65 = arith.constant 0.797884583 : f32
    %122 = vector.broadcast %cst_65 : f32 to vector<16x64xf32>
    %123 = arith.mulf %122, %121 : vector<16x64xf32>
    %124 = math.tanh %123 : vector<16x64xf32>
    %cst_66 = arith.constant 1.000000e+00 : f32
    %125 = vector.broadcast %cst_66 : f32 to vector<16x64xf32>
    %126 = arith.addf %125, %124 : vector<16x64xf32>
    %cst_67 = arith.constant 5.000000e-01 : f32
    %127 = vector.broadcast %cst_67 : f32 to vector<16x64xf32>
    %128 = arith.mulf %127, %126 : vector<16x64xf32>
    %129 = arith.mulf %116, %128 : vector<16x64xf32>
    %c0_68 = arith.constant 0 : index
    %c0_69 = arith.constant 0 : index
    %c0_70 = arith.constant 0 : index
    %130 = vector.load %arg16[%c0_68, %c0_69, %c0_70] : memref<2x64x32xf32, #tpu.memory_space<vmem>>, vector<1x64x32xf32>
    %131 = vector.shape_cast %130 : vector<1x64x32xf32> to vector<64x32xf32>
    %cst_71 = arith.constant dense<0.000000e+00> : vector<16x32xf32>
    %132 = tpu.matmul %129, %131, %cst_71 {dimension_numbers = #tpu.dot_dimension_numbers<[1], [0], [0], [1], [0, 0, 1, 1], [], []>} : vector<16x64xf32>, vector<64x32xf32>, vector<16x32xf32> -> vector<16x32xf32>
    %c0_72 = arith.constant 0 : index
    %c0_73 = arith.constant 0 : index
    %c0_74 = arith.constant 0 : index
    %133 = vector.load %arg17[%c0_72, %c0_73, %c0_74] : memref<2x1x32xf32, #tpu.memory_space<vmem>>, vector<1x1x32xf32>
    %134 = vector.shape_cast %133 : vector<1x1x32xf32> to vector<1x32xf32>
    %135 = vector.broadcast %134 : vector<1x32xf32> to vector<16x32xf32>
    %136 = arith.addf %132, %135 : vector<16x32xf32>
    %137 = arith.addf %109, %136 : vector<16x32xf32>
    %c0_75 = arith.constant 0 : index
    %c0_76 = arith.constant 0 : index
    %c0_77 = arith.constant 0 : index
    %138 = vector.load %arg18[%c0_75, %c0_76, %c0_77] : memref<2x1x32xf32, #tpu.memory_space<vmem>>, vector<1x1x32xf32>
    %139 = vector.shape_cast %138 : vector<1x1x32xf32> to vector<1x32xf32>
    %c0_78 = arith.constant 0 : index
    %c0_79 = arith.constant 0 : index
    %c0_80 = arith.constant 0 : index
    %140 = vector.load %arg19[%c0_78, %c0_79, %c0_80] : memref<2x1x32xf32, #tpu.memory_space<vmem>>, vector<1x1x32xf32>
    %141 = vector.shape_cast %140 : vector<1x1x32xf32> to vector<1x32xf32>
    %cst_81 = arith.constant dense<0.000000e+00> : vector<16xf32>
    %142 = vector.multi_reduction <add>, %137, %cst_81 [1] : vector<16x32xf32> to vector<16xf32>
    %143 = vector.shape_cast %142 : vector<16xf32> to vector<16x1xf32>
    %cst_82 = arith.constant 3.200000e+01 : f32
    %144 = vector.broadcast %cst_82 : f32 to vector<16x1xf32>
    %145 = arith.divf %143, %144 : vector<16x1xf32>
    %146 = vector.broadcast %145 : vector<16x1xf32> to vector<16x32xf32>
    %147 = arith.subf %137, %146 : vector<16x32xf32>
    %148 = arith.mulf %147, %147 : vector<16x32xf32>
    %cst_83 = arith.constant dense<0.000000e+00> : vector<16xf32>
    %149 = vector.multi_reduction <add>, %148, %cst_83 [1] : vector<16x32xf32> to vector<16xf32>
    %150 = vector.shape_cast %149 : vector<16xf32> to vector<16x1xf32>
    %cst_84 = arith.constant 3.200000e+01 : f32
    %151 = vector.broadcast %cst_84 : f32 to vector<16x1xf32>
    %152 = arith.divf %150, %151 : vector<16x1xf32>
    %153 = vector.broadcast %145 : vector<16x1xf32> to vector<16x32xf32>
    %154 = arith.subf %137, %153 : vector<16x32xf32>
    %cst_85 = arith.constant 9.99999996E-13 : f32
    %155 = vector.broadcast %cst_85 : f32 to vector<16x1xf32>
    %156 = arith.addf %152, %155 : vector<16x1xf32>
    %157 = math.rsqrt %156 : vector<16x1xf32>
    %158 = vector.broadcast %157 : vector<16x1xf32> to vector<16x32xf32>
    %159 = arith.mulf %154, %158 : vector<16x32xf32>
    %160 = vector.broadcast %139 : vector<1x32xf32> to vector<16x32xf32>
    %161 = arith.mulf %159, %160 : vector<16x32xf32>
    %162 = vector.broadcast %141 : vector<1x32xf32> to vector<16x32xf32>
    %163 = arith.addf %161, %162 : vector<16x32xf32>
    %c1 = arith.constant 1 : index
    %c0_86 = arith.constant 0 : index
    %c0_87 = arith.constant 0 : index
    %164 = vector.load %arg4[%c1, %c0_86, %c0_87] : memref<2x32x32xf32, #tpu.memory_space<vmem>>, vector<1x32x32xf32>
    %165 = vector.shape_cast %164 : vector<1x32x32xf32> to vector<32x32xf32>
    %cst_88 = arith.constant dense<0.000000e+00> : vector<16x32xf32>
    %166 = tpu.matmul %163, %165, %cst_88 {dimension_numbers = #tpu.dot_dimension_numbers<[1], [0], [0], [1], [0, 0, 1, 1], [], []>} : vector<16x32xf32>, vector<32x32xf32>, vector<16x32xf32> -> vector<16x32xf32>
    %c1_89 = arith.constant 1 : index
    %c0_90 = arith.constant 0 : index
    %c0_91 = arith.constant 0 : index
    %167 = vector.load %arg5[%c1_89, %c0_90, %c0_91] : memref<2x1x32xf32, #tpu.memory_space<vmem>>, vector<1x1x32xf32>
    %168 = vector.shape_cast %167 : vector<1x1x32xf32> to vector<1x32xf32>
    %169 = vector.broadcast %168 : vector<1x32xf32> to vector<16x32xf32>
    %170 = arith.addf %166, %169 : vector<16x32xf32>
    %c1_92 = arith.constant 1 : index
    %c0_93 = arith.constant 0 : index
    %c0_94 = arith.constant 0 : index
    %171 = vector.load %arg6[%c1_92, %c0_93, %c0_94] : memref<2x32x32xf32, #tpu.memory_space<vmem>>, vector<1x32x32xf32>
    %172 = vector.shape_cast %171 : vector<1x32x32xf32> to vector<32x32xf32>
    %cst_95 = arith.constant dense<0.000000e+00> : vector<16x32xf32>
    %173 = tpu.matmul %163, %172, %cst_95 {dimension_numbers = #tpu.dot_dimension_numbers<[1], [0], [0], [1], [0, 0, 1, 1], [], []>} : vector<16x32xf32>, vector<32x32xf32>, vector<16x32xf32> -> vector<16x32xf32>
    %c1_96 = arith.constant 1 : index
    %c0_97 = arith.constant 0 : index
    %c0_98 = arith.constant 0 : index
    %174 = vector.load %arg7[%c1_96, %c0_97, %c0_98] : memref<2x1x32xf32, #tpu.memory_space<vmem>>, vector<1x1x32xf32>
    %175 = vector.shape_cast %174 : vector<1x1x32xf32> to vector<1x32xf32>
    %176 = vector.broadcast %175 : vector<1x32xf32> to vector<16x32xf32>
    %177 = arith.addf %173, %176 : vector<16x32xf32>
    %c1_99 = arith.constant 1 : index
    %c0_100 = arith.constant 0 : index
    %c0_101 = arith.constant 0 : index
    %178 = vector.load %arg8[%c1_99, %c0_100, %c0_101] : memref<2x32x32xf32, #tpu.memory_space<vmem>>, vector<1x32x32xf32>
    %179 = vector.shape_cast %178 : vector<1x32x32xf32> to vector<32x32xf32>
    %cst_102 = arith.constant dense<0.000000e+00> : vector<16x32xf32>
    %180 = tpu.matmul %163, %179, %cst_102 {dimension_numbers = #tpu.dot_dimension_numbers<[1], [0], [0], [1], [0, 0, 1, 1], [], []>} : vector<16x32xf32>, vector<32x32xf32>, vector<16x32xf32> -> vector<16x32xf32>
    %c1_103 = arith.constant 1 : index
    %c0_104 = arith.constant 0 : index
    %c0_105 = arith.constant 0 : index
    %181 = vector.load %arg9[%c1_103, %c0_104, %c0_105] : memref<2x1x32xf32, #tpu.memory_space<vmem>>, vector<1x1x32xf32>
    %182 = vector.shape_cast %181 : vector<1x1x32xf32> to vector<1x32xf32>
    %183 = vector.broadcast %182 : vector<1x32xf32> to vector<16x32xf32>
    %184 = arith.addf %180, %183 : vector<16x32xf32>
    %185 = vector.shape_cast %170 : vector<16x32xf32> to vector<2x8x4x8xf32>
    %186 = tpu.transpose %185, [0, 2, 1, 3] : vector<2x8x4x8xf32> -> vector<2x4x8x8xf32>
    %187 = vector.shape_cast %186 : vector<2x4x8x8xf32> to vector<8x8x8xf32>
    %188 = vector.shape_cast %177 : vector<16x32xf32> to vector<2x8x4x8xf32>
    %189 = tpu.transpose %188, [0, 2, 1, 3] : vector<2x8x4x8xf32> -> vector<2x4x8x8xf32>
    %190 = vector.shape_cast %189 : vector<2x4x8x8xf32> to vector<8x8x8xf32>
    %191 = vector.shape_cast %184 : vector<16x32xf32> to vector<2x8x4x8xf32>
    %192 = tpu.transpose %191, [0, 2, 1, 3] : vector<2x8x4x8xf32> -> vector<2x4x8x8xf32>
    %193 = vector.shape_cast %192 : vector<2x4x8x8xf32> to vector<8x8x8xf32>
    "tpu.trace_start"() <{level = 10 : i32, message = "nqd,nkd->nqk"}> : () -> ()
    %cst_106 = arith.constant dense<0.000000e+00> : vector<8x8x8xf32>
    %194 = tpu.matmul %187, %190, %cst_106 {dimension_numbers = #tpu.dot_dimension_numbers<[2], [2], [1], [1], [0, 0, 0, 1, 1, 1], [0], [0]>} : vector<8x8x8xf32>, vector<8x8x8xf32>, vector<8x8x8xf32> -> vector<8x8x8xf32>
    "tpu.trace_stop"() : () -> ()
    %cst_107 = arith.constant 0.353553385 : f32
    %195 = vector.broadcast %cst_107 : f32 to vector<8x8x8xf32>
    %196 = arith.mulf %194, %195 : vector<8x8x8xf32>
    %197 = vector.broadcast %25 : vector<8x1x8xf32> to vector<8x8x8xf32>
    %198 = arith.addf %196, %197 : vector<8x8x8xf32>
    %cst_108 = arith.constant dense<0xFF800000> : vector<8x8xf32>
    %199 = vector.multi_reduction <maximumf>, %198, %cst_108 [2] : vector<8x8x8xf32> to vector<8x8xf32>
    %cst_109 = arith.constant 0xFF800000 : f32
    %200 = vector.broadcast %cst_109 : f32 to vector<8x8xf32>
    %201 = arith.maximumf %200, %199 : vector<8x8xf32>
    %202 = vector.shape_cast %201 : vector<8x8xf32> to vector<8x8x1xf32>
    %203 = vector.broadcast %202 : vector<8x8x1xf32> to vector<8x8x8xf32>
    %204 = arith.subf %198, %203 : vector<8x8x8xf32>
    %205 = math.exp %204 : vector<8x8x8xf32>
    %cst_110 = arith.constant dense<0.000000e+00> : vector<8x8xf32>
    %206 = vector.multi_reduction <add>, %205, %cst_110 [2] : vector<8x8x8xf32> to vector<8x8xf32>
    %207 = vector.shape_cast %206 : vector<8x8xf32> to vector<8x8x1xf32>
    %208 = vector.broadcast %207 : vector<8x8x1xf32> to vector<8x8x8xf32>
    %209 = arith.divf %205, %208 : vector<8x8x8xf32>
    "tpu.trace_start"() <{level = 10 : i32, message = "nqk,nkd->nqd"}> : () -> ()
    %cst_111 = arith.constant dense<0.000000e+00> : vector<8x8x8xf32>
    %210 = tpu.matmul %209, %193, %cst_111 {dimension_numbers = #tpu.dot_dimension_numbers<[2], [1], [1], [2], [0, 0, 0, 1, 1, 2], [0], [0]>} : vector<8x8x8xf32>, vector<8x8x8xf32>, vector<8x8x8xf32> -> vector<8x8x8xf32>
    "tpu.trace_stop"() : () -> ()
    %211 = vector.shape_cast %210 : vector<8x8x8xf32> to vector<2x4x8x8xf32>
    %212 = tpu.transpose %211, [0, 2, 1, 3] : vector<2x4x8x8xf32> -> vector<2x8x4x8xf32>
    %213 = vector.shape_cast %212 : vector<2x8x4x8xf32> to vector<16x32xf32>
    %c1_112 = arith.constant 1 : index
    %c0_113 = arith.constant 0 : index
    %c0_114 = arith.constant 0 : index
    %214 = vector.load %arg10[%c1_112, %c0_113, %c0_114] : memref<2x32x32xf32, #tpu.memory_space<vmem>>, vector<1x32x32xf32>
    %215 = vector.shape_cast %214 : vector<1x32x32xf32> to vector<32x32xf32>
    %cst_115 = arith.constant dense<0.000000e+00> : vector<16x32xf32>
    %216 = tpu.matmul %213, %215, %cst_115 {dimension_numbers = #tpu.dot_dimension_numbers<[1], [0], [0], [1], [0, 0, 1, 1], [], []>} : vector<16x32xf32>, vector<32x32xf32>, vector<16x32xf32> -> vector<16x32xf32>
    %c1_116 = arith.constant 1 : index
    %c0_117 = arith.constant 0 : index
    %c0_118 = arith.constant 0 : index
    %217 = vector.load %arg11[%c1_116, %c0_117, %c0_118] : memref<2x1x32xf32, #tpu.memory_space<vmem>>, vector<1x1x32xf32>
    %218 = vector.shape_cast %217 : vector<1x1x32xf32> to vector<1x32xf32>
    %219 = vector.broadcast %218 : vector<1x32xf32> to vector<16x32xf32>
    %220 = arith.addf %216, %219 : vector<16x32xf32>
    %221 = arith.addf %163, %220 : vector<16x32xf32>
    %c1_119 = arith.constant 1 : index
    %c0_120 = arith.constant 0 : index
    %c0_121 = arith.constant 0 : index
    %222 = vector.load %arg12[%c1_119, %c0_120, %c0_121] : memref<2x1x32xf32, #tpu.memory_space<vmem>>, vector<1x1x32xf32>
    %223 = vector.shape_cast %222 : vector<1x1x32xf32> to vector<1x32xf32>
    %c1_122 = arith.constant 1 : index
    %c0_123 = arith.constant 0 : index
    %c0_124 = arith.constant 0 : index
    %224 = vector.load %arg13[%c1_122, %c0_123, %c0_124] : memref<2x1x32xf32, #tpu.memory_space<vmem>>, vector<1x1x32xf32>
    %225 = vector.shape_cast %224 : vector<1x1x32xf32> to vector<1x32xf32>
    %cst_125 = arith.constant dense<0.000000e+00> : vector<16xf32>
    %226 = vector.multi_reduction <add>, %221, %cst_125 [1] : vector<16x32xf32> to vector<16xf32>
    %227 = vector.shape_cast %226 : vector<16xf32> to vector<16x1xf32>
    %cst_126 = arith.constant 3.200000e+01 : f32
    %228 = vector.broadcast %cst_126 : f32 to vector<16x1xf32>
    %229 = arith.divf %227, %228 : vector<16x1xf32>
    %230 = vector.broadcast %229 : vector<16x1xf32> to vector<16x32xf32>
    %231 = arith.subf %221, %230 : vector<16x32xf32>
    %232 = arith.mulf %231, %231 : vector<16x32xf32>
    %cst_127 = arith.constant dense<0.000000e+00> : vector<16xf32>
    %233 = vector.multi_reduction <add>, %232, %cst_127 [1] : vector<16x32xf32> to vector<16xf32>
    %234 = vector.shape_cast %233 : vector<16xf32> to vector<16x1xf32>
    %cst_128 = arith.constant 3.200000e+01 : f32
    %235 = vector.broadcast %cst_128 : f32 to vector<16x1xf32>
    %236 = arith.divf %234, %235 : vector<16x1xf32>
    %237 = vector.broadcast %229 : vector<16x1xf32> to vector<16x32xf32>
    %238 = arith.subf %221, %237 : vector<16x32xf32>
    %cst_129 = arith.constant 9.99999996E-13 : f32
    %239 = vector.broadcast %cst_129 : f32 to vector<16x1xf32>
    %240 = arith.addf %236, %239 : vector<16x1xf32>
    %241 = math.rsqrt %240 : vector<16x1xf32>
    %242 = vector.broadcast %241 : vector<16x1xf32> to vector<16x32xf32>
    %243 = arith.mulf %238, %242 : vector<16x32xf32>
    %244 = vector.broadcast %223 : vector<1x32xf32> to vector<16x32xf32>
    %245 = arith.mulf %243, %244 : vector<16x32xf32>
    %246 = vector.broadcast %225 : vector<1x32xf32> to vector<16x32xf32>
    %247 = arith.addf %245, %246 : vector<16x32xf32>
    %c1_130 = arith.constant 1 : index
    %c0_131 = arith.constant 0 : index
    %c0_132 = arith.constant 0 : index
    %248 = vector.load %arg14[%c1_130, %c0_131, %c0_132] : memref<2x32x64xf32, #tpu.memory_space<vmem>>, vector<1x32x64xf32>
    %249 = vector.shape_cast %248 : vector<1x32x64xf32> to vector<32x64xf32>
    %cst_133 = arith.constant dense<0.000000e+00> : vector<16x64xf32>
    %250 = tpu.matmul %247, %249, %cst_133 {dimension_numbers = #tpu.dot_dimension_numbers<[1], [0], [0], [1], [0, 0, 1, 1], [], []>} : vector<16x32xf32>, vector<32x64xf32>, vector<16x64xf32> -> vector<16x64xf32>
    %c1_134 = arith.constant 1 : index
    %c0_135 = arith.constant 0 : index
    %c0_136 = arith.constant 0 : index
    %251 = vector.load %arg15[%c1_134, %c0_135, %c0_136] : memref<2x1x64xf32, #tpu.memory_space<vmem>>, vector<1x1x64xf32>
    %252 = vector.shape_cast %251 : vector<1x1x64xf32> to vector<1x64xf32>
    %253 = vector.broadcast %252 : vector<1x64xf32> to vector<16x64xf32>
    %254 = arith.addf %250, %253 : vector<16x64xf32>
    %255 = arith.mulf %254, %254 : vector<16x64xf32>
    %256 = arith.mulf %254, %255 : vector<16x64xf32>
    %cst_137 = arith.constant 4.471500e-02 : f32
    %257 = vector.broadcast %cst_137 : f32 to vector<16x64xf32>
    %258 = arith.mulf %257, %256 : vector<16x64xf32>
    %259 = arith.addf %254, %258 : vector<16x64xf32>
    %cst_138 = arith.constant 0.797884583 : f32
    %260 = vector.broadcast %cst_138 : f32 to vector<16x64xf32>
    %261 = arith.mulf %260, %259 : vector<16x64xf32>
    %262 = math.tanh %261 : vector<16x64xf32>
    %cst_139 = arith.constant 1.000000e+00 : f32
    %263 = vector.broadcast %cst_139 : f32 to vector<16x64xf32>
    %264 = arith.addf %263, %262 : vector<16x64xf32>
    %cst_140 = arith.constant 5.000000e-01 : f32
    %265 = vector.broadcast %cst_140 : f32 to vector<16x64xf32>
    %266 = arith.mulf %265, %264 : vector<16x64xf32>
    %267 = arith.mulf %254, %266 : vector<16x64xf32>
    %c1_141 = arith.constant 1 : index
    %c0_142 = arith.constant 0 : index
    %c0_143 = arith.constant 0 : index
    %268 = vector.load %arg16[%c1_141, %c0_142, %c0_143] : memref<2x64x32xf32, #tpu.memory_space<vmem>>, vector<1x64x32xf32>
    %269 = vector.shape_cast %268 : vector<1x64x32xf32> to vector<64x32xf32>
    %cst_144 = arith.constant dense<0.000000e+00> : vector<16x32xf32>
    %270 = tpu.matmul %267, %269, %cst_144 {dimension_numbers = #tpu.dot_dimension_numbers<[1], [0], [0], [1], [0, 0, 1, 1], [], []>} : vector<16x64xf32>, vector<64x32xf32>, vector<16x32xf32> -> vector<16x32xf32>
    %c1_145 = arith.constant 1 : index
    %c0_146 = arith.constant 0 : index
    %c0_147 = arith.constant 0 : index
    %271 = vector.load %arg17[%c1_145, %c0_146, %c0_147] : memref<2x1x32xf32, #tpu.memory_space<vmem>>, vector<1x1x32xf32>
    %272 = vector.shape_cast %271 : vector<1x1x32xf32> to vector<1x32xf32>
    %273 = vector.broadcast %272 : vector<1x32xf32> to vector<16x32xf32>
    %274 = arith.addf %270, %273 : vector<16x32xf32>
    %275 = arith.addf %247, %274 : vector<16x32xf32>
    %c1_148 = arith.constant 1 : index
    %c0_149 = arith.constant 0 : index
    %c0_150 = arith.constant 0 : index
    %276 = vector.load %arg18[%c1_148, %c0_149, %c0_150] : memref<2x1x32xf32, #tpu.memory_space<vmem>>, vector<1x1x32xf32>
    %277 = vector.shape_cast %276 : vector<1x1x32xf32> to vector<1x32xf32>
    %c1_151 = arith.constant 1 : index
    %c0_152 = arith.constant 0 : index
    %c0_153 = arith.constant 0 : index
    %278 = vector.load %arg19[%c1_151, %c0_152, %c0_153] : memref<2x1x32xf32, #tpu.memory_space<vmem>>, vector<1x1x32xf32>
    %279 = vector.shape_cast %278 : vector<1x1x32xf32> to vector<1x32xf32>
    %cst_154 = arith.constant dense<0.000000e+00> : vector<16xf32>
    %280 = vector.multi_reduction <add>, %275, %cst_154 [1] : vector<16x32xf32> to vector<16xf32>
    %281 = vector.shape_cast %280 : vector<16xf32> to vector<16x1xf32>
    %cst_155 = arith.constant 3.200000e+01 : f32
    %282 = vector.broadcast %cst_155 : f32 to vector<16x1xf32>
    %283 = arith.divf %281, %282 : vector<16x1xf32>
    %284 = vector.broadcast %283 : vector<16x1xf32> to vector<16x32xf32>
    %285 = arith.subf %275, %284 : vector<16x32xf32>
    %286 = arith.mulf %285, %285 : vector<16x32xf32>
    %cst_156 = arith.constant dense<0.000000e+00> : vector<16xf32>
    %287 = vector.multi_reduction <add>, %286, %cst_156 [1] : vector<16x32xf32> to vector<16xf32>
    %288 = vector.shape_cast %287 : vector<16xf32> to vector<16x1xf32>
    %cst_157 = arith.constant 3.200000e+01 : f32
    %289 = vector.broadcast %cst_157 : f32 to vector<16x1xf32>
    %290 = arith.divf %288, %289 : vector<16x1xf32>
    %291 = vector.broadcast %283 : vector<16x1xf32> to vector<16x32xf32>
    %292 = arith.subf %275, %291 : vector<16x32xf32>
    %cst_158 = arith.constant 9.99999996E-13 : f32
    %293 = vector.broadcast %cst_158 : f32 to vector<16x1xf32>
    %294 = arith.addf %290, %293 : vector<16x1xf32>
    %295 = math.rsqrt %294 : vector<16x1xf32>
    %296 = vector.broadcast %295 : vector<16x1xf32> to vector<16x32xf32>
    %297 = arith.mulf %292, %296 : vector<16x32xf32>
    %298 = vector.broadcast %277 : vector<1x32xf32> to vector<16x32xf32>
    %299 = arith.mulf %297, %298 : vector<16x32xf32>
    %300 = vector.broadcast %279 : vector<1x32xf32> to vector<16x32xf32>
    %301 = arith.addf %299, %300 : vector<16x32xf32>
    %302 = vector.shape_cast %301 : vector<16x32xf32> to vector<2x8x32xf32>
    %303 = vector.extract_strided_slice %302 {offsets = [0, 0, 0], sizes = [2, 1, 32], strides = [1, 1, 1]} : vector<2x8x32xf32> to vector<2x1x32xf32>
    %304 = vector.shape_cast %303 : vector<2x1x32xf32> to vector<2x32xf32>
    %c0_159 = arith.constant 0 : index
    %c0_160 = arith.constant 0 : index
    %305 = vector.load %arg20[%c0_159, %c0_160] : memref<32x32xf32, #tpu.memory_space<vmem>>, vector<32x32xf32>
    %cst_161 = arith.constant dense<0.000000e+00> : vector<2x32xf32>
    %306 = tpu.matmul %304, %305, %cst_161 {dimension_numbers = #tpu.dot_dimension_numbers<[1], [0], [0], [1], [0, 0, 1, 1], [], []>} : vector<2x32xf32>, vector<32x32xf32>, vector<2x32xf32> -> vector<2x32xf32>
    %c0_162 = arith.constant 0 : index
    %c0_163 = arith.constant 0 : index
    %307 = vector.load %arg21[%c0_162, %c0_163] : memref<1x32xf32, #tpu.memory_space<vmem>>, vector<1x32xf32>
    %308 = vector.broadcast %307 : vector<1x32xf32> to vector<2x32xf32>
    %309 = arith.addf %306, %308 : vector<2x32xf32>
    %310 = math.tanh %309 : vector<2x32xf32>
    %c0_164 = arith.constant 0 : index
    %c0_165 = arith.constant 0 : index
    %311 = vector.load %arg22[%c0_164, %c0_165] : memref<32x128xf32, #tpu.memory_space<vmem>>, vector<32x128xf32>
    %cst_166 = arith.constant dense<0.000000e+00> : vector<2x128xf32>
    %312 = tpu.matmul %310, %311, %cst_166 {dimension_numbers = #tpu.dot_dimension_numbers<[1], [0], [0], [1], [0, 0, 1, 1], [], []>} : vector<2x32xf32>, vector<32x128xf32>, vector<2x128xf32> -> vector<2x128xf32>
    %c0_167 = arith.constant 0 : index
    %c0_168 = arith.constant 0 : index
    %313 = vector.load %arg23[%c0_167, %c0_168] : memref<1x128xf32, #tpu.memory_space<vmem>>, vector<1x128xf32>
    %314 = vector.broadcast %313 : vector<1x128xf32> to vector<2x128xf32>
    %315 = arith.addf %312, %314 : vector<2x128xf32>
    %c0_169 = arith.constant 0 : index
    %c0_170 = arith.constant 0 : index
    %316 = vector.load %arg24[%c0_169, %c0_170] : memref<2x128xf32, #tpu.memory_space<vmem>>, vector<2x128xf32>
    tpu.vector_store %arg24[%c0_169, %c0_170], %315 {strides = array<i32>} : memref<2x128xf32, #tpu.memory_space<vmem>>, vector<2x128xf32>,
    return
  }
}

</mosaic_0001>

<bundles_post_ra>
// kernel: base_classifier_forward.1
= control target key start
LH: loop header
LB: loop body
LE: loop exit
PB: predicated region body
PF: predicated region fallthrough
CT: control target
= control target key end

     0   :  { %s8826_s0 = inlined_call_operand.vmem [shape: f32[16,32], index: 0, kind: input, shape index: {}]   ;;  %s8827_s1 = inlined_call_operand.vmem [shape: f32[8,1,8], index: 1, kind: input, shape index: {}]   ;;  %s8828_s2 = inlined_call_operand.vmem [shape: f32[1,32], index: 2, kind: input, shape index: {}]   ;;  %s8829_s3 = inlined_call_operand.vmem [shape: f32[1,32], index: 3, kind: input, shape index: {}]   ;;  %s8830_s4 = inlined_call_operand.vmem [shape: f32[2,32,32], index: 4, kind: input, shape index: {}]   ;;  %s8831_s5 = inlined_call_operand.vmem [shape: f32[2,1,32], index: 5, kind: input, shape index: {}]   ;;  %s8832_s6 = inlined_call_operand.vmem [shape: f32[2,32,32], index: 6, kind: input, shape index: {}]   ;;  %s8833_s7 = inlined_call_operand.vmem [shape: f32[2,1,32], index: 7, kind: input, shape index: {}]   ;;  %s8834_s8 = inlined_call_operand.vmem [shape: f32[2,32,32], index: 8, kind: input, shape index: {}]   ;;  %s8835_s9 = inlined_call_operand.vmem [shape: f32[2,1,32], index: 9, kind: input, shape index: {}]   ;;  %s8836_s10 = inlined_call_operand.vmem [shape: f32[2,32,32], index: 10, kind: input, shape index: {}]   ;;  %s8837_s11 = inlined_call_operand.vmem [shape: f32[2,1,32], index: 11, kind: input, shape index: {}]   ;;  %s8838_s12 = inlined_call_operand.vmem [shape: f32[2,1,32], index: 12, kind: input, shape index: {}]   ;;  %s8839_s13 = inlined_call_operand.vmem [shape: f32[2,1,32], index: 13, kind: input, shape index: {}]   ;;  %s8840_s14 = inlined_call_operand.vmem [shape: f32[2,32,64], index: 14, kind: input, shape index: {}]   ;;  %s8841_s15 = inlined_call_operand.vmem [shape: f32[2,1,64], index: 15, kind: input, shape index: {}]   ;;  %s8842_s16 = inlined_call_operand.vmem [shape: f32[2,64,32], index: 16, kind: input, shape index: {}]   ;;  %s8843_s17 = inlined_call_operand.vmem [shape: f32[2,1,32], index: 17, kind: input, shape index: {}]   ;;  %s8844_s18 = inlined_call_operand.vmem [shape: f32[2,1,32], index: 18, kind: input, shape index: {}]   ;;  %s8845_s19 = inlined_call_operand.vmem [shape: f32[2,1,32], index: 19, kind: input, shape index: {}]   ;;  %s8846_s20 = inlined_call_operand.vmem [shape: f32[32,32], index: 20, kind: input, shape index: {}]   ;;  %s8847_s21 = inlined_call_operand.vmem [shape: f32[1,32], index: 21, kind: input, shape index: {}]   ;;  %s8848_s22 = inlined_call_operand.vmem [shape: f32[32,128], index: 22, kind: input, shape index: {}]   ;;  %s8849_s23 = inlined_call_operand.vmem [shape: f32[1,128], index: 23, kind: input, shape index: {}]   ;;  %s8850_s24 = inlined_call_operand.hbm [shape: f32[2,128], index: 24, kind: output, shape index: {}]  }
   0x1   :  { %8871 = sst [smem:[#allocation5_spill]] %s8826_s0 }
   0x2   :  { %8872 = sst [smem:[#allocation6_spill]] %s8827_s1 }
   0x3   :  { %8873 = sst [smem:[#allocation7_spill]] %s8828_s2 }
   0x4   :  { %8874 = sst [smem:[#allocation8_spill]] %s8829_s3 }
   0x5   :  { %8875 = sst [smem:[#allocation9_spill]] %s8830_s4 }
   0x6   :  { %8876 = sst [smem:[#allocation10_spill]] %s8831_s5 }
   0x7   :  { %8877 = sst [smem:[#allocation11_spill]] %s8832_s6 }
   0x8   :  { %8878 = sst [smem:[#allocation12_spill]] %s8833_s7 }
   0x9   :  { %8879 = sst [smem:[#allocation13_spill]] %s8834_s8 }
   0xa   :  { %8880 = sst [smem:[#allocation14_spill]] %s8849_s23 }
   0xb   :  { %8881 = sst [smem:[#allocation15_spill]] %s8850_s24 }
   0xc   :  { %s8882_s27 = sld [smem:[#allocation5_spill]]  ;;  %vm82_vm0 = vcmask 261120  }
  0x12   :  { %v78_v0 = vld [vmem:[%s8882_s27] sm:$0xff]  ;;  %v79_v1 = vld [vmem:[%s8882_s27 + $0x8] sm:$0xff] }
  0x13   :  { %29 = vsyncpa [#allocation3], 0  ;;  %v83_v2 = vsel %vm82_vm0, %v78_v0, 0.0  ;;  %v86_v3 = vsel %vm82_vm0, %v79_v1, 0.0  ;;  %s8883_s0 = sld [smem:[#allocation9_spill]]  ;;  %s8884_s8 = sld [smem:[#allocation11_spill]]  ;;  %v423_v63 = vlaneseq }
  0x14   :  { %84 = vadd.xlane.f32.xlu0 %v83_v2  ;;  %s8885_s25 = sld [smem:[#allocation13_spill]]  ;;  %s8886_s27 = sld [smem:[#allocation7_spill]]  ;;  %v7571_v59 = vmov 0.0   ;;  %vm7572_vm1 = vmmov 0   ;;  %v7573_v61 = vmov 1983009808  }
  0x15   :  { %s8887_s2 = sld [smem:[#allocation8_spill]]  ;;  %s8888_s5 = sld [smem:[#allocation12_spill]]  ;;  %v421_v62 = vunpack.c.l.s4 %v7573_v61  ;;  %vm1274_vm2 = vcmask 64512   ;;  %vm2917_vm3 = vcmask 130048   ;;  %vm2920_vm4 = vcmask 195584  }
  0x16   :  { %s8889_s28 = sld [smem:[#allocation10_spill]]  ;;  %s8866_s6 = smov 112   ;;  %vm3186_vm5 = vcmask 523264   ;;  %vm6472_vm6 = vcmask 1041409  }
  0x17   :  { %s8858_s29 = smov 104   ;;  %v422_v2 = vunpack.c.0.s8 %v421_v62  ;;  %s8890_s3 = sld [smem:[#allocation6_spill]] }
  0x18   :  { %87 = vadd.xlane.f32.xlu0 %v86_v3  ;;  %v424_v3 = vshrl.u32 %v423_v63, 7  ;;  %s8864_s7 = smov 16   ;;  %s8862_s30 = smov 8  }
  0x19   :  { %v134_v14 = vld [vmem:[%s8883_s0] sm:$0xff]  ;;  %v135_v15 = vld [vmem:[%s8883_s0 + $0x8] sm:$0xff]  ;;  %v136_v19 = vld [vmem:[%s8883_s0 + $0x10] sm:$0xff]  ;;  %s8860_s4 = smov 24  }
  0x1a   :  { %v226_v16 = vld [vmem:[%s8884_s8] sm:$0xff]  ;;  %v7306_v17 = vpack.c.bf16 %v135_v15, %v134_v14  ;;  %v227_v18 = vld [vmem:[%s8884_s8 + $0x8] sm:$0xff]  ;;  %v137_v20 = vld [vmem:[%s8883_s0 + $0x18] sm:$0xff] }
  0x1b   :  { %v7314_v21 = vpack.c.bf16 %v227_v18, %v226_v16  ;;  %v7310_v22 = vpack.c.bf16 %v137_v20, %v136_v19  ;;  %v228_v23 = vld [vmem:[%s8884_s8 + $0x10] sm:$0xff]  ;;  %v229_v24 = vld [vmem:[%s8884_s8 + $0x18] sm:$0xff]  ;;  %v312_v26 = vld [vmem:[%s8885_s25] sm:$0xff] }
  0x1c   :  { %7307 = vmatprep.subr.bf16.mxu0 %v7306_v17  ;;  %v7318_v25 = vpack.c.bf16 %v229_v24, %v228_v23  ;;  %v313_v27 = vld [vmem:[%s8885_s25 + $0x8] sm:$0xff]  ;;  %v6646_v36 = vld [vmem:[%s8886_s27] ss:$0 sm:$0xff]  ;;  %v314_v43 = vld [vmem:[%s8885_s25 + $0x10] sm:$0xff] }
  0x1d   :  { %7309 = vmatpush3.bf16.msra.mxu0 %v7306_v17  ;;  %7315 = vmatprep.subr.bf16.mxu1 %v7314_v21  ;;  %v7322_v28 = vpack.c.bf16 %v313_v27, %v312_v26  ;;  %v6647_v38 = vld [vmem:[%s8887_s2] ss:$0 sm:$0xff]  ;;  %v315_v44 = vld [vmem:[%s8885_s25 + $0x18] sm:$0xff]  ;;  %s8868_s2 = smov 120  }
  0x1e   :  { %7317 = vmatpush3.bf16.msra.mxu1 %v7314_v21  ;;  %7311 = vmatprep.subr.bf16.mxu0 %v7310_v22  ;;  %v7326_v47 = vpack.c.bf16 %v315_v44, %v314_v43  ;;  %v6651_v48 = vld [vmem:[%s8888_s5] ss:$0 sm:$0xff] }
  0x1f   :  { %7319 = vmatprep.subr.bf16.mxu1 %v7318_v25  ;;  %v6648_v54 = vld [vmem:[%s8889_s28] ss:$0 sm:$0xff] }
  0x21   :  { %7313 = vmatpush3.bf16.msra.mxu0 %v7310_v22 }
  0x22   :  { %7321 = vmatpush3.bf16.msra.mxu1 %v7318_v25  ;;  %7323 = vmatprep.subr.bf16.mxu0 %v7322_v28 }
  0x23   :  { %7009 = vmatprep.subr.mxu1 %v7571_v59 }
  0xa1   :  { %v85_v4 = vpop.xlane.xlu0 %84 }
  0xa2   :  { %v90_v5 = vmul.f32 0.03125, %v85_v4 }
  0xa4   :  { %v92_v6 = vsub.f32 %v78_v0, %v90_v5  ;;  %v7574_v0 = vmov 1934713408  }
  0xa5   :  { %v88_v7 = vpop.xlane.xlu0 %87 }
  0xa6   :  { %v91_v8 = vmul.f32 0.03125, %v88_v7  ;;  %v94_v9 = vmul.f32 %v92_v6, %v92_v6  ;;  %v7816_v7 = vsub.s32 %v422_v2, %v424_v3 }
  0xa8   :  { %v93_v10 = vsub.f32 %v79_v1, %v91_v8  ;;  %v96_v11 = vsel %vm82_vm0, %v94_v9, 0.0  ;;  %v453_v1 = vunpack.c.l.s4 %v7574_v0 }
  0xa9   :  { %97 = vadd.xlane.f32.xlu1 %v96_v11 }
  0xaa   :  { %v95_v12 = vmul.f32 %v93_v10, %v93_v10 }
  0xac   :  { %v99_v13 = vsel %vm82_vm0, %v95_v12, 0.0 }
  0xad   :  { %100 = vadd.xlane.f32.xlu1 %v99_v13 }
 0x136   :  { %v98_v29 = vpop.xlane.xlu1 %97 }
 0x137   :  { %v102_v30 = vmul.f32 0.03125, %v98_v29 }
 0x139   :  { %v104_v31 = vadd.f32 1e-12, %v102_v30 }
 0x13a   :  { %v101_v32 = vpop.xlane.xlu1 %100 }
 0x13b   :  { %7442 = vrsqrt.f32 %v104_v31  ;;  %v103_v33 = vmul.f32 0.03125, %v101_v32 }
 0x13d   :  { %v105_v34 = vadd.f32 1e-12, %v103_v33 }
 0x13f   :  { %7444 = vrsqrt.f32 %v105_v34 }
 0x145   :  { %v7443_v35 = vpop.eup %7442 }
 0x146   :  { %v108_v37 = vmul.f32 %v7443_v35, %v92_v6  ;;  %v454_v6 = vunpack.c.0.s8 %v453_v1 }
 0x148   :  { %v116_v39 = vmul.f32 %v6646_v36, %v108_v37  ;;  %v7818_v14 = vsub.s32 %v454_v6, %v424_v3 }
 0x149   :  { %v7445_v40 = vpop.eup %7444 }
 0x14a   :  { %v7751_v41 = vadd.f32 %v6647_v38, %v116_v39  ;;  %v109_v42 = vmul.f32 %v7445_v40, %v93_v10 }
 0x14c   :  { %6984 = vmatprep.mubr.msk.f32.mxu0 %vm82_vm0, %v7751_v41  ;;  %6995 = vmatprep.mubr.msk.f32.mxu1 %vm82_vm0, %v7751_v41  ;;  %v117_v45 = vmul.f32 %v6646_v36, %v109_v42 }
 0x14e   :  { %v7763_v46 = vadd.f32 %v6647_v38, %v117_v45 }
 0x150   :  { %6985 = vmatmul.mubr.msk.f32.vlgmr.msra.gmra.mrb[0].mxu0 %vm82_vm0, %v7763_v46  ;;  %6996 = vmatmul.mubr.msk.f32.vlgmr.msra.gmra.mrb[0].mxu1 %vm82_vm0, %v7763_v46 }
 0x151   :  { %7325 = vmatpush3.bf16.msra.mxu0 %v7322_v28  ;;  %7006 = vmatprep.mubr.msk.f32.mxu0 %vm82_vm0, %v7751_v41 }
 0x152   :  { %7327 = vmatprep.subr.bf16.mxu0 %v7326_v47  ;;  %7011 = vmatprep.mubr.msk.f32.mxu1 %vm7572_vm1, %v7571_v59 }
 0x155   :  { %7329 = vmatpush3.bf16.msra.mxu0 %v7326_v47 }
 0x156   :  { %7019 = vmatprep.subr.mxu0 %v7571_v59 }
 0x158   :  { %7007 = vmatmul.mubr.msk.f32.vlgmr.msra.gmra.mrb[2].mxu0 %vm82_vm0, %v7763_v46 }
 0x159   :  { %7021 = vmatprep.mubr.msk.f32.mxu0 %vm7572_vm1, %v7571_v59 }
 0x223   :  { %v6986_v49 = vpop.f32.mrb[0].mxu0  ;;  %v6997_v50 = vpop.f32.mrb[0].mxu1 }
 0x224   :  { %v217_v51 = vpop.f32.mrb[1].mxu0  ;;  %v303_v52 = vpop.f32.mrb[1].mxu1  ;;  %v7790_v58 = vadd.f32 %v6997_v50, %v6651_v48  ;;  %v7802_v60 = vadd.f32 %v6986_v49, %v6648_v54 }
 0x225   :  { %v304_v53 = vadd.f32 %v6651_v48, %v303_v52  ;;  %v7781_v55 = vadd.f32 %v6648_v54, %v217_v51 }
 0x227   :  { %698 = vrot.lane.b32.xlu1 %v304_v53, %s8866_s6  ;;  %692 = vrot.lane.b32.xlu0 %v304_v53, %s8868_s2 }
 0x22b   :  { %v7783_v56 = vpop.f32.mrb[2].mxu0  ;;  %704 = vrot.lane.b32.xlu1 %v304_v53, %s8858_s29  ;;  %406 = vrot.lane.b32.xlu0 %v7781_v55, %s8866_s6 }
 0x22c   :  { %v7788_v57 = vpop.f32.mrb[3].mxu0 }
 0x22f   :  { %694 = vrot.lane.b32.xlu0 %v7790_v58, %s8868_s2  ;;  %400 = vrot.lane.b32.xlu1 %v7781_v55, %s8868_s2 }
 0x233   :  { %706 = vrot.lane.b32.xlu0 %v7790_v58, %s8858_s29  ;;  %412 = vrot.lane.b32.xlu1 %v7781_v55, %s8858_s29 }
 0x237   :  { %408 = vrot.lane.b32.xlu0 %v7802_v60, %s8866_s6  ;;  %700 = vrot.lane.b32.xlu1 %v7790_v58, %s8866_s6 }
 0x23b   :  { %402 = vrot.lane.b32.xlu1 %v7802_v60, %s8868_s2 }
 0x23f   :  { %414 = vrot.lane.b32.xlu1 %v7802_v60, %s8858_s29 }
 0x299   :  { %v699_v4 = vpop.permute.xlu1 %698  ;;  %v693_v5 = vpop.permute.xlu0 %692 }
 0x29a   :  { %v710_v8 = vcombine.low %v304_v53, %v699_v4  ;;  %v711_v9 = vcombine.high %v304_v53, %v699_v4 }
 0x29c   :  { %v718_v15 = vrot.slane %v710_v8, %v7816_v7  ;;  %v725_v16 = vrot.slane %v711_v9, %v7816_v7 }
 0x29d   :  { %v705_v10 = vpop.permute.xlu1 %704  ;;  %v407_v11 = vpop.permute.xlu0 %406 }
 0x29e   :  { %v726_v12 = vcombine.low %v693_v5, %v705_v10  ;;  %v727_v13 = vcombine.high %v693_v5, %v705_v10  ;;  %v418_v29 = vcombine.low %v7781_v55, %v407_v11  ;;  %v419_v30 = vcombine.high %v7781_v55, %v407_v11 }
 0x2a0   :  { %v734_v17 = vrot.slane %v726_v12, %v7816_v7  ;;  %v741_v18 = vrot.slane %v727_v13, %v7816_v7  ;;  %v426_v47 = vrot.slane %v418_v29, %v7816_v7  ;;  %v433_v48 = vrot.slane %v419_v30, %v7816_v7 }
 0x2a1   :  { %v695_v19 = vpop.permute.xlu0 %694  ;;  %v401_v20 = vpop.permute.xlu1 %400 }
 0x2a2   :  { %v742_v21 = vcombine.low %v718_v15, %v734_v17  ;;  %v743_v22 = vcombine.high %v718_v15, %v734_v17  ;;  %v758_v23 = vcombine.low %v725_v16, %v741_v18  ;;  %v759_v24 = vcombine.high %v725_v16, %v741_v18 }
 0x2a4   :  { %v750_v25 = vrot.slane %v742_v21, %v7818_v14  ;;  %v757_v26 = vrot.slane %v743_v22, %v7818_v14  ;;  %v766_v27 = vrot.slane %v758_v23, %v7818_v14  ;;  %v773_v28 = vrot.slane %v759_v24, %v7818_v14 }
 0x2a5   :  { %v707_v31 = vpop.permute.xlu0 %706  ;;  %v413_v32 = vpop.permute.xlu1 %412 }
 0x2a6   :  { %v846_v33 = vcombine.low %v750_v25, %v757_v26  ;;  %v6661_v34 = vcombine.high %v750_v25, %v757_v26  ;;  %v862_v35 = vcombine.low %v766_v27, %v773_v28  ;;  %v6662_v36 = vcombine.high %v766_v27, %v773_v28 }
 0x2a7   :  { %v794_v37 = vcombine.low %v695_v19, %v707_v31  ;;  %v795_v38 = vcombine.high %v695_v19, %v707_v31  ;;  %v434_v39 = vcombine.low %v401_v20, %v413_v32  ;;  %v435_v40 = vcombine.high %v401_v20, %v413_v32 }
 0x2a8   :  { %v853_v42 = vrot.slane %v846_v33, %v7816_v7  ;;  %v861_v43 = vrot.slane %v6661_v34, %v7816_v7  ;;  %v869_v44 = vrot.slane %v862_v35, %v7816_v7  ;;  %v877_v45 = vrot.slane %v6662_v36, %v7816_v7 }
 0x2a9   :  { %v442_v49 = vrot.slane %v434_v39, %v7816_v7  ;;  %v449_v50 = vrot.slane %v435_v40, %v7816_v7  ;;  %v701_v51 = vpop.permute.xlu1 %700  ;;  %v802_v54 = vrot.slane %v794_v37, %v7816_v7  ;;  %v809_v55 = vrot.slane %v795_v38, %v7816_v7  ;;  %v409_v1 = vpop.permute.xlu0 %408 }
 0x2aa   :  { %v878_v52 = vcombine.low %v853_v42, %v861_v43  ;;  %v879_v53 = vcombine.high %v853_v42, %v861_v43  ;;  %v894_v2 = vcombine.low %v869_v44, %v877_v45  ;;  %v895_v3 = vcombine.high %v869_v44, %v877_v45 }
 0x2ab   :  { %v450_v61 = vcombine.low %v426_v47, %v442_v49  ;;  %v451_v62 = vcombine.high %v426_v47, %v442_v49  ;;  %v466_v63 = vcombine.low %v433_v48, %v449_v50  ;;  %v467_v0 = vcombine.high %v433_v48, %v449_v50 }
 0x2ac   :  { %v778_v4 = vcombine.low %v7790_v58, %v701_v51  ;;  %v779_v5 = vcombine.high %v7790_v58, %v701_v51  ;;  %v486_v11 = vcombine.low %v7802_v60, %v409_v1  ;;  %v487_v12 = vcombine.high %v7802_v60, %v409_v1 }
 0x2ad   :  { %v458_v6 = vrot.slane %v450_v61, %v7818_v14  ;;  %v465_v8 = vrot.slane %v451_v62, %v7818_v14  ;;  %v474_v9 = vrot.slane %v466_v63, %v7818_v14  ;;  %v481_v10 = vrot.slane %v467_v0, %v7818_v14  ;;  %v403_v16 = vpop.permute.xlu1 %402 }
 0x2ae   :  { %v786_v13 = vrot.slane %v778_v4, %v7816_v7  ;;  %v793_v15 = vrot.slane %v779_v5, %v7816_v7  ;;  %v886_v40 = vrot.slane %v878_v52, %v7818_v14  ;;  %v902_v42 = vrot.slane %v894_v2, %v7818_v14 }
 0x2af   :  { %v554_v17 = vcombine.low %v458_v6, %v465_v8  ;;  %v6657_v58 = vcombine.high %v458_v6, %v465_v8  ;;  %v570_v18 = vcombine.low %v474_v9, %v481_v10  ;;  %v6658_v19 = vcombine.high %v474_v9, %v481_v10 }
 0x2b0   :  { %v810_v20 = vcombine.low %v786_v13, %v802_v54  ;;  %v811_v21 = vcombine.high %v786_v13, %v802_v54  ;;  %v826_v22 = vcombine.low %v793_v15, %v809_v55  ;;  %v827_v23 = vcombine.high %v793_v15, %v809_v55 }
 0x2b1   :  { %v561_v24 = vrot.slane %v554_v17, %v7816_v7  ;;  %v569_v25 = vrot.slane %v6657_v58, %v7816_v7  ;;  %v577_v60 = vrot.slane %v570_v18, %v7816_v7  ;;  %v585_v26 = vrot.slane %v6658_v19, %v7816_v7  ;;  %v415_v39 = vpop.permute.xlu1 %414 }
 0x2b2   :  { %v818_v27 = vrot.slane %v810_v20, %v7818_v14  ;;  %v825_v28 = vrot.slane %v811_v21, %v7818_v14  ;;  %v834_v29 = vrot.slane %v826_v22, %v7818_v14  ;;  %v841_v30 = vrot.slane %v827_v23, %v7818_v14 }
 0x2b3   :  { %v586_v31 = vcombine.low %v561_v24, %v569_v25  ;;  %v587_v32 = vcombine.high %v561_v24, %v569_v25  ;;  %v602_v33 = vcombine.low %v577_v60, %v585_v26  ;;  %v603_v34 = vcombine.high %v577_v60, %v585_v26 }
 0x2b4   :  { %v914_v35 = vcombine.low %v818_v27, %v825_v28  ;;  %v6663_v36 = vcombine.high %v818_v27, %v825_v28  ;;  %v930_v37 = vcombine.low %v834_v29, %v841_v30  ;;  %v6664_v38 = vcombine.high %v834_v29, %v841_v30 }
 0x2b5   :  { %v7861_v43 = vrot.slane %v879_v53, %v7818_v14  ;;  %v909_v44 = vrot.slane %v895_v3, %v7818_v14  ;;  %v910_v50 = vcombine.low %v886_v40, %v902_v42  ;;  %v502_v52 = vcombine.low %v403_v16, %v415_v39 }
 0x2b6   :  { %v7865_v45 = vrot.slane %v914_v35, %v7816_v7  ;;  %v7868_v47 = vrot.slane %v6663_v36, %v7816_v7  ;;  %v7871_v48 = vrot.slane %v930_v37, %v7816_v7  ;;  %v7874_v49 = vrot.slane %v6664_v38, %v7816_v7 }
 0x2b7   :  { %v912_v51 = vcombine.low %v7861_v43, %v909_v44  ;;  %v503_v53 = vcombine.high %v403_v16, %v415_v39  ;;  %v494_v54 = vrot.slane %v486_v11, %v7816_v7  ;;  %v501_v55 = vrot.slane %v487_v12, %v7816_v7  ;;  %7010 = vmatpush3.xpose.msk.msra.mxu1 %vm1274_vm2, %v910_v50 }
 0x2b8   :  { %v946_v61 = vcombine.low %v7865_v45, %v7868_v47  ;;  %v510_v62 = vrot.slane %v502_v52, %v7816_v7  ;;  %v594_v0 = vrot.slane %v586_v31, %v7818_v14  ;;  %v962_v1 = vcombine.low %v7871_v48, %v7874_v49  ;;  %7014 = vmatprep.subr.mxu1 %v7571_v59 }
 0x2b9   :  { %7020 = vmatpush3.xpose.msk.msra.mxu0 %vm1274_vm2, %v912_v51  ;;  %v517_v63 = vrot.slane %v503_v53, %v7816_v7  ;;  %v610_v2 = vrot.slane %v602_v33, %v7818_v14  ;;  %v601_v3 = vrot.slane %v587_v32, %v7818_v14  ;;  %v617_v4 = vrot.slane %v603_v34, %v7818_v14  ;;  %v6685_v53 = vld [vmem:[%s8890_s3] ss:$0 sm:$0xff] }
 0x2ba   :  { %v518_v5 = vcombine.low %v494_v54, %v510_v62  ;;  %v519_v6 = vcombine.high %v494_v54, %v510_v62  ;;  %7029 = vmatprep.subr.mxu0 %v7571_v59  ;;  %v947_v10 = vcombine.high %v7865_v45, %v7868_v47  ;;  %v911_v12 = vcombine.high %v886_v40, %v902_v42 }
 0x2bb   :  { %v534_v8 = vcombine.low %v501_v55, %v517_v63  ;;  %v535_v9 = vcombine.high %v501_v55, %v517_v63  ;;  %v618_v11 = vcombine.low %v594_v0, %v610_v2  ;;  %v620_v13 = vcombine.low %v601_v3, %v617_v4  ;;  %v6687_v63 = vld [vmem:[%s8890_s3 + $0x2] ss:$0 sm:$0xff] }
 0x2bc   :  { %v526_v15 = vrot.slane %v518_v5, %v7818_v14  ;;  %v533_v16 = vrot.slane %v519_v6, %v7818_v14  ;;  %v963_v18 = vcombine.high %v7871_v48, %v7874_v49  ;;  %v954_v19 = vrot.slane %v946_v61, %v7818_v14 }
 0x2bd   :  { %v542_v17 = vrot.slane %v534_v8, %v7818_v14  ;;  %v549_v58 = vrot.slane %v535_v9, %v7818_v14  ;;  %7012 = vmatmul.mubr.msk.f32.vlgmr.msra.gmra.mrb[2].mxu1 %vm1274_vm2, %v618_v11  ;;  %7022 = vmatmul.mubr.msk.f32.vlgmr.msra.gmra.mrb[4].mxu0 %vm1274_vm2, %v620_v13  ;;  %v970_v20 = vrot.slane %v962_v1, %v7818_v14 }
 0x2be   :  { %v622_v21 = vcombine.low %v526_v15, %v533_v16  ;;  %v6659_v22 = vcombine.high %v526_v15, %v533_v16  ;;  %7015 = vmatpush3.xpose.msk.msra.mxu1 %vm1274_vm2, %v911_v12  ;;  %7016 = vmatprep.mubr.msk.f32.mxu1 %vm7572_vm1, %v7571_v59  ;;  %v619_v25 = vcombine.high %v594_v0, %v610_v2  ;;  %v6686_v2 = vld [vmem:[%s8890_s3 + $0x1] ss:$0 sm:$0xff]  ;;  %v6689_v15 = vld [vmem:[%s8890_s3 + $0x4] ss:$0 sm:$0xff] }
 0x2bf   :  { %v638_v23 = vcombine.low %v542_v17, %v549_v58  ;;  %v6660_v24 = vcombine.high %v542_v17, %v549_v58  ;;  %7024 = vmatprep.subr.mxu1 %v7571_v59  ;;  %v913_v60 = vcombine.high %v7861_v43, %v909_v44  ;;  %v978_v26 = vcombine.low %v954_v19, %v970_v20 }
 0x2c0   :  { %v629_v27 = vrot.slane %v622_v21, %v7816_v7  ;;  %v637_v28 = vrot.slane %v6659_v22, %v7816_v7  ;;  %7031 = vmatprep.mubr.msk.f32.mxu0 %vm7572_vm1, %v7571_v59  ;;  %v621_v35 = vcombine.high %v601_v3, %v617_v4  ;;  %v961_v36 = vrot.slane %v947_v10, %v7818_v14 }
 0x2c1   :  { %v645_v29 = vrot.slane %v638_v23, %v7816_v7  ;;  %v653_v30 = vrot.slane %v6660_v24, %v7816_v7  ;;  %7017 = vmatmul.mubr.msk.f32.vlgmr.msra.gmra.mrb[4].mxu1 %vm1274_vm2, %v619_v25  ;;  %7030 = vmatpush3.xpose.msk.msra.mxu0 %vm1274_vm2, %v978_v26  ;;  %v977_v37 = vrot.slane %v963_v18, %v7818_v14 }
 0x2c2   :  { %v654_v31 = vcombine.low %v629_v27, %v637_v28  ;;  %v655_v32 = vcombine.high %v629_v27, %v637_v28  ;;  %7025 = vmatpush3.xpose.msk.msra.mxu1 %vm1274_vm2, %v913_v60  ;;  %7026 = vmatprep.mubr.msk.f32.mxu1 %vm7572_vm1, %v7571_v59  ;;  %v979_v38 = vcombine.high %v954_v19, %v970_v20  ;;  %v6688_v20 = vld [vmem:[%s8890_s3 + $0x3] ss:$0 sm:$0xff]  ;;  %v6691_v28 = vld [vmem:[%s8890_s3 + $0x6] ss:$0 sm:$0xff] }
 0x2c3   :  { %v670_v33 = vcombine.low %v645_v29, %v653_v30  ;;  %v671_v34 = vcombine.high %v645_v29, %v653_v30  ;;  %7034 = vmatprep.subr.mxu1 %v7571_v59  ;;  %7039 = vmatprep.subr.mxu0 %v7571_v59  ;;  %v980_v47 = vcombine.low %v961_v36, %v977_v37 }
 0x2c4   :  { %v662_v39 = vrot.slane %v654_v31, %v7818_v14  ;;  %v669_v42 = vrot.slane %v655_v32, %v7818_v14  ;;  %v981_v48 = vcombine.high %v961_v36, %v977_v37  ;;  %v6654_v31 = vld [vmem:[%s8835_s9] ss:$0 sm:$0xff] }
 0x2c5   :  { %v678_v40 = vrot.slane %v670_v33, %v7818_v14  ;;  %7027 = vmatmul.mubr.msk.f32.vlgmr.msra.gmra.mrb[6].mxu1 %vm1274_vm2, %v621_v35  ;;  %v685_v45 = vrot.slane %v671_v34, %v7818_v14  ;;  %v390_v33 = vadd.f32 %v6654_v31, %v7788_v57  ;;  %v6690_v35 = vld [vmem:[%s8890_s3 + $0x5] ss:$0 sm:$0xff] }
 0x2c6   :  { %7035 = vmatpush3.xpose.msk.msra.mxu1 %vm1274_vm2, %v979_v38  ;;  %7036 = vmatprep.mubr.msk.f32.mxu1 %vm7572_vm1, %v7571_v59  ;;  %v6692_v38 = vld [vmem:[%s8890_s3 + $0x7] ss:$0 sm:$0xff] }
 0x2c7   :  { %v686_v43 = vcombine.low %v662_v39, %v678_v40  ;;  %v687_v44 = vcombine.high %v662_v39, %v678_v40  ;;  %7044 = vmatprep.subr.mxu1 %v7571_v59  ;;  %v688_v49 = vcombine.low %v669_v42, %v685_v45  ;;  %v689_v50 = vcombine.high %v669_v42, %v685_v45 }
 0x2c8   :  { %v7996_v42 = vadd.f32 %v7783_v56, %v6654_v31 }
 0x2c9   :  { %7032 = vmatmul.mubr.msk.f32.vlgmr.msra.gmra.mrb[6].mxu0 %vm1274_vm2, %v686_v43  ;;  %7037 = vmatmul.mubr.msk.f32.vlgmr.msra.gmra.mrb[8].mxu1 %vm1274_vm2, %v687_v44 }
 0x2ca   :  { %7040 = vmatpush3.xpose.msk.msra.mxu0 %vm1274_vm2, %v980_v47  ;;  %7045 = vmatpush3.xpose.msk.msra.mxu1 %vm1274_vm2, %v981_v48 }
 0x2cb   :  { %7041 = vmatprep.mubr.msk.f32.mxu0 %vm7572_vm1, %v7571_v59  ;;  %7046 = vmatprep.mubr.msk.f32.mxu1 %vm7572_vm1, %v7571_v59 }
 0x2cc   :  { %7049 = vmatprep.subr.mxu0 %v7571_v59  ;;  %7054 = vmatprep.subr.mxu1 %v7571_v59 }
 0x2cd   :  { %7042 = vmatmul.mubr.msk.f32.vlgmr.msra.gmra.mrb[8].mxu0 %vm1274_vm2, %v688_v49  ;;  %7047 = vmatmul.mubr.msk.f32.vlgmr.msra.gmra.mrb[10].mxu1 %vm1274_vm2, %v689_v50 }
 0x2ce   :  { %7051 = vmatprep.mubr.msk.f32.mxu0 %vm7572_vm1, %v7571_v59  ;;  %7056 = vmatprep.mubr.msk.f32.mxu1 %vm7572_vm1, %v7571_v59 }
 0x390   :  { %v1347_v51 = vpop.f32.mrb[2].mxu1  ;;  %v1499_v52 = vpop.f32.mrb[4].mxu0 }
 0x391   :  { %v1883_v54 = vmul.f32 0.35355338, %v1347_v51  ;;  %v1885_v55 = vmul.f32 0.35355338, %v1499_v52  ;;  %v7013_v61 = vpop.f32.mrb[3].mxu1  ;;  %v7023_v62 = vpop.f32.mrb[5].mxu0 }
 0x393   :  { %v1939_v0 = vadd.f32 %v6685_v53, %v1883_v54  ;;  %v1941_v6 = vadd.f32 %v6687_v63, %v1885_v55 }
 0x394   :  { %v1423_v1 = vpop.f32.mrb[4].mxu1 }
 0x395   :  { %v1884_v3 = vmul.f32 0.35355338, %v1423_v1  ;;  %v7018_v4 = vpop.f32.mrb[5].mxu1  ;;  %v1947_v5 = vsel %vm1274_vm2, %v1939_v0, -inf  ;;  %v1953_v11 = vsel %vm1274_vm2, %v1941_v6, -inf }
 0x396   :  { %1948 = vmax.xlane.f32.xlu0 %v1947_v5 }
 0x397   :  { %v1940_v8 = vadd.f32 %v6686_v2, %v1884_v3 }
 0x398   :  { %v1575_v9 = vpop.f32.mrb[6].mxu1 }
 0x399   :  { %v7028_v10 = vpop.f32.mrb[7].mxu1  ;;  %v1950_v12 = vsel %vm1274_vm2, %v1940_v8, -inf  ;;  %v1886_v16 = vmul.f32 0.35355338, %v1575_v9 }
 0x39a   :  { %1954 = vmax.xlane.f32.xlu0 %v1953_v11  ;;  %1951 = vmax.xlane.f32.xlu1 %v1950_v12 }
 0x39b   :  { %v1942_v26 = vadd.f32 %v6688_v20, %v1886_v16 }
 0x39c   :  { %v1651_v13 = vpop.f32.mrb[6].mxu0  ;;  %v1727_v58 = vpop.f32.mrb[8].mxu1 }
 0x39d   :  { %v1887_v17 = vmul.f32 0.35355338, %v1651_v13  ;;  %v7033_v18 = vpop.f32.mrb[7].mxu0  ;;  %v7038_v19 = vpop.f32.mrb[9].mxu1  ;;  %v1956_v29 = vsel %vm1274_vm2, %v1942_v26, -inf }
 0x39e   :  { %v1888_v34 = vmul.f32 0.35355338, %v1727_v58 }
 0x39f   :  { %v1943_v21 = vadd.f32 %v6689_v15, %v1887_v17 }
 0x3a0   :  { %v1803_v22 = vpop.f32.mrb[8].mxu0  ;;  %v1879_v24 = vpop.f32.mrb[10].mxu1  ;;  %v7984_v37 = vadd.f32 %v6690_v35, %v1888_v34 }
 0x3a1   :  { %v1889_v23 = vmul.f32 0.35355338, %v1803_v22  ;;  %v7043_v25 = vpop.f32.mrb[9].mxu0  ;;  %v1959_v60 = vsel %vm1274_vm2, %v1943_v21, -inf  ;;  %v7048_v27 = vpop.f32.mrb[11].mxu1 }
 0x3a2   :  { %1960 = vmax.xlane.f32.xlu0 %v1959_v60  ;;  %v1890_v36 = vmul.f32 0.35355338, %v1879_v24  ;;  %v1962_v57 = vsel %vm1274_vm2, %v7984_v37, -inf }
 0x3a3   :  { %v1945_v30 = vadd.f32 %v6691_v28, %v1889_v23 }
 0x3a4   :  { %v7991_v39 = vadd.f32 %v6692_v38, %v1890_v36 }
 0x3a5   :  { %v1965_v32 = vsel %vm1274_vm2, %v1945_v30, -inf }
 0x3a6   :  { %1957 = vmax.xlane.f32.xlu0 %v1956_v29  ;;  %v1968_v40 = vsel %vm1274_vm2, %v7991_v39, -inf }
 0x3aa   :  { %1966 = vmax.xlane.f32.xlu0 %v1965_v32 }
 0x3ab   :  { %990 = vrot.lane.b32.xlu1 %v390_v33, %s8866_s6 }
 0x3af   :  { %996 = vrot.lane.b32.xlu1 %v390_v33, %s8858_s29 }
 0x3c0   :  { %984 = vrot.lane.b32.xlu0 %v390_v33, %s8868_s2 }
 0x3d3   :  { %1963 = vmax.xlane.f32.xlu1 %v1962_v57 }
 0x3d7   :  { %1969 = vmax.xlane.f32.xlu1 %v1968_v40 }
 0x3e8   :  { %986 = vrot.lane.b32.xlu1 %v7996_v42, %s8868_s2  ;;  %s8892_s2 = smov 112  }
 0x423   :  { %v1949_v43 = vpop.xlane.xlu0 %1948 }
 0x424   :  { %v1971_v44 = vsub.f32 %v1939_v0, %v1949_v43 }
 0x426   :  { %v1979_v45 = vmul.f32 1.442695, %v1971_v44 }
 0x427   :  { %v1955_v47 = vpop.xlane.xlu0 %1954  ;;  %v1952_v48 = vpop.xlane.xlu1 %1951 }
 0x428   :  { %7446 = vpow2.f32 %v1979_v45  ;;  %v1973_v49 = vsub.f32 %v1941_v6, %v1955_v47  ;;  %v1972_v50 = vsub.f32 %v1940_v8, %v1952_v48 }
 0x42a   :  { %v1983_v51 = vmul.f32 1.442695, %v1973_v49  ;;  %v1981_v52 = vmul.f32 1.442695, %v1972_v50 }
 0x42b   :  { %v991_v0 = vpop.permute.xlu1 %990 }
 0x42c   :  { %7448 = vpow2.f32 %v1983_v51  ;;  %v1002_v9 = vcombine.low %v390_v33, %v991_v0  ;;  %v1003_v10 = vcombine.high %v390_v33, %v991_v0 }
 0x42d   :  { %7450 = vpow2.f32 %v1981_v52 }
 0x42e   :  { %v1010_v58 = vrot.slane %v1002_v9, %v7816_v7  ;;  %v1017_v18 = vrot.slane %v1003_v10, %v7816_v7 }
 0x42f   :  { %v1961_v53 = vpop.xlane.xlu0 %1960  ;;  %v997_v12 = vpop.permute.xlu1 %996 }
 0x430   :  { %v1975_v54 = vsub.f32 %v1943_v21, %v1961_v53 }
 0x432   :  { %v1987_v55 = vmul.f32 1.442695, %v1975_v54  ;;  %v8000_v56 = vpop.eup %7446 }
 0x433   :  { %v1958_v61 = vpop.xlane.xlu0 %1957  ;;  %v1995_v63 = vsel %vm1274_vm2, %v8000_v56, 0.0 }
 0x434   :  { %7452 = vpow2.f32 %v1987_v55  ;;  %v1974_v62 = vsub.f32 %v1942_v26, %v1958_v61  ;;  %1996 = vadd.xlane.f32.xlu0 %v1995_v63 }
 0x436   :  { %v1985_v1 = vmul.f32 1.442695, %v1974_v62  ;;  %v8004_v2 = vpop.eup %7448 }
 0x437   :  { %v1967_v3 = vpop.xlane.xlu0 %1966  ;;  %v8006_v4 = vpop.eup %7450  ;;  %v2001_v6 = vsel %vm1274_vm2, %v8004_v2, 0.0 }
 0x438   :  { %7454 = vpow2.f32 %v1985_v1  ;;  %v1977_v5 = vsub.f32 %v1945_v30, %v1967_v3  ;;  %2002 = vadd.xlane.f32.xlu0 %v2001_v6  ;;  %v1998_v8 = vsel %vm1274_vm2, %v8006_v4, 0.0 }
 0x439   :  { %1999 = vadd.xlane.f32.xlu1 %v1998_v8 }
 0x43a   :  { %v1991_v11 = vmul.f32 1.442695, %v1977_v5 }
 0x43b   :  { %v985_v13 = vpop.permute.xlu0 %984 }
 0x43c   :  { %7456 = vpow2.f32 %v1991_v11  ;;  %v1018_v15 = vcombine.low %v985_v13, %v997_v12  ;;  %v1019_v16 = vcombine.high %v985_v13, %v997_v12 }
 0x43e   :  { %v8012_v17 = vpop.eup %7452  ;;  %v1026_v19 = vrot.slane %v1018_v15, %v7816_v7  ;;  %v1033_v20 = vrot.slane %v1019_v16, %v7816_v7 }
 0x43f   :  { %v2007_v21 = vsel %vm1274_vm2, %v8012_v17, 0.0 }
 0x440   :  { %v1034_v22 = vcombine.low %v1010_v58, %v1026_v19  ;;  %v1035_v23 = vcombine.high %v1010_v58, %v1026_v19  ;;  %v1050_v24 = vcombine.low %v1017_v18, %v1033_v20  ;;  %v1051_v25 = vcombine.high %v1017_v18, %v1033_v20  ;;  %2008 = vadd.xlane.f32.xlu1 %v2007_v21 }
 0x442   :  { %v8020_v60 = vpop.eup %7454  ;;  %v1042_v26 = vrot.slane %v1034_v22, %v7818_v14  ;;  %v1049_v27 = vrot.slane %v1035_v23, %v7818_v14  ;;  %v1058_v28 = vrot.slane %v1050_v24, %v7818_v14  ;;  %v1065_v29 = vrot.slane %v1051_v25, %v7818_v14 }
 0x443   :  { %v2004_v30 = vsel %vm1274_vm2, %v8020_v60, 0.0 }
 0x444   :  { %v1138_v31 = vcombine.low %v1042_v26, %v1049_v27  ;;  %v6665_v32 = vcombine.high %v1042_v26, %v1049_v27  ;;  %v1154_v33 = vcombine.low %v1058_v28, %v1065_v29  ;;  %v6666_v34 = vcombine.high %v1058_v28, %v1065_v29  ;;  %2005 = vadd.xlane.f32.xlu1 %v2004_v30 }
 0x446   :  { %v8028_v35 = vpop.eup %7456  ;;  %v1145_v36 = vrot.slane %v1138_v31, %v7816_v7  ;;  %v1153_v38 = vrot.slane %v6665_v32, %v7816_v7  ;;  %v1161_v57 = vrot.slane %v1154_v33, %v7816_v7  ;;  %v1169_v40 = vrot.slane %v6666_v34, %v7816_v7 }
 0x447   :  { %v2013_v43 = vsel %vm1274_vm2, %v8028_v35, 0.0 }
 0x448   :  { %2014 = vadd.xlane.f32.xlu0 %v2013_v43  ;;  %v1170_v44 = vcombine.low %v1145_v36, %v1153_v38  ;;  %v1186_v45 = vcombine.low %v1161_v57, %v1169_v40  ;;  %v1171_v47 = vcombine.high %v1145_v36, %v1153_v38  ;;  %v1187_v48 = vcombine.high %v1161_v57, %v1169_v40 }
 0x44a   :  { %v1178_v49 = vrot.slane %v1170_v44, %v7818_v14  ;;  %v1194_v50 = vrot.slane %v1186_v45, %v7818_v14  ;;  %v1185_v51 = vrot.slane %v1171_v47, %v7818_v14  ;;  %v1201_v52 = vrot.slane %v1187_v48, %v7818_v14 }
 0x44c   :  { %v1202_v53 = vcombine.low %v1178_v49, %v1194_v50  ;;  %v1203_v54 = vcombine.high %v1178_v49, %v1194_v50  ;;  %v1204_v55 = vcombine.low %v1185_v51, %v1201_v52  ;;  %v1205_v61 = vcombine.high %v1185_v51, %v1201_v52 }
 0x44e   :  { %7050 = vmatpush3.msra.mxu0 %v1202_v53  ;;  %7055 = vmatpush3.msra.mxu1 %v1203_v54 }
 0x44f   :  { %7059 = vmatprep.subr.mxu0 %v7571_v59  ;;  %7064 = vmatprep.subr.mxu1 %v7571_v59 }
 0x455   :  { %998 = vrot.lane.b32.xlu1 %v7996_v42, %s8858_s29 }
 0x460   :  { %v1964_v62 = vpop.xlane.xlu1 %1963 }
 0x461   :  { %v1976_v63 = vsub.f32 %v7984_v37, %v1964_v62 }
 0x463   :  { %v1989_v0 = vmul.f32 1.442695, %v1976_v63 }
 0x464   :  { %v1970_v1 = vpop.xlane.xlu1 %1969 }
 0x465   :  { %7458 = vpow2.f32 %v1989_v0  ;;  %v1978_v3 = vsub.f32 %v7991_v39, %v1970_v1 }
 0x467   :  { %v1993_v5 = vmul.f32 1.442695, %v1978_v3 }
 0x468   :  { %v987_v11 = vpop.permute.xlu1 %986 }
 0x469   :  { %7460 = vpow2.f32 %v1993_v5 }
 0x46f   :  { %v8046_v6 = vpop.eup %7458 }
 0x470   :  { %v2010_v8 = vsel %vm1274_vm2, %v8046_v6, 0.0 }
 0x471   :  { %2011 = vadd.xlane.f32.xlu0 %v2010_v8 }
 0x473   :  { %v8050_v9 = vpop.eup %7460 }
 0x474   :  { %v2016_v10 = vsel %vm1274_vm2, %v8050_v9, 0.0 }
 0x475   :  { %2017 = vadd.xlane.f32.xlu0 %v2016_v10 }
 0x48b   :  { %992 = vrot.lane.b32.xlu0 %v7996_v42, %s8866_s6  ;;  %s8897_s6 = sld [smem:[#allocation14_spill]] }
 0x4c1   :  { %v1997_v37 = vpop.xlane.xlu0 %1996 }
 0x4c2   :  { %7462 = vrcp.f32 %v1997_v37 }
 0x4c5   :  { %v2003_v39 = vpop.xlane.xlu0 %2002 }
 0x4c6   :  { %7464 = vrcp.f32 %v2003_v39  ;;  %v2000_v12 = vpop.xlane.xlu1 %1999 }
 0x4c7   :  { %7466 = vrcp.f32 %v2000_v12 }
 0x4cc   :  { %v7463_v13 = vpop.eup %7462 }
 0x4cd   :  { %v2009_v15 = vpop.xlane.xlu1 %2008  ;;  %v2020_v16 = vmul.f32 %v7463_v13, %v8000_v56 }
 0x4cf   :  { %7052 = vmatmul.mubr.msk.f32.vlgmr.msra.gmra.mrb[10].mxu0 %vm1274_vm2, %v2020_v16 }
 0x4d0   :  { %v7465_v58 = vpop.eup %7464  ;;  %7060 = vmatpush3.msra.mxu0 %v1204_v55  ;;  %7061 = vmatprep.mubr.msk.f32.mxu0 %vm7572_vm1, %v7571_v59 }
 0x4d1   :  { %v2006_v18 = vpop.xlane.xlu1 %2005  ;;  %v7467_v19 = vpop.eup %7466  ;;  %v2024_v20 = vmul.f32 %v7465_v58, %v8004_v2  ;;  %7069 = vmatprep.subr.mxu0 %v7571_v59 }
 0x4d2   :  { %7468 = vrcp.f32 %v2006_v18  ;;  %v2022_v21 = vmul.f32 %v7467_v19, %v8006_v4 }
 0x4d3   :  { %7062 = vmatmul.mubr.msk.f32.vlgmr.msra.gmra.mrb[12].mxu0 %vm1274_vm2, %v2024_v20  ;;  %7470 = vrcp.f32 %v2009_v15 }
 0x4d4   :  { %7057 = vmatmul.mubr.msk.f32.vlgmr.msra.gmra.mrb[12].mxu1 %vm1274_vm2, %v2022_v21  ;;  %7071 = vmatprep.mubr.msk.f32.mxu0 %vm7572_vm1, %v7571_v59 }
 0x4d5   :  { %7065 = vmatpush3.msra.mxu1 %v1205_v61  ;;  %7066 = vmatprep.mubr.msk.f32.mxu1 %vm7572_vm1, %v7571_v59  ;;  %v2015_v4 = vpop.xlane.xlu0 %2014  ;;  %v999_v23 = vpop.permute.xlu1 %998 }
 0x4d6   :  { %7074 = vmatprep.subr.mxu1 %v7571_v59  ;;  %v1086_v25 = vcombine.low %v987_v11, %v999_v23  ;;  %v1087_v26 = vcombine.high %v987_v11, %v999_v23 }
 0x4d8   :  { %v1094_v30 = vrot.slane %v1086_v25, %v7816_v7 }
 0x4dc   :  { %v7469_v56 = vpop.eup %7468 }
 0x4dd   :  { %v2026_v2 = vmul.f32 %v7469_v56, %v8020_v60  ;;  %v1101_v60 = vrot.slane %v1087_v26, %v7816_v7  ;;  %v7471_v53 = vpop.eup %7470 }
 0x4de   :  { %v2028_v39 = vmul.f32 %v7471_v53, %v8012_v17 }
 0x4df   :  { %7067 = vmatmul.mubr.msk.f32.vlgmr.msra.gmra.mrb[14].mxu1 %vm1274_vm2, %v2026_v2 }
 0x4e0   :  { %7076 = vmatprep.mubr.msk.f32.mxu1 %vm7572_vm1, %v7571_v59 }
 0x4fe   :  { %v2012_v22 = vpop.xlane.xlu0 %2011 }
 0x4ff   :  { %7472 = vrcp.f32 %v2012_v22 }
 0x500   :  { %7474 = vrcp.f32 %v2015_v4 }
 0x502   :  { %v2018_v24 = vpop.xlane.xlu0 %2017 }
 0x503   :  { %7476 = vrcp.f32 %v2018_v24 }
 0x506   :  { %v993_v27 = vpop.permute.xlu0 %992 }
 0x507   :  { %v1070_v28 = vcombine.low %v7996_v42, %v993_v27  ;;  %v1071_v29 = vcombine.high %v7996_v42, %v993_v27 }
 0x509   :  { %v1078_v31 = vrot.slane %v1070_v28, %v7816_v7  ;;  %v1085_v32 = vrot.slane %v1071_v29, %v7816_v7  ;;  %v7473_v63 = vpop.eup %7472 }
 0x50a   :  { %v7475_v3 = vpop.eup %7474  ;;  %v2030_v12 = vmul.f32 %v7473_v63, %v8046_v6 }
 0x50b   :  { %v1102_v33 = vcombine.low %v1078_v31, %v1094_v30  ;;  %v1103_v34 = vcombine.high %v1078_v31, %v1094_v30  ;;  %v1118_v36 = vcombine.low %v1085_v32, %v1101_v60  ;;  %v1119_v38 = vcombine.high %v1085_v32, %v1101_v60 }
 0x50c   :  { %v2032_v16 = vmul.f32 %v7475_v3, %v8028_v35 }
 0x50d   :  { %v1110_v57 = vrot.slane %v1102_v33, %v7818_v14  ;;  %v1117_v40 = vrot.slane %v1103_v34, %v7818_v14  ;;  %v1126_v42 = vrot.slane %v1118_v36, %v7818_v14  ;;  %v1133_v43 = vrot.slane %v1119_v38, %v7818_v14  ;;  %v7477_v11 = vpop.eup %7476 }
 0x50e   :  { %v2034_v58 = vmul.f32 %v7477_v11, %v8050_v9 }
 0x50f   :  { %v1206_v44 = vcombine.low %v1110_v57, %v1117_v40  ;;  %v6667_v45 = vcombine.high %v1110_v57, %v1117_v40  ;;  %v1222_v47 = vcombine.low %v1126_v42, %v1133_v43  ;;  %v6668_v48 = vcombine.high %v1126_v42, %v1133_v43 }
 0x511   :  { %v1213_v49 = vrot.slane %v1206_v44, %v7816_v7  ;;  %v1221_v50 = vrot.slane %v6667_v45, %v7816_v7  ;;  %v1229_v51 = vrot.slane %v1222_v47, %v7816_v7  ;;  %v1237_v52 = vrot.slane %v6668_v48, %v7816_v7 }
 0x513   :  { %v1238_v54 = vcombine.low %v1213_v49, %v1221_v50  ;;  %v1254_v55 = vcombine.low %v1229_v51, %v1237_v52  ;;  %v1239_v61 = vcombine.high %v1213_v49, %v1221_v50  ;;  %v1255_v62 = vcombine.high %v1229_v51, %v1237_v52 }
 0x515   :  { %v1246_v0 = vrot.slane %v1238_v54, %v7818_v14  ;;  %v1262_v1 = vrot.slane %v1254_v55, %v7818_v14  ;;  %v1253_v5 = vrot.slane %v1239_v61, %v7818_v14  ;;  %v1269_v8 = vrot.slane %v1255_v62, %v7818_v14 }
 0x517   :  { %v1270_v10 = vcombine.low %v1246_v0, %v1262_v1  ;;  %v1271_v37 = vcombine.high %v1246_v0, %v1262_v1  ;;  %v1272_v13 = vcombine.low %v1253_v5, %v1269_v8  ;;  %v1273_v15 = vcombine.high %v1253_v5, %v1269_v8 }
 0x519   :  { %7070 = vmatpush3.msra.mxu0 %v1270_v10  ;;  %7075 = vmatpush3.msra.mxu1 %v1271_v37 }
 0x51a   :  { %7072 = vmatmul.mubr.msk.f32.vlgmr.msra.gmra.mrb[14].mxu0 %vm1274_vm2, %v2028_v39  ;;  %7077 = vmatmul.mubr.msk.f32.vlgmr.msra.gmra.mrb[16].mxu1 %vm1274_vm2, %v2030_v12 }
 0x51b   :  { %7079 = vmatprep.subr.mxu0 %v7571_v59  ;;  %7084 = vmatprep.subr.mxu1 %v7571_v59 }
 0x51c   :  { %7080 = vmatpush3.msra.mxu0 %v1272_v13  ;;  %7085 = vmatpush3.msra.mxu1 %v1273_v15 }
 0x51d   :  { %7081 = vmatprep.mubr.msk.f32.mxu0 %vm7572_vm1, %v7571_v59  ;;  %7086 = vmatprep.mubr.msk.f32.mxu1 %vm7572_vm1, %v7571_v59 }
 0x51e   :  { %7082 = vmatmul.mubr.msk.f32.vlgmr.msra.gmra.mrb[16].mxu0 %vm1274_vm2, %v2032_v16  ;;  %7087 = vmatmul.mubr.msk.f32.vlgmr.msra.gmra.mrb[18].mxu1 %vm1274_vm2, %v2034_v58 }
 0x5a2   :  { %v2104_v17 = vpop.f32.mrb[10].mxu0 }
 0x5a3   :  { %v7053_v6 = vpop.f32.mrb[11].mxu0 }
 0x5a6   :  { %v2250_v18 = vpop.f32.mrb[12].mxu0 }
 0x5a7   :  { %v2177_v19 = vpop.f32.mrb[12].mxu1  ;;  %v2619_v20 = vcombine.low %v2104_v17, %v2250_v18  ;;  %v2620_v35 = vcombine.high %v2104_v17, %v2250_v18  ;;  %v7063_v21 = vpop.f32.mrb[13].mxu0 }
 0x5a8   :  { %v7058_v9 = vpop.f32.mrb[13].mxu1  ;;  %v2924_v21 = vld [vmem:[%s8836_s10 + $0x8] sm:$0xff] }
 0x5a9   :  { %v2627_v23 = vrot.slane %v2619_v20, %v7816_v7  ;;  %v2634_v24 = vrot.slane %v2620_v35, %v7816_v7  ;;  %v2923_v35 = vld [vmem:[%s8836_s10] sm:$0xff] }
 0x5b2   :  { %v2323_v56 = vpop.f32.mrb[14].mxu1 }
 0x5b3   :  { %v2635_v2 = vcombine.low %v2177_v19, %v2323_v56  ;;  %v2636_v4 = vcombine.high %v2177_v19, %v2323_v56  ;;  %v7068_v22 = vpop.f32.mrb[15].mxu1 }
 0x5b4   :  { %v7330_v22 = vpack.c.bf16 %v2924_v21, %v2923_v35  ;;  %v3062_v21 = vld [vmem:[%s8840_s14 + $0x8] sm:$0xff] }
 0x5b5   :  { %v2643_v25 = vrot.slane %v2635_v2, %v7816_v7  ;;  %v2650_v26 = vrot.slane %v2636_v4, %v7816_v7 }
 0x5b6   :  { %7331 = vmatprep.subr.bf16.mxu0 %v7330_v22 }
 0x5b7   :  { %v2651_v27 = vcombine.low %v2627_v23, %v2643_v25  ;;  %v2652_v28 = vcombine.high %v2627_v23, %v2643_v25  ;;  %v2667_v29 = vcombine.low %v2634_v24, %v2650_v26  ;;  %v2668_v30 = vcombine.high %v2634_v24, %v2650_v26  ;;  %7333 = vmatpush3.bf16.msra.mxu0 %v7330_v22 }
 0x5b9   :  { %v2659_v60 = vrot.slane %v2651_v27, %v7818_v14  ;;  %v2666_v31 = vrot.slane %v2652_v28, %v7818_v14  ;;  %v2675_v32 = vrot.slane %v2667_v29, %v7818_v14  ;;  %v2682_v33 = vrot.slane %v2668_v30, %v7818_v14  ;;  %v2925_v27 = vld [vmem:[%s8836_s10 + $0x10] sm:$0xff]  ;;  %v2926_v28 = vld [vmem:[%s8836_s10 + $0x18] sm:$0xff] }
 0x5bb   :  { %v2755_v34 = vcombine.low %v2659_v60, %v2666_v31  ;;  %v6701_v36 = vcombine.high %v2659_v60, %v2666_v31  ;;  %v2771_v38 = vcombine.low %v2675_v32, %v2682_v33  ;;  %v6702_v57 = vcombine.high %v2675_v32, %v2682_v33 }
 0x5bc   :  { %v7334_v32 = vpack.c.bf16 %v2926_v28, %v2925_v27 }
 0x5bd   :  { %v2762_v40 = vrot.slane %v2755_v34, %v7816_v7  ;;  %v2770_v42 = vrot.slane %v6701_v36, %v7816_v7  ;;  %v2778_v43 = vrot.slane %v2771_v38, %v7816_v7  ;;  %v2786_v44 = vrot.slane %v6702_v57, %v7816_v7 }
 0x5be   :  { %7335 = vmatprep.subr.bf16.mxu0 %v7334_v32 }
 0x5bf   :  { %v2788_v45 = vcombine.high %v2762_v40, %v2770_v42  ;;  %v2804_v47 = vcombine.high %v2778_v43, %v2786_v44  ;;  %v2787_v48 = vcombine.low %v2762_v40, %v2770_v42  ;;  %v2803_v49 = vcombine.low %v2778_v43, %v2786_v44  ;;  %7337 = vmatpush3.bf16.msra.mxu0 %v7334_v32 }
 0x5c1   :  { %v2802_v50 = vrot.slane %v2788_v45, %v7818_v14  ;;  %v2818_v51 = vrot.slane %v2804_v47, %v7818_v14  ;;  %v8121_v52 = vrot.slane %v2787_v48, %v7818_v14  ;;  %v8124_v53 = vrot.slane %v2803_v49, %v7818_v14 }
 0x5c3   :  { %v2821_v54 = vcombine.low %v2802_v50, %v2818_v51  ;;  %v2820_v55 = vcombine.high %v8121_v52, %v8124_v53  ;;  %v2822_v61 = vcombine.high %v2802_v50, %v2818_v51  ;;  %v2819_v62 = vcombine.low %v8121_v52, %v8124_v53  ;;  %v6705_v53 = vld [vmem:[%s8837_s11] ss:$0 sm:$0xff] }
 0x5c5   :  { %2901 = vrot.lane.b32.xlu0 %v2821_v54, %s8864_s7  ;;  %2893 = vrot.lane.b32.xlu1 %v2820_v55, %s8862_s30 }
 0x5c9   :  { %2909 = vrot.lane.b32.xlu0 %v2822_v61, %s8860_s4 }
 0x5ed   :  { %v2396_v63 = vpop.f32.mrb[14].mxu0  ;;  %v2469_v0 = vpop.f32.mrb[16].mxu1 }
 0x5ee   :  { %v7073_v1 = vpop.f32.mrb[15].mxu0  ;;  %v7078_v3 = vpop.f32.mrb[17].mxu1 }
 0x5f1   :  { %v2542_v5 = vpop.f32.mrb[16].mxu0  ;;  %v2615_v8 = vpop.f32.mrb[18].mxu1 }
 0x5f2   :  { %v2687_v10 = vcombine.low %v2396_v63, %v2542_v5  ;;  %v2688_v37 = vcombine.high %v2396_v63, %v2542_v5  ;;  %v2703_v11 = vcombine.low %v2469_v0, %v2615_v8  ;;  %v2704_v39 = vcombine.high %v2469_v0, %v2615_v8  ;;  %v7083_v12 = vpop.f32.mrb[17].mxu0  ;;  %v7088_v13 = vpop.f32.mrb[19].mxu1 }
 0x5f4   :  { %v2695_v15 = vrot.slane %v2687_v10, %v7816_v7  ;;  %v2702_v16 = vrot.slane %v2688_v37, %v7816_v7  ;;  %v2711_v58 = vrot.slane %v2703_v11, %v7816_v7  ;;  %v2718_v17 = vrot.slane %v2704_v39, %v7816_v7 }
 0x5f6   :  { %v2719_v6 = vcombine.low %v2695_v15, %v2711_v58  ;;  %v2720_v18 = vcombine.high %v2695_v15, %v2711_v58  ;;  %v2735_v19 = vcombine.low %v2702_v16, %v2718_v17  ;;  %v2736_v20 = vcombine.high %v2702_v16, %v2718_v17 }
 0x5f8   :  { %v2727_v9 = vrot.slane %v2719_v6, %v7818_v14  ;;  %v2734_v56 = vrot.slane %v2720_v18, %v7818_v14  ;;  %v2743_v2 = vrot.slane %v2735_v19, %v7818_v14  ;;  %v2750_v4 = vrot.slane %v2736_v20, %v7818_v14 }
 0x5fa   :  { %v2823_v23 = vcombine.low %v2727_v9, %v2734_v56  ;;  %v6703_v24 = vcombine.high %v2727_v9, %v2734_v56  ;;  %v2839_v25 = vcombine.low %v2743_v2, %v2750_v4  ;;  %v6704_v26 = vcombine.high %v2743_v2, %v2750_v4  ;;  %v3063_v9 = vld [vmem:[%s8840_s14 + $0x10] sm:$0xff]  ;;  %v3064_v2 = vld [vmem:[%s8840_s14 + $0x18] sm:$0xff] }
 0x5fb   :  { %v7342_v4 = vpack.c.bf16 %v3064_v2, %v3063_v9 }
 0x5fc   :  { %v2830_v29 = vrot.slane %v2823_v23, %v7816_v7  ;;  %v2838_v30 = vrot.slane %v6703_v24, %v7816_v7  ;;  %v2846_v60 = vrot.slane %v2839_v25, %v7816_v7  ;;  %v2854_v31 = vrot.slane %v6704_v26, %v7816_v7 }
 0x5fe   :  { %v2855_v33 = vcombine.low %v2830_v29, %v2838_v30  ;;  %v2871_v34 = vcombine.low %v2846_v60, %v2854_v31  ;;  %v2856_v36 = vcombine.high %v2830_v29, %v2838_v30  ;;  %v2872_v38 = vcombine.high %v2846_v60, %v2854_v31  ;;  %v6708_v29 = vld [vmem:[%s8838_s12] ss:$0 sm:$0xff] }
 0x5ff   :  { %v6709_v60 = vld [vmem:[%s8839_s13] ss:$0 sm:$0xff] }
 0x600   :  { %v2863_v57 = vrot.slane %v2855_v33, %v7818_v14  ;;  %v2879_v40 = vrot.slane %v2871_v34, %v7818_v14  ;;  %v2870_v42 = vrot.slane %v2856_v36, %v7818_v14  ;;  %v2886_v43 = vrot.slane %v2872_v38, %v7818_v14 }
 0x602   :  { %v2888_v44 = vcombine.high %v2863_v57, %v2879_v40  ;;  %v2889_v45 = vcombine.low %v2870_v42, %v2886_v43  ;;  %v2890_v47 = vcombine.high %v2870_v42, %v2886_v43  ;;  %v2887_v48 = vcombine.low %v2863_v57, %v2879_v40  ;;  %v3171_v57 = vld [vmem:[%s8842_s16] sm:$0xff]  ;;  %v3172_v40 = vld [vmem:[%s8842_s16 + $0x8] sm:$0xff]  ;;  %v3173_v43 = vld [vmem:[%s8842_s16 + $0x10] sm:$0xff] }
 0x603   :  { %v7346_v42 = vpack.c.bf16 %v3172_v40, %v3171_v57 }
 0x604   :  { %2895 = vrot.lane.b32.xlu1 %v2888_v44, %s8862_s30  ;;  %v3174_v44 = vld [vmem:[%s8842_s16 + $0x18] sm:$0xff] }
 0x605   :  { %7347 = vmatprep.subr.bf16.mxu0 %v7346_v42 }
 0x608   :  { %2903 = vrot.lane.b32.xlu1 %v2889_v45, %s8864_s7  ;;  %v7350_v45 = vpack.c.bf16 %v3174_v44, %v3173_v43  ;;  %v6737_v43 = vld [vmem:[%s8885_s25 + $0x38] sm:$0xff] }
 0x60c   :  { %2911 = vrot.lane.b32.xlu1 %v2890_v47, %s8860_s4  ;;  %v3175_v47 = vld [vmem:[%s8842_s16 + $0x20] sm:$0xff]  ;;  %s8891_s4 = smov 120  }
 0x637   :  { %v2902_v49 = vpop.permute.xlu0 %2901  ;;  %v2894_v50 = vpop.permute.xlu1 %2893 }
 0x638   :  { %v2915_v51 = vsel %vm1274_vm2, %v2819_v62, %v2894_v50 }
 0x639   :  { %v2918_v55 = vsel %vm2917_vm3, %v2915_v51, %v2902_v49  ;;  %v3177_v49 = vld [vmem:[%s8842_s16 + $0x30] sm:$0xff]  ;;  %v3178_v51 = vld [vmem:[%s8842_s16 + $0x38] sm:$0xff] }
 0x63b   :  { %v2910_v54 = vpop.permute.xlu0 %2909 }
 0x63c   :  { %v2921_v61 = vsel %vm2920_vm4, %v2918_v55, %v2910_v54  ;;  %v7358_v54 = vpack.c.bf16 %v3178_v51, %v3177_v49  ;;  %v6710_v55 = vld [vmem:[%s8841_s15] ss:$0 sm:$0xff] }
 0x63d   :  { %7097 = vmatprep.mubr.msk.f32.mxu0 %vm82_vm0, %v2921_v61 }
 0x676   :  { %v2896_v63 = vpop.permute.xlu1 %2895 }
 0x677   :  { %v2916_v1 = vsel %vm1274_vm2, %v2887_v48, %v2896_v63  ;;  %v3176_v48 = vld [vmem:[%s8842_s16 + $0x28] sm:$0xff] }
 0x678   :  { %v7354_v50 = vpack.c.bf16 %v3176_v48, %v3175_v47  ;;  %v6727_v47 = vld [vmem:[%s8884_s8 + $0x28] sm:$0xff] }
 0x67a   :  { %v2904_v0 = vpop.permute.xlu1 %2903 }
 0x67b   :  { %v2919_v3 = vsel %vm2917_vm3, %v2916_v1, %v2904_v0 }
 0x67e   :  { %v2912_v5 = vpop.permute.xlu1 %2911 }
 0x67f   :  { %v2922_v52 = vsel %vm2920_vm4, %v2919_v3, %v2912_v5 }
 0x680   :  { %7098 = vmatmul.mubr.msk.f32.vlgmr.msra.gmra.mrb[18].mxu0 %vm82_vm0, %v2922_v52 }
 0x681   :  { %7349 = vmatpush3.bf16.msra.mxu0 %v7346_v42  ;;  %v6736_v42 = vld [vmem:[%s8885_s25 + $0x30] sm:$0xff] }
 0x682   :  { %7351 = vmatprep.subr.bf16.mxu0 %v7350_v45  ;;  %v7382_v44 = vpack.c.bf16 %v6737_v43, %v6736_v42 }
 0x685   :  { %7353 = vmatpush3.bf16.msra.mxu0 %v7350_v45  ;;  %v6726_v45 = vld [vmem:[%s8884_s8 + $0x20] sm:$0xff] }
 0x686   :  { %7355 = vmatprep.subr.bf16.mxu0 %v7354_v50  ;;  %v7370_v48 = vpack.c.bf16 %v6727_v47, %v6726_v45 }
 0x689   :  { %7357 = vmatpush3.bf16.msra.mxu0 %v7354_v50 }
 0x68a   :  { %7359 = vmatprep.subr.bf16.mxu0 %v7358_v54 }
 0x68d   :  { %7361 = vmatpush3.bf16.msra.mxu0 %v7358_v54 }
 0x753   :  { %v7099_v62 = vpop.f32.mrb[18].mxu0 }
 0x754   :  { %v3012_v8 = vadd.f32 %v7099_v62, %v6705_v53  ;;  %v3006_v10 = vpop.f32.mrb[19].mxu0 }
 0x755   :  { %v3007_v37 = vadd.f32 %v6705_v53, %v3006_v10 }
 0x756   :  { %v3016_v11 = vadd.f32 %v3012_v8, %v7763_v46 }
 0x757   :  { %v3015_v39 = vadd.f32 %v3007_v37, %v7751_v41  ;;  %v3061_v41 = vld [vmem:[%s8840_s14] sm:$0xff] }
 0x758   :  { %v3022_v12 = vsel %vm82_vm0, %v3016_v11, 0.0  ;;  %v7338_v56 = vpack.c.bf16 %v3062_v21, %v3061_v41 }
 0x759   :  { %3023 = vadd.xlane.f32.xlu1 %v3022_v12  ;;  %v3019_v13 = vsel %vm82_vm0, %v3015_v39, 0.0 }
 0x75a   :  { %3020 = vadd.xlane.f32.xlu0 %v3019_v13  ;;  %7339 = vmatprep.subr.bf16.mxu1 %v7338_v56 }
 0x75b   :  { %7341 = vmatpush3.bf16.msra.mxu1 %v7338_v56 }
 0x75c   :  { %7343 = vmatprep.subr.bf16.mxu1 %v7342_v4 }
 0x75f   :  { %7345 = vmatpush3.bf16.msra.mxu1 %v7342_v4 }
 0x7e6   :  { %v3024_v15 = vpop.xlane.xlu1 %3023 }
 0x7e7   :  { %v3026_v16 = vmul.f32 0.03125, %v3024_v15  ;;  %v3021_v58 = vpop.xlane.xlu0 %3020 }
 0x7e8   :  { %v3025_v17 = vmul.f32 0.03125, %v3021_v58 }
 0x7e9   :  { %v3028_v6 = vsub.f32 %v3016_v11, %v3026_v16 }
 0x7ea   :  { %v3027_v18 = vsub.f32 %v3015_v39, %v3025_v17 }
 0x7eb   :  { %v3030_v35 = vmul.f32 %v3028_v6, %v3028_v6 }
 0x7ec   :  { %v3029_v19 = vmul.f32 %v3027_v18, %v3027_v18 }
 0x7ed   :  { %v3034_v46 = vsel %vm82_vm0, %v3030_v35, 0.0 }
 0x7ee   :  { %v3031_v20 = vsel %vm82_vm0, %v3029_v19, 0.0  ;;  %v6713_v19 = vld [vmem:[%s8843_s17] ss:$0 sm:$0xff] }
 0x7ef   :  { %3032 = vadd.xlane.f32.xlu0 %v3031_v20 }
 0x7f3   :  { %3035 = vadd.xlane.f32.xlu0 %v3034_v46 }
 0x87c   :  { %v3033_v22 = vpop.xlane.xlu0 %3032 }
 0x87d   :  { %v3037_v23 = vmul.f32 0.03125, %v3033_v22 }
 0x87f   :  { %v3039_v24 = vadd.f32 1e-12, %v3037_v23 }
 0x880   :  { %v3036_v25 = vpop.xlane.xlu0 %3035 }
 0x881   :  { %7478 = vrsqrt.f32 %v3039_v24  ;;  %v3038_v26 = vmul.f32 0.03125, %v3036_v25 }
 0x883   :  { %v3040_v27 = vadd.f32 1e-12, %v3038_v26 }
 0x885   :  { %7480 = vrsqrt.f32 %v3040_v27 }
 0x88b   :  { %v7479_v28 = vpop.eup %7478 }
 0x88c   :  { %v3043_v30 = vmul.f32 %v7479_v28, %v3027_v18 }
 0x88e   :  { %v3051_v31 = vmul.f32 %v6708_v29, %v3043_v30 }
 0x88f   :  { %v7481_v32 = vpop.eup %7480 }
 0x890   :  { %v3044_v33 = vmul.f32 %v7481_v32, %v3028_v6  ;;  %v3059_v34 = vadd.f32 %v6709_v60, %v3051_v31  ;;  %v6719_v31 = vld [vmem:[%s8883_s0 + $0x28] sm:$0xff]  ;;  %v6734_v32 = vld [vmem:[%s8885_s25 + $0x20] sm:$0xff] }
 0x892   :  { %v3052_v36 = vmul.f32 %v6708_v29, %v3044_v33  ;;  %7108 = vmatprep.mubr.msk.f32.mxu1 %vm82_vm0, %v3059_v34 }
 0x894   :  { %v3060_v38 = vadd.f32 %v6709_v60, %v3052_v36  ;;  %v6718_v60 = vld [vmem:[%s8883_s0 + $0x20] sm:$0xff]  ;;  %v6720_v36 = vld [vmem:[%s8883_s0 + $0x30] sm:$0xff] }
 0x895   :  { %v7362_v33 = vpack.c.bf16 %v6719_v31, %v6718_v60 }
 0x896   :  { %7109 = vmatmul.mubr.msk.f32.vlgmr.msra.gmra.mrb[20].mxu1 %vm82_vm0, %v3060_v38 }
 0x897   :  { %7363 = vmatprep.subr.bf16.mxu1 %v7362_v33 }
 0x898   :  { %7365 = vmatpush3.bf16.msra.mxu1 %v7362_v33 }
 0x969   :  { %v7110_v61 = vpop.f32.mrb[20].mxu1 }
 0x96a   :  { %v3150_v63 = vadd.f32 %v7110_v61, %v6710_v55  ;;  %v3144_v0 = vpop.f32.mrb[21].mxu1 }
 0x96b   :  { %v3145_v1 = vadd.f32 %v6710_v55, %v3144_v0  ;;  %v6716_v0 = vld [vmem:[%s8844_s18] ss:$0 sm:$0xff] }
 0x96c   :  { %v3154_v3 = vmul.f32 %v3150_v63, %v3150_v63 }
 0x96d   :  { %v3153_v5 = vmul.f32 %v3145_v1, %v3145_v1 }
 0x96e   :  { %v3156_v52 = vmul.f32 %v3154_v3, %v3150_v63 }
 0x96f   :  { %v3155_v53 = vmul.f32 %v3153_v5, %v3145_v1 }
 0x970   :  { %v3158_v62 = vmul.f32 0.044715, %v3156_v52  ;;  %v6717_v52 = vld [vmem:[%s8845_s19] ss:$0 sm:$0xff] }
 0x971   :  { %v3157_v8 = vmul.f32 0.044715, %v3155_v53 }
 0x972   :  { %v3160_v10 = vadd.f32 %v3158_v62, %v3150_v63 }
 0x973   :  { %v3159_v37 = vadd.f32 %v3157_v8, %v3145_v1  ;;  %v6728_v8 = vld [vmem:[%s8884_s8 + $0x30] sm:$0xff] }
 0x974   :  { %v3162_v11 = vmul.f32 0.7978846, %v3160_v10  ;;  %v6729_v10 = vld [vmem:[%s8884_s8 + $0x38] sm:$0xff] }
 0x975   :  { %v3161_v39 = vmul.f32 0.7978846, %v3159_v37 }
 0x976   :  { %7482 = vtanh.f32 %v3162_v11 }
 0x977   :  { %7484 = vtanh.f32 %v3161_v39  ;;  %v7374_v39 = vpack.c.bf16 %v6729_v10, %v6728_v8 }
 0x980   :  { %v7483_v12 = vpop.eup %7482 }
 0x981   :  { %v7485_v13 = vpop.eup %7484  ;;  %v3166_v15 = vadd.f32 1.0, %v7483_v12  ;;  %v6723_v12 = vld [vmem:[%s8889_s28 + $0x1] ss:$0 sm:$0xff]  ;;  %s8893_s28 = smov 104  }
 0x982   :  { %v3165_v16 = vadd.f32 1.0, %v7485_v13 }
 0x983   :  { %v3168_v58 = vmul.f32 0.5, %v3166_v15 }
 0x984   :  { %v3167_v17 = vmul.f32 0.5, %v3165_v16 }
 0x985   :  { %v3170_v18 = vmul.f32 %v3168_v58, %v3150_v63 }
 0x986   :  { %v3169_v6 = vmul.f32 %v3167_v17, %v3145_v1 }
 0x988   :  { %7127 = vmatprep.mubr.msk.f32.mxu0 %vm3186_vm5, %v3169_v6  ;;  %v6731_v6 = vld [vmem:[%s8888_s5 + $0x1] ss:$0 sm:$0xff] }
 0x989   :  { %7128 = vmatmul.mubr.msk.f32.vlgmr.msra.gmra.mrb[20].mxu0 %vm3186_vm5, %v3170_v18 }
 0xa5c   :  { %v7129_v20 = vpop.f32.mrb[20].mxu0 }
 0xa5d   :  { %v3265_v35 = vadd.f32 %v7129_v20, %v6713_v19  ;;  %v3259_v46 = vpop.f32.mrb[21].mxu0 }
 0xa5e   :  { %v3260_v41 = vadd.f32 %v6713_v19, %v3259_v46 }
 0xa5f   :  { %v3269_v21 = vadd.f32 %v3265_v35, %v3060_v38  ;;  %v6721_v38 = vld [vmem:[%s8883_s0 + $0x38] sm:$0xff] }
 0xa60   :  { %v3268_v9 = vadd.f32 %v3260_v41, %v3059_v34  ;;  %v6735_v34 = vld [vmem:[%s8885_s25 + $0x28] sm:$0xff]  ;;  %v7366_v40 = vpack.c.bf16 %v6721_v38, %v6720_v36 }
 0xa61   :  { %v3275_v56 = vsel %vm82_vm0, %v3269_v21, 0.0  ;;  %v7378_v57 = vpack.c.bf16 %v6735_v34, %v6734_v32 }
 0xa62   :  { %3276 = vadd.xlane.f32.xlu1 %v3275_v56  ;;  %v3272_v2 = vsel %vm82_vm0, %v3268_v9, 0.0  ;;  %7367 = vmatprep.subr.bf16.mxu1 %v7366_v40 }
 0xa63   :  { %3273 = vadd.xlane.f32.xlu0 %v3272_v2  ;;  %7379 = vmatprep.subr.bf16.mxu0 %v7378_v57 }
 0xa64   :  { %7381 = vmatpush3.bf16.msra.mxu0 %v7378_v57  ;;  %7369 = vmatpush3.bf16.msra.mxu1 %v7366_v40 }
 0xa65   :  { %7383 = vmatprep.subr.bf16.mxu0 %v7382_v44  ;;  %7371 = vmatprep.subr.bf16.mxu1 %v7370_v48 }
 0xa68   :  { %7385 = vmatpush3.bf16.msra.mxu0 %v7382_v44 }
 0xa69   :  { %7173 = vmatprep.subr.mxu0 %v7571_v59 }
 0xaef   :  { %v3277_v4 = vpop.xlane.xlu1 %3276 }
 0xaf0   :  { %v3279_v22 = vmul.f32 0.03125, %v3277_v4  ;;  %v3274_v23 = vpop.xlane.xlu0 %3273 }
 0xaf1   :  { %v3278_v24 = vmul.f32 0.03125, %v3274_v23 }
 0xaf2   :  { %v3281_v25 = vsub.f32 %v3269_v21, %v3279_v22 }
 0xaf3   :  { %v3280_v26 = vsub.f32 %v3268_v9, %v3278_v24 }
 0xaf4   :  { %v3283_v27 = vmul.f32 %v3281_v25, %v3281_v25 }
 0xaf5   :  { %v3282_v28 = vmul.f32 %v3280_v26, %v3280_v26 }
 0xaf6   :  { %v3287_v29 = vsel %vm82_vm0, %v3283_v27, 0.0 }
 0xaf7   :  { %3288 = vadd.xlane.f32.xlu1 %v3287_v29  ;;  %v3284_v30 = vsel %vm82_vm0, %v3282_v28, 0.0 }
 0xaf8   :  { %3285 = vadd.xlane.f32.xlu0 %v3284_v30 }
 0xb84   :  { %v3289_v49 = vpop.xlane.xlu1 %3288 }
 0xb85   :  { %v3291_v50 = vmul.f32 0.03125, %v3289_v49  ;;  %v3286_v51 = vpop.xlane.xlu0 %3285 }
 0xb86   :  { %v3290_v54 = vmul.f32 0.03125, %v3286_v51 }
 0xb87   :  { %v3293_v55 = vadd.f32 1e-12, %v3291_v50 }
 0xb88   :  { %v3292_v61 = vadd.f32 1e-12, %v3290_v54 }
 0xb89   :  { %7486 = vrsqrt.f32 %v3293_v55 }
 0xb8a   :  { %7488 = vrsqrt.f32 %v3292_v61 }
 0xb93   :  { %v7487_v63 = vpop.eup %7486 }
 0xb94   :  { %v7489_v1 = vpop.eup %7488  ;;  %v3297_v3 = vmul.f32 %v7487_v63, %v3281_v25 }
 0xb95   :  { %v3296_v5 = vmul.f32 %v7489_v1, %v3280_v26 }
 0xb96   :  { %v3305_v53 = vmul.f32 %v6716_v0, %v3297_v3 }
 0xb97   :  { %v3304_v62 = vmul.f32 %v6716_v0, %v3296_v5 }
 0xb98   :  { %v8285_v11 = vadd.f32 %v6717_v52, %v3305_v53 }
 0xb99   :  { %v8283_v37 = vadd.f32 %v6717_v52, %v3304_v62 }
 0xb9b   :  { %7138 = vmatprep.mubr.msk.f32.mxu1 %vm82_vm0, %v8283_v37  ;;  %7160 = vmatprep.mubr.msk.f32.mxu0 %vm82_vm0, %v8283_v37 }
 0xb9c   :  { %7139 = vmatmul.mubr.msk.f32.vlgmr.msra.gmra.mrb[22].mxu1 %vm82_vm0, %v8285_v11  ;;  %7161 = vmatmul.mubr.msk.f32.vlgmr.msra.gmra.mrb[22].mxu0 %vm82_vm0, %v8285_v11 }
 0xb9d   :  { %7373 = vmatpush3.bf16.msra.mxu1 %v7370_v48  ;;  %7149 = vmatprep.mubr.msk.f32.mxu1 %vm82_vm0, %v8283_v37 }
 0xb9e   :  { %7375 = vmatprep.subr.bf16.mxu1 %v7374_v39  ;;  %7175 = vmatprep.mubr.msk.f32.mxu0 %vm7572_vm1, %v7571_v59 }
 0xba1   :  { %7377 = vmatpush3.bf16.msra.mxu1 %v7374_v39 }
 0xba2   :  { %7163 = vmatprep.subr.mxu1 %v7571_v59 }
 0xba4   :  { %7150 = vmatmul.mubr.msk.f32.vlgmr.msra.gmra.mrb[24].mxu1 %vm82_vm0, %v8285_v11 }
 0xba5   :  { %7165 = vmatprep.mubr.msk.f32.mxu1 %vm7572_vm1, %v7571_v59 }
 0xc6f   :  { %v7140_v13 = vpop.f32.mrb[22].mxu1  ;;  %v8307_v15 = vpop.f32.mrb[22].mxu0 }
 0xc70   :  { %v3399_v16 = vpop.f32.mrb[23].mxu1  ;;  %v8309_v58 = vpop.f32.mrb[23].mxu0  ;;  %v8328_v46 = vadd.f32 %v7140_v13, %v6723_v12 }
 0xc71   :  { %v3400_v17 = vadd.f32 %v6723_v12, %v3399_v16 }
 0xc73   :  { %3586 = vrot.lane.b32.xlu1 %v3400_v17, %s8891_s4 }
 0xc77   :  { %v7151_v18 = vpop.f32.mrb[24].mxu1 }
 0xc78   :  { %v3487_v19 = vpop.f32.mrb[25].mxu1  ;;  %v8319_v35 = vadd.f32 %v7151_v18, %v6731_v6 }
 0xc79   :  { %v3488_v20 = vadd.f32 %v6731_v6, %v3487_v19 }
 0xc7b   :  { %3878 = vrot.lane.b32.xlu0 %v3488_v20, %s8891_s4  ;;  %3884 = vrot.lane.b32.xlu1 %v3488_v20, %s8892_s2 }
 0xc7f   :  { %3592 = vrot.lane.b32.xlu0 %v3400_v17, %s8892_s2  ;;  %3890 = vrot.lane.b32.xlu1 %v3488_v20, %s8893_s28 }
 0xc83   :  { %3880 = vrot.lane.b32.xlu0 %v8319_v35, %s8891_s4  ;;  %3598 = vrot.lane.b32.xlu1 %v3400_v17, %s8893_s28 }
 0xc87   :  { %3892 = vrot.lane.b32.xlu0 %v8319_v35, %s8893_s28  ;;  %3886 = vrot.lane.b32.xlu1 %v8319_v35, %s8892_s2 }
 0xc8b   :  { %3594 = vrot.lane.b32.xlu0 %v8328_v46, %s8892_s2  ;;  %3588 = vrot.lane.b32.xlu1 %v8328_v46, %s8891_s4 }
 0xc8f   :  { %3600 = vrot.lane.b32.xlu1 %v8328_v46, %s8893_s28 }
 0xce5   :  { %v3587_v41 = vpop.permute.xlu1 %3586 }
 0xced   :  { %v3879_v21 = vpop.permute.xlu0 %3878  ;;  %v3885_v9 = vpop.permute.xlu1 %3884 }
 0xcee   :  { %v3896_v56 = vcombine.low %v3488_v20, %v3885_v9  ;;  %v3897_v2 = vcombine.high %v3488_v20, %v3885_v9 }
 0xcf0   :  { %v3904_v25 = vrot.slane %v3896_v56, %v7816_v7  ;;  %v3911_v26 = vrot.slane %v3897_v2, %v7816_v7 }
 0xcf1   :  { %v3593_v4 = vpop.permute.xlu0 %3592  ;;  %v3891_v22 = vpop.permute.xlu1 %3890 }
 0xcf2   :  { %v3912_v23 = vcombine.low %v3879_v21, %v3891_v22  ;;  %v3913_v24 = vcombine.high %v3879_v21, %v3891_v22  ;;  %v3604_v29 = vcombine.low %v3400_v17, %v3593_v4  ;;  %v3605_v30 = vcombine.high %v3400_v17, %v3593_v4 }
 0xcf4   :  { %v3920_v27 = vrot.slane %v3912_v23, %v7816_v7  ;;  %v3927_v28 = vrot.slane %v3913_v24, %v7816_v7  ;;  %v3612_v45 = vrot.slane %v3604_v29, %v7816_v7  ;;  %v3619_v47 = vrot.slane %v3605_v30, %v7816_v7 }
 0xcf5   :  { %v3599_v60 = vpop.permute.xlu1 %3598  ;;  %v3881_v36 = vpop.permute.xlu0 %3880 }
 0xcf6   :  { %v3928_v31 = vcombine.low %v3904_v25, %v3920_v27  ;;  %v3929_v32 = vcombine.high %v3904_v25, %v3920_v27  ;;  %v3944_v33 = vcombine.low %v3911_v26, %v3927_v28  ;;  %v3945_v34 = vcombine.high %v3911_v26, %v3927_v28 }
 0xcf7   :  { %v3620_v38 = vcombine.low %v3587_v41, %v3599_v60  ;;  %v3621_v57 = vcombine.high %v3587_v41, %v3599_v60 }
 0xcf8   :  { %v3936_v40 = vrot.slane %v3928_v31, %v7818_v14  ;;  %v3943_v42 = vrot.slane %v3929_v32, %v7818_v14  ;;  %v3952_v43 = vrot.slane %v3944_v33, %v7818_v14  ;;  %v3959_v44 = vrot.slane %v3945_v34, %v7818_v14 }
 0xcf9   :  { %v3628_v48 = vrot.slane %v3620_v38, %v7816_v7  ;;  %v3635_v49 = vrot.slane %v3621_v57, %v7816_v7  ;;  %v3887_v50 = vpop.permute.xlu1 %3886  ;;  %v3893_v8 = vpop.permute.xlu0 %3892 }
 0xcfa   :  { %v4032_v51 = vcombine.low %v3936_v40, %v3943_v42  ;;  %v6746_v54 = vcombine.high %v3936_v40, %v3943_v42  ;;  %v4048_v55 = vcombine.low %v3952_v43, %v3959_v44  ;;  %v6747_v61 = vcombine.high %v3952_v43, %v3959_v44 }
 0xcfb   :  { %v3636_v63 = vcombine.low %v3612_v45, %v3628_v48  ;;  %v3637_v0 = vcombine.high %v3612_v45, %v3628_v48  ;;  %v3652_v1 = vcombine.low %v3619_v47, %v3635_v49  ;;  %v3653_v3 = vcombine.high %v3619_v47, %v3635_v49 }
 0xcfc   :  { %v8349_v5 = vrot.slane %v4032_v51, %v7816_v7  ;;  %v8352_v52 = vrot.slane %v6746_v54, %v7816_v7  ;;  %v8355_v53 = vrot.slane %v4048_v55, %v7816_v7  ;;  %v8358_v62 = vrot.slane %v6747_v61, %v7816_v7 }
 0xcfd   :  { %v3644_v10 = vrot.slane %v3636_v63, %v7818_v14  ;;  %v3651_v39 = vrot.slane %v3637_v0, %v7818_v14  ;;  %v3660_v12 = vrot.slane %v3652_v1, %v7818_v14  ;;  %v3667_v13 = vrot.slane %v3653_v3, %v7818_v14  ;;  %v3589_v16 = vpop.permute.xlu1 %3588  ;;  %v3595_v28 = vpop.permute.xlu0 %3594 }
 0xcfe   :  { %v4064_v17 = vcombine.low %v8349_v5, %v8352_v52  ;;  %v4065_v6 = vcombine.high %v8349_v5, %v8352_v52  ;;  %v3980_v21 = vcombine.low %v3881_v36, %v3893_v8  ;;  %v3981_v9 = vcombine.high %v3881_v36, %v3893_v8 }
 0xcff   :  { %v3740_v18 = vcombine.low %v3644_v10, %v3651_v39  ;;  %v6742_v19 = vcombine.high %v3644_v10, %v3651_v39  ;;  %v3756_v20 = vcombine.low %v3660_v12, %v3667_v13  ;;  %v6743_v41 = vcombine.high %v3660_v12, %v3667_v13 }
 0xd00   :  { %v3964_v56 = vcombine.low %v8319_v35, %v3887_v50  ;;  %v3965_v2 = vcombine.high %v8319_v35, %v3887_v50  ;;  %v4080_v4 = vcombine.low %v8355_v53, %v8358_v62  ;;  %v4081_v22 = vcombine.high %v8355_v53, %v8358_v62 }
 0xd01   :  { %v8375_v23 = vrot.slane %v3740_v18, %v7816_v7  ;;  %v8378_v24 = vrot.slane %v6742_v19, %v7816_v7  ;;  %v3988_v25 = vrot.slane %v3980_v21, %v7816_v7  ;;  %v3995_v26 = vrot.slane %v3981_v9, %v7816_v7  ;;  %v3601_v29 = vpop.permute.xlu1 %3600 }
 0xd02   :  { %v3972_v27 = vrot.slane %v3964_v56, %v7816_v7  ;;  %v3979_v35 = vrot.slane %v3965_v2, %v7816_v7  ;;  %v8385_v30 = vrot.slane %v3756_v20, %v7816_v7  ;;  %v8388_v60 = vrot.slane %v6743_v41, %v7816_v7 }
 0xd03   :  { %v3772_v31 = vcombine.low %v8375_v23, %v8378_v24  ;;  %v3773_v32 = vcombine.high %v8375_v23, %v8378_v24  ;;  %v3672_v57 = vcombine.low %v8328_v46, %v3595_v28  ;;  %v3673_v40 = vcombine.high %v8328_v46, %v3595_v28 }
 0xd04   :  { %v3996_v33 = vcombine.low %v3972_v27, %v3988_v25  ;;  %v3997_v34 = vcombine.high %v3972_v27, %v3988_v25  ;;  %v4012_v36 = vcombine.low %v3979_v35, %v3995_v26  ;;  %v4013_v38 = vcombine.high %v3979_v35, %v3995_v26 }
 0xd05   :  { %v3688_v42 = vcombine.low %v3589_v16, %v3601_v29  ;;  %v3689_v43 = vcombine.high %v3589_v16, %v3601_v29  ;;  %v3680_v49 = vrot.slane %v3672_v57, %v7816_v7  ;;  %v3687_v50 = vrot.slane %v3673_v40, %v7816_v7 }
 0xd06   :  { %v4004_v44 = vrot.slane %v3996_v33, %v7818_v14  ;;  %v4011_v45 = vrot.slane %v3997_v34, %v7818_v14  ;;  %v4020_v47 = vrot.slane %v4012_v36, %v7818_v14  ;;  %v4027_v48 = vrot.slane %v4013_v38, %v7818_v14 }
 0xd07   :  { %v3696_v51 = vrot.slane %v3688_v42, %v7816_v7  ;;  %v3703_v54 = vrot.slane %v3689_v43, %v7816_v7  ;;  %v3788_v19 = vcombine.low %v8385_v30, %v8388_v60  ;;  %v3789_v20 = vcombine.high %v8385_v30, %v8388_v60 }
 0xd08   :  { %v4100_v55 = vcombine.low %v4004_v44, %v4011_v45  ;;  %v6748_v46 = vcombine.high %v4004_v44, %v4011_v45  ;;  %v4116_v61 = vcombine.low %v4020_v47, %v4027_v48  ;;  %v6749_v63 = vcombine.high %v4020_v47, %v4027_v48 }
 0xd09   :  { %v3704_v0 = vcombine.low %v3680_v49, %v3696_v51  ;;  %v3705_v1 = vcombine.high %v3680_v49, %v3696_v51  ;;  %v3720_v3 = vcombine.low %v3687_v50, %v3703_v54  ;;  %v3721_v53 = vcombine.high %v3687_v50, %v3703_v54 }
 0xd0a   :  { %v4107_v62 = vrot.slane %v4100_v55, %v7816_v7  ;;  %v4115_v8 = vrot.slane %v6748_v46, %v7816_v7  ;;  %v4123_v10 = vrot.slane %v4116_v61, %v7816_v7  ;;  %v4131_v39 = vrot.slane %v6749_v63, %v7816_v7 }
 0xd0b   :  { %v3712_v12 = vrot.slane %v3704_v0, %v7818_v14  ;;  %v3719_v13 = vrot.slane %v3705_v1, %v7818_v14  ;;  %v3728_v16 = vrot.slane %v3720_v3, %v7818_v14  ;;  %v3735_v18 = vrot.slane %v3721_v53, %v7818_v14 }
 0xd0c   :  { %v4132_v41 = vcombine.low %v4107_v62, %v4115_v8  ;;  %v4148_v21 = vcombine.low %v4123_v10, %v4131_v39  ;;  %v4072_v24 = vrot.slane %v4064_v17, %v7818_v14  ;;  %v4088_v25 = vrot.slane %v4080_v4, %v7818_v14 }
 0xd0d   :  { %v3808_v9 = vcombine.low %v3712_v12, %v3719_v13  ;;  %v6744_v56 = vcombine.high %v3712_v12, %v3719_v13  ;;  %v3824_v2 = vcombine.low %v3728_v16, %v3735_v18  ;;  %v6745_v23 = vcombine.high %v3728_v16, %v3735_v18  ;;  %v7536_v18 = vld [vmem:[%s8890_s3] ss:$0 sm:$0xff] }
 0xd0e   :  { %v4079_v26 = vrot.slane %v4065_v6, %v7818_v14  ;;  %v4095_v27 = vrot.slane %v4081_v22, %v7818_v14  ;;  %v4096_v60 = vcombine.low %v4072_v24, %v4088_v25  ;;  %v3780_v17 = vrot.slane %v3772_v31, %v7818_v14 }
 0xd0f   :  { %v3815_v35 = vrot.slane %v3808_v9, %v7816_v7  ;;  %v3823_v28 = vrot.slane %v6744_v56, %v7816_v7  ;;  %v3831_v29 = vrot.slane %v3824_v2, %v7816_v7  ;;  %v3839_v30 = vrot.slane %v6745_v23, %v7816_v7  ;;  %v7537_v56 = vld [vmem:[%s8890_s3 + $0x2] ss:$0 sm:$0xff] }
 0xd10   :  { %v4098_v33 = vcombine.low %v4079_v26, %v4095_v27  ;;  %v3796_v4 = vrot.slane %v3788_v19, %v7818_v14  ;;  %v4133_v34 = vcombine.high %v4107_v62, %v4115_v8  ;;  %v4149_v52 = vcombine.high %v4123_v10, %v4131_v39  ;;  %7164 = vmatpush3.xpose.msk.msra.mxu1 %vm1274_vm2, %v4096_v60 }
 0xd11   :  { %v3840_v36 = vcombine.low %v3815_v35, %v3823_v28  ;;  %v3856_v5 = vcombine.low %v3831_v29, %v3839_v30  ;;  %v3787_v22 = vrot.slane %v3773_v32, %v7818_v14  ;;  %7168 = vmatprep.subr.mxu1 %v7571_v59  ;;  %v4097_v38 = vcombine.high %v4072_v24, %v4088_v25  ;;  %v7538_v24 = vld [vmem:[%s8890_s3 + $0x1] ss:$0 sm:$0xff] }
 0xd12   :  { %7174 = vmatpush3.xpose.msk.msra.mxu0 %vm1274_vm2, %v4098_v33  ;;  %v3804_v6 = vcombine.low %v3780_v17, %v3796_v4  ;;  %v3803_v57 = vrot.slane %v3789_v20, %v7818_v14  ;;  %v4140_v31 = vrot.slane %v4132_v41, %v7818_v14  ;;  %v4156_v40 = vrot.slane %v4148_v21, %v7818_v14  ;;  %v7539_v33 = vld [vmem:[%s8890_s3 + $0x4] ss:$0 sm:$0xff] }
 0xd13   :  { %7183 = vmatprep.subr.mxu0 %v7571_v59  ;;  %v3848_v42 = vrot.slane %v3840_v36, %v7818_v14  ;;  %v3864_v43 = vrot.slane %v3856_v5, %v7818_v14  ;;  %v3841_v44 = vcombine.high %v3815_v35, %v3823_v28  ;;  %v3857_v45 = vcombine.high %v3831_v29, %v3839_v30 }
 0xd14   :  { %7166 = vmatmul.mubr.msk.f32.vlgmr.msra.gmra.mrb[26].mxu1 %vm1274_vm2, %v3804_v6  ;;  %v3806_v32 = vcombine.low %v3787_v22, %v3803_v57  ;;  %v4164_v47 = vcombine.low %v4140_v31, %v4156_v40  ;;  %v4147_v48 = vrot.slane %v4133_v34, %v7818_v14  ;;  %v4163_v49 = vrot.slane %v4149_v52, %v7818_v14 }
 0xd15   :  { %7169 = vmatpush3.xpose.msk.msra.mxu1 %vm1274_vm2, %v4097_v38  ;;  %7170 = vmatprep.mubr.msk.f32.mxu1 %vm7572_vm1, %v7571_v59  ;;  %v3805_v50 = vcombine.high %v3780_v17, %v3796_v4  ;;  %v3872_v51 = vcombine.low %v3848_v42, %v3864_v43  ;;  %v4099_v54 = vcombine.high %v4079_v26, %v4095_v27 }
 0xd16   :  { %7176 = vmatmul.mubr.msk.f32.vlgmr.msra.gmra.mrb[24].mxu0 %vm1274_vm2, %v3806_v32  ;;  %7178 = vmatprep.subr.mxu1 %v7571_v59  ;;  %v3855_v55 = vrot.slane %v3841_v44, %v7818_v14  ;;  %v3871_v46 = vrot.slane %v3857_v45, %v7818_v14  ;;  %v4166_v61 = vcombine.low %v4147_v48, %v4163_v49  ;;  %v6739_v45 = vld [vmem:[%s8835_s9 + $0x1] ss:$0 sm:$0xff] }
 0xd17   :  { %7184 = vmatpush3.xpose.msk.msra.mxu0 %vm1274_vm2, %v4164_v47  ;;  %7185 = vmatprep.mubr.msk.f32.mxu0 %vm7572_vm1, %v7571_v59  ;;  %v3807_v63 = vcombine.high %v3787_v22, %v3803_v57  ;;  %v4165_v0 = vcombine.high %v4140_v31, %v4156_v40  ;;  %v3873_v1 = vcombine.high %v3848_v42, %v3864_v43  ;;  %v7540_v22 = vld [vmem:[%s8890_s3 + $0x3] ss:$0 sm:$0xff]  ;;  %v7541_v42 = vld [vmem:[%s8890_s3 + $0x6] ss:$0 sm:$0xff] }
 0xd18   :  { %7171 = vmatmul.mubr.msk.f32.vlgmr.msra.gmra.mrb[28].mxu1 %vm1274_vm2, %v3805_v50  ;;  %7193 = vmatprep.subr.mxu0 %v7571_v59  ;;  %v3874_v3 = vcombine.low %v3855_v55, %v3871_v46  ;;  %v4167_v53 = vcombine.high %v4147_v48, %v4163_v49  ;;  %v3875_v62 = vcombine.high %v3855_v55, %v3871_v46  ;;  %v7542_v49 = vld [vmem:[%s8890_s3 + $0x5] ss:$0 sm:$0xff] }
 0xd19   :  { %7179 = vmatpush3.xpose.msk.msra.mxu1 %vm1274_vm2, %v4099_v54  ;;  %7180 = vmatprep.mubr.msk.f32.mxu1 %vm7572_vm1, %v7571_v59  ;;  %v3576_v32 = vadd.f32 %v6739_v45, %v8309_v58  ;;  %v7543_v58 = vld [vmem:[%s8890_s3 + $0x7] ss:$0 sm:$0xff]  ;;  %v8528_v46 = vadd.f32 %v8307_v15, %v6739_v45  ;;  %s8894_s3 = smov 16  }
 0xd1a   :  { %7188 = vmatprep.subr.mxu1 %v7571_v59  ;;  %7186 = vmatmul.mubr.msk.f32.vlgmr.msra.gmra.mrb[26].mxu0 %vm1274_vm2, %v3872_v51 }
 0xd1b   :  { %7194 = vmatpush3.xpose.msk.msra.mxu0 %vm1274_vm2, %v4166_v61  ;;  %7195 = vmatprep.mubr.msk.f32.mxu0 %vm7572_vm1, %v7571_v59 }
 0xd1c   :  { %7181 = vmatmul.mubr.msk.f32.vlgmr.msra.gmra.mrb[30].mxu1 %vm1274_vm2, %v3807_v63  ;;  %7203 = vmatprep.subr.mxu0 %v7571_v59 }
 0xd1d   :  { %7189 = vmatpush3.xpose.msk.msra.mxu1 %vm1274_vm2, %v4165_v0  ;;  %7190 = vmatprep.mubr.msk.f32.mxu1 %vm7572_vm1, %v7571_v59 }
 0xd1e   :  { %7198 = vmatprep.subr.mxu1 %v7571_v59  ;;  %7196 = vmatmul.mubr.msk.f32.vlgmr.msra.gmra.mrb[28].mxu0 %vm1274_vm2, %v3874_v3 }
 0xd1f   :  { %7205 = vmatprep.mubr.msk.f32.mxu0 %vm7572_vm1, %v7571_v59 }
 0xd20   :  { %7191 = vmatmul.mubr.msk.f32.vlgmr.msra.gmra.mrb[32].mxu1 %vm1274_vm2, %v3873_v1 }
 0xd21   :  { %7199 = vmatpush3.xpose.msk.msra.mxu1 %vm1274_vm2, %v4167_v53  ;;  %7200 = vmatprep.mubr.msk.f32.mxu1 %vm7572_vm1, %v7571_v59 }
 0xd22   :  { %7208 = vmatprep.subr.mxu1 %v7571_v59 }
 0xd24   :  { %7201 = vmatmul.mubr.msk.f32.vlgmr.msra.gmra.mrb[34].mxu1 %vm1274_vm2, %v3875_v62 }
 0xd25   :  { %7210 = vmatprep.mubr.msk.f32.mxu1 %vm7572_vm1, %v7571_v59 }
 0xde7   :  { %v4532_v8 = vpop.f32.mrb[26].mxu1 }
 0xde8   :  { %v5068_v10 = vmul.f32 0.35355338, %v4532_v8  ;;  %v7167_v39 = vpop.f32.mrb[27].mxu1 }
 0xde9   :  { %v4684_v12 = vpop.f32.mrb[24].mxu0 }
 0xdea   :  { %v5070_v13 = vmul.f32 0.35355338, %v4684_v12  ;;  %v7177_v16 = vpop.f32.mrb[25].mxu0  ;;  %v5076_v19 = vadd.f32 %v7536_v18, %v5068_v10 }
 0xdeb   :  { %v4608_v20 = vpop.f32.mrb[28].mxu1 }
 0xdec   :  { %v5069_v41 = vmul.f32 0.35355338, %v4608_v20  ;;  %v7172_v21 = vpop.f32.mrb[29].mxu1  ;;  %v5084_v9 = vsel %vm1274_vm2, %v5076_v19, -inf  ;;  %v5078_v2 = vadd.f32 %v7537_v56, %v5070_v13 }
 0xded   :  { %5085 = vmax.xlane.f32.xlu0 %v5084_v9  ;;  %v4836_v23 = vpop.f32.mrb[26].mxu0 }
 0xdee   :  { %v5077_v25 = vadd.f32 %v7538_v24, %v5069_v41  ;;  %v5072_v26 = vmul.f32 0.35355338, %v4836_v23  ;;  %v7187_v27 = vpop.f32.mrb[27].mxu0  ;;  %v5090_v30 = vsel %vm1274_vm2, %v5078_v2, -inf }
 0xdef   :  { %v4760_v35 = vpop.f32.mrb[30].mxu1 }
 0xdf0   :  { %v5071_v28 = vmul.f32 0.35355338, %v4760_v35  ;;  %v7182_v29 = vpop.f32.mrb[31].mxu1  ;;  %v5087_v60 = vsel %vm1274_vm2, %v5077_v25, -inf  ;;  %v5080_v17 = vadd.f32 %v7539_v33, %v5072_v26 }
 0xdf1   :  { %5091 = vmax.xlane.f32.xlu0 %v5090_v30  ;;  %5088 = vmax.xlane.f32.xlu1 %v5087_v60  ;;  %v4988_v4 = vpop.f32.mrb[28].mxu0 }
 0xdf2   :  { %v7197_v34 = vpop.f32.mrb[29].mxu0  ;;  %v5096_v36 = vsel %vm1274_vm2, %v5080_v17, -inf  ;;  %v5074_v6 = vmul.f32 0.35355338, %v4988_v4  ;;  %v5079_v38 = vadd.f32 %v7540_v22, %v5071_v28 }
 0xdf3   :  { %v4912_v5 = vpop.f32.mrb[32].mxu1 }
 0xdf4   :  { %v7192_v52 = vpop.f32.mrb[33].mxu1  ;;  %v5093_v40 = vsel %vm1274_vm2, %v5079_v38, -inf  ;;  %v5082_v43 = vadd.f32 %v7541_v42, %v5074_v6  ;;  %v5073_v47 = vmul.f32 0.35355338, %v4912_v5 }
 0xdf5   :  { %5097 = vmax.xlane.f32.xlu0 %v5096_v36 }
 0xdf6   :  { %v5102_v44 = vsel %vm1274_vm2, %v5082_v43, -inf  ;;  %v8516_v50 = vadd.f32 %v7542_v49, %v5073_v47 }
 0xdf7   :  { %v5064_v57 = vpop.f32.mrb[34].mxu1 }
 0xdf8   :  { %v7202_v31 = vpop.f32.mrb[35].mxu1  ;;  %v5075_v48 = vmul.f32 0.35355338, %v5064_v57  ;;  %v5099_v51 = vsel %vm1274_vm2, %v8516_v50, -inf }
 0xdf9   :  { %5094 = vmax.xlane.f32.xlu0 %v5093_v40 }
 0xdfa   :  { %v8523_v54 = vadd.f32 %v7543_v58, %v5075_v48 }
 0xdfc   :  { %v5105_v55 = vsel %vm1274_vm2, %v8523_v54, -inf }
 0xdfd   :  { %5103 = vmax.xlane.f32.xlu0 %v5102_v44 }
 0xe02   :  { %4176 = vrot.lane.b32.xlu1 %v3576_v32, %s8892_s2 }
 0xe06   :  { %4182 = vrot.lane.b32.xlu1 %v3576_v32, %s8893_s28 }
 0xe13   :  { %4170 = vrot.lane.b32.xlu0 %v3576_v32, %s8891_s4 }
 0xe2a   :  { %5100 = vmax.xlane.f32.xlu1 %v5099_v51 }
 0xe2e   :  { %5106 = vmax.xlane.f32.xlu1 %v5105_v55 }
 0xe3f   :  { %4172 = vrot.lane.b32.xlu1 %v8528_v46, %s8891_s4  ;;  %s8895_s4 = smov 8  }
 0xe7a   :  { %v5086_v61 = vpop.xlane.xlu0 %5085 }
 0xe7b   :  { %v5108_v63 = vsub.f32 %v5076_v19, %v5086_v61 }
 0xe7d   :  { %v5116_v0 = vmul.f32 1.442695, %v5108_v63 }
 0xe7e   :  { %v5092_v1 = vpop.xlane.xlu0 %5091  ;;  %v5089_v3 = vpop.xlane.xlu1 %5088 }
 0xe7f   :  { %7490 = vpow2.f32 %v5116_v0  ;;  %v5110_v53 = vsub.f32 %v5078_v2, %v5092_v1  ;;  %v5109_v62 = vsub.f32 %v5077_v25, %v5089_v3 }
 0xe81   :  { %v5120_v8 = vmul.f32 1.442695, %v5110_v53  ;;  %v5118_v10 = vmul.f32 1.442695, %v5109_v62 }
 0xe82   :  { %v5098_v39 = vpop.xlane.xlu0 %5097  ;;  %v4177_v18 = vpop.permute.xlu1 %4176 }
 0xe83   :  { %7492 = vpow2.f32 %v5120_v8  ;;  %v5112_v12 = vsub.f32 %v5080_v17, %v5098_v39  ;;  %v4188_v2 = vcombine.low %v3576_v32, %v4177_v18  ;;  %v4189_v23 = vcombine.high %v3576_v32, %v4177_v18 }
 0xe84   :  { %7494 = vpow2.f32 %v5118_v10 }
 0xe85   :  { %v5124_v13 = vmul.f32 1.442695, %v5112_v12  ;;  %v4196_v33 = vrot.slane %v4188_v2, %v7816_v7  ;;  %v4203_v17 = vrot.slane %v4189_v23, %v7816_v7 }
 0xe86   :  { %v5095_v15 = vpop.xlane.xlu0 %5094  ;;  %v4183_v26 = vpop.permute.xlu1 %4182 }
 0xe87   :  { %7496 = vpow2.f32 %v5124_v13  ;;  %v5111_v16 = vsub.f32 %v5079_v38, %v5095_v15 }
 0xe89   :  { %v8532_v20 = vpop.eup %7490  ;;  %v5122_v19 = vmul.f32 1.442695, %v5111_v16 }
 0xe8a   :  { %v5132_v41 = vsel %vm1274_vm2, %v8532_v20, 0.0  ;;  %v5104_v21 = vpop.xlane.xlu0 %5103 }
 0xe8b   :  { %7498 = vpow2.f32 %v5122_v19  ;;  %5133 = vadd.xlane.f32.xlu0 %v5132_v41  ;;  %v5114_v9 = vsub.f32 %v5082_v43, %v5104_v21 }
 0xe8d   :  { %v8536_v56 = vpop.eup %7492  ;;  %v5128_v24 = vmul.f32 1.442695, %v5114_v9 }
 0xe8e   :  { %v8538_v25 = vpop.eup %7494  ;;  %v5138_v27 = vsel %vm1274_vm2, %v8536_v56, 0.0  ;;  %v4171_v35 = vpop.permute.xlu0 %4170 }
 0xe8f   :  { %7500 = vpow2.f32 %v5128_v24  ;;  %5139 = vadd.xlane.f32.xlu0 %v5138_v27  ;;  %v5135_v28 = vsel %vm1274_vm2, %v8538_v25, 0.0  ;;  %v4204_v29 = vcombine.low %v4171_v35, %v4183_v26  ;;  %v4205_v30 = vcombine.high %v4171_v35, %v4183_v26 }
 0xe90   :  { %5136 = vadd.xlane.f32.xlu1 %v5135_v28 }
 0xe91   :  { %v8544_v60 = vpop.eup %7496  ;;  %v4212_v4 = vrot.slane %v4204_v29, %v7816_v7  ;;  %v4219_v34 = vrot.slane %v4205_v30, %v7816_v7 }
 0xe92   :  { %v5144_v36 = vsel %vm1274_vm2, %v8544_v60, 0.0 }
 0xe93   :  { %v4220_v5 = vcombine.low %v4196_v33, %v4212_v4  ;;  %v4221_v52 = vcombine.high %v4196_v33, %v4212_v4  ;;  %v4236_v6 = vcombine.low %v4203_v17, %v4219_v34  ;;  %v4237_v22 = vcombine.high %v4203_v17, %v4219_v34 }
 0xe94   :  { %5145 = vadd.xlane.f32.xlu1 %v5144_v36 }
 0xe95   :  { %v8552_v38 = vpop.eup %7498  ;;  %v4228_v57 = vrot.slane %v4220_v5, %v7818_v14  ;;  %v4235_v31 = vrot.slane %v4221_v52, %v7818_v14  ;;  %v4244_v40 = vrot.slane %v4236_v6, %v7818_v14  ;;  %v4251_v42 = vrot.slane %v4237_v22, %v7818_v14 }
 0xe96   :  { %v5141_v43 = vsel %vm1274_vm2, %v8552_v38, 0.0 }
 0xe97   :  { %v4324_v44 = vcombine.low %v4228_v57, %v4235_v31  ;;  %v6750_v45 = vcombine.high %v4228_v57, %v4235_v31  ;;  %v4340_v32 = vcombine.low %v4244_v40, %v4251_v42  ;;  %v6751_v47 = vcombine.high %v4244_v40, %v4251_v42 }
 0xe98   :  { %5142 = vadd.xlane.f32.xlu1 %v5141_v43 }
 0xe99   :  { %v8560_v48 = vpop.eup %7500  ;;  %v4331_v49 = vrot.slane %v4324_v44, %v7816_v7  ;;  %v4339_v51 = vrot.slane %v6750_v45, %v7816_v7  ;;  %v4347_v58 = vrot.slane %v4340_v32, %v7816_v7  ;;  %v4355_v55 = vrot.slane %v6751_v47, %v7816_v7 }
 0xe9a   :  { %v5150_v61 = vsel %vm1274_vm2, %v8560_v48, 0.0 }
 0xe9b   :  { %5151 = vadd.xlane.f32.xlu0 %v5150_v61  ;;  %v4356_v63 = vcombine.low %v4331_v49, %v4339_v51  ;;  %v4372_v0 = vcombine.low %v4347_v58, %v4355_v55  ;;  %v4357_v1 = vcombine.high %v4331_v49, %v4339_v51  ;;  %v4373_v3 = vcombine.high %v4347_v58, %v4355_v55 }
 0xe9d   :  { %v4364_v53 = vrot.slane %v4356_v63, %v7818_v14  ;;  %v4380_v62 = vrot.slane %v4372_v0, %v7818_v14  ;;  %v4371_v8 = vrot.slane %v4357_v1, %v7818_v14  ;;  %v4387_v10 = vrot.slane %v4373_v3, %v7818_v14 }
 0xe9f   :  { %v4388_v39 = vcombine.low %v4364_v53, %v4380_v62  ;;  %v4389_v12 = vcombine.high %v4364_v53, %v4380_v62  ;;  %v4390_v13 = vcombine.low %v4371_v8, %v4387_v10  ;;  %v4391_v15 = vcombine.high %v4371_v8, %v4387_v10 }
 0xea1   :  { %7204 = vmatpush3.msra.mxu0 %v4388_v39  ;;  %7209 = vmatpush3.msra.mxu1 %v4389_v12 }
 0xea2   :  { %7213 = vmatprep.subr.mxu0 %v7571_v59  ;;  %7218 = vmatprep.subr.mxu1 %v7571_v59 }
 0xea9   :  { %4184 = vrot.lane.b32.xlu1 %v8528_v46, %s8893_s28 }
 0xeb7   :  { %v5101_v16 = vpop.xlane.xlu1 %5100 }
 0xeb8   :  { %v5113_v18 = vsub.f32 %v8516_v50, %v5101_v16 }
 0xeba   :  { %v5126_v19 = vmul.f32 1.442695, %v5113_v18 }
 0xebb   :  { %v5107_v41 = vpop.xlane.xlu1 %5106 }
 0xebc   :  { %7502 = vpow2.f32 %v5126_v19  ;;  %v5115_v21 = vsub.f32 %v8523_v54, %v5107_v41 }
 0xebe   :  { %v5130_v9 = vmul.f32 1.442695, %v5115_v21 }
 0xebf   :  { %v4173_v27 = vpop.permute.xlu1 %4172 }
 0xec0   :  { %7504 = vpow2.f32 %v5130_v9 }
 0xec6   :  { %v8578_v2 = vpop.eup %7502 }
 0xec7   :  { %v5147_v23 = vsel %vm1274_vm2, %v8578_v2, 0.0 }
 0xec8   :  { %5148 = vadd.xlane.f32.xlu0 %v5147_v23 }
 0xeca   :  { %v8582_v24 = vpop.eup %7504 }
 0xecb   :  { %v5153_v26 = vsel %vm1274_vm2, %v8582_v24, 0.0 }
 0xecc   :  { %5154 = vadd.xlane.f32.xlu0 %v5153_v26 }
 0xee2   :  { %4178 = vrot.lane.b32.xlu0 %v8528_v46, %s8892_s2  ;;  %s8896_s2 = smov 24  }
 0xf18   :  { %v5134_v50 = vpop.xlane.xlu0 %5133 }
 0xf19   :  { %7506 = vrcp.f32 %v5134_v50 }
 0xf1c   :  { %v5140_v54 = vpop.xlane.xlu0 %5139 }
 0xf1d   :  { %7508 = vrcp.f32 %v5140_v54  ;;  %v5137_v35 = vpop.xlane.xlu1 %5136 }
 0xf1e   :  { %7510 = vrcp.f32 %v5137_v35 }
 0xf21   :  { %v5146_v28 = vpop.xlane.xlu1 %5145 }
 0xf23   :  { %v7507_v29 = vpop.eup %7506 }
 0xf24   :  { %v5157_v30 = vmul.f32 %v7507_v29, %v8532_v20 }
 0xf25   :  { %v5143_v33 = vpop.xlane.xlu1 %5142 }
 0xf26   :  { %7206 = vmatmul.mubr.msk.f32.vlgmr.msra.gmra.mrb[30].mxu0 %vm1274_vm2, %v5157_v30  ;;  %7512 = vrcp.f32 %v5143_v33 }
 0xf27   :  { %v7509_v17 = vpop.eup %7508  ;;  %7214 = vmatpush3.msra.mxu0 %v4390_v13  ;;  %7215 = vmatprep.mubr.msk.f32.mxu0 %vm7572_vm1, %v7571_v59  ;;  %7514 = vrcp.f32 %v5146_v28 }
 0xf28   :  { %v7511_v4 = vpop.eup %7510  ;;  %v5161_v34 = vmul.f32 %v7509_v17, %v8536_v56  ;;  %7223 = vmatprep.subr.mxu0 %v7571_v59 }
 0xf29   :  { %v5159_v36 = vmul.f32 %v7511_v4, %v8538_v25  ;;  %v5152_v25 = vpop.xlane.xlu0 %5151  ;;  %v4185_v52 = vpop.permute.xlu1 %4184 }
 0xf2a   :  { %7216 = vmatmul.mubr.msk.f32.vlgmr.msra.gmra.mrb[32].mxu0 %vm1274_vm2, %v5161_v34  ;;  %v4272_v22 = vcombine.low %v4173_v27, %v4185_v52  ;;  %v4273_v57 = vcombine.high %v4173_v27, %v4185_v52 }
 0xf2b   :  { %7211 = vmatmul.mubr.msk.f32.vlgmr.msra.gmra.mrb[36].mxu1 %vm1274_vm2, %v5159_v36  ;;  %7225 = vmatprep.mubr.msk.f32.mxu0 %vm7572_vm1, %v7571_v59 }
 0xf2c   :  { %7219 = vmatpush3.msra.mxu1 %v4391_v15  ;;  %7220 = vmatprep.mubr.msk.f32.mxu1 %vm7572_vm1, %v7571_v59  ;;  %v4280_v43 = vrot.slane %v4272_v22, %v7816_v7 }
 0xf2d   :  { %7228 = vmatprep.subr.mxu1 %v7571_v59 }
 0xf30   :  { %v7513_v20 = vpop.eup %7512 }
 0xf31   :  { %v5163_v56 = vmul.f32 %v7513_v20, %v8552_v38  ;;  %v4287_v38 = vrot.slane %v4273_v57, %v7816_v7  ;;  %v7515_v39 = vpop.eup %7514 }
 0xf32   :  { %v5165_v54 = vmul.f32 %v7515_v39, %v8544_v60 }
 0xf33   :  { %7221 = vmatmul.mubr.msk.f32.vlgmr.msra.gmra.mrb[38].mxu1 %vm1274_vm2, %v5163_v56 }
 0xf34   :  { %7230 = vmatprep.mubr.msk.f32.mxu1 %vm7572_vm1, %v7571_v59 }
 0xf55   :  { %v5149_v5 = vpop.xlane.xlu0 %5148 }
 0xf56   :  { %7516 = vrcp.f32 %v5149_v5 }
 0xf57   :  { %7518 = vrcp.f32 %v5152_v25 }
 0xf59   :  { %v5155_v6 = vpop.xlane.xlu0 %5154 }
 0xf5a   :  { %7520 = vrcp.f32 %v5155_v6 }
 0xf5d   :  { %v4179_v31 = vpop.permute.xlu0 %4178 }
 0xf5e   :  { %v4256_v40 = vcombine.low %v8528_v46, %v4179_v31  ;;  %v4257_v42 = vcombine.high %v8528_v46, %v4179_v31 }
 0xf60   :  { %v4264_v44 = vrot.slane %v4256_v40, %v7816_v7  ;;  %v4271_v45 = vrot.slane %v4257_v42, %v7816_v7  ;;  %v7517_v18 = vpop.eup %7516 }
 0xf61   :  { %v7519_v21 = vpop.eup %7518  ;;  %v5167_v35 = vmul.f32 %v7517_v18, %v8578_v2 }
 0xf62   :  { %v4288_v32 = vcombine.low %v4264_v44, %v4280_v43  ;;  %v4289_v47 = vcombine.high %v4264_v44, %v4280_v43  ;;  %v4304_v49 = vcombine.low %v4271_v45, %v4287_v38  ;;  %v4305_v51 = vcombine.high %v4271_v45, %v4287_v38 }
 0xf63   :  { %v5169_v30 = vmul.f32 %v7519_v21, %v8560_v48 }
 0xf64   :  { %v4296_v58 = vrot.slane %v4288_v32, %v7818_v14  ;;  %v4303_v55 = vrot.slane %v4289_v47, %v7818_v14  ;;  %v4312_v46 = vrot.slane %v4304_v49, %v7818_v14  ;;  %v4319_v61 = vrot.slane %v4305_v51, %v7818_v14  ;;  %v7521_v27 = vpop.eup %7520 }
 0xf65   :  { %v5171_v33 = vmul.f32 %v7521_v27, %v8582_v24 }
 0xf66   :  { %v4392_v63 = vcombine.low %v4296_v58, %v4303_v55  ;;  %v6752_v0 = vcombine.high %v4296_v58, %v4303_v55  ;;  %v4408_v1 = vcombine.low %v4312_v46, %v4319_v61  ;;  %v6753_v3 = vcombine.high %v4312_v46, %v4319_v61 }
 0xf68   :  { %v4399_v53 = vrot.slane %v4392_v63, %v7816_v7  ;;  %v4407_v62 = vrot.slane %v6752_v0, %v7816_v7  ;;  %v4415_v8 = vrot.slane %v4408_v1, %v7816_v7  ;;  %v4423_v10 = vrot.slane %v6753_v3, %v7816_v7 }
 0xf6a   :  { %v4424_v12 = vcombine.low %v4399_v53, %v4407_v62  ;;  %v4440_v13 = vcombine.low %v4415_v8, %v4423_v10  ;;  %v4425_v15 = vcombine.high %v4399_v53, %v4407_v62  ;;  %v4441_v16 = vcombine.high %v4415_v8, %v4423_v10 }
 0xf6c   :  { %v4432_v19 = vrot.slane %v4424_v12, %v7818_v14  ;;  %v4448_v41 = vrot.slane %v4440_v13, %v7818_v14  ;;  %v4439_v9 = vrot.slane %v4425_v15, %v7818_v14  ;;  %v4455_v23 = vrot.slane %v4441_v16, %v7818_v14 }
 0xf6e   :  { %v4456_v26 = vcombine.low %v4432_v19, %v4448_v41  ;;  %v4457_v50 = vcombine.high %v4432_v19, %v4448_v41  ;;  %v4458_v28 = vcombine.low %v4439_v9, %v4455_v23  ;;  %v4459_v29 = vcombine.high %v4439_v9, %v4455_v23 }
 0xf70   :  { %7224 = vmatpush3.msra.mxu0 %v4456_v26  ;;  %7229 = vmatpush3.msra.mxu1 %v4457_v50 }
 0xf71   :  { %7226 = vmatmul.mubr.msk.f32.vlgmr.msra.gmra.mrb[34].mxu0 %vm1274_vm2, %v5165_v54  ;;  %7231 = vmatmul.mubr.msk.f32.vlgmr.msra.gmra.mrb[40].mxu1 %vm1274_vm2, %v5167_v35 }
 0xf72   :  { %7233 = vmatprep.subr.mxu0 %v7571_v59  ;;  %7238 = vmatprep.subr.mxu1 %v7571_v59 }
 0xf73   :  { %7234 = vmatpush3.msra.mxu0 %v4458_v28  ;;  %7239 = vmatpush3.msra.mxu1 %v4459_v29 }
 0xf74   :  { %7235 = vmatprep.mubr.msk.f32.mxu0 %vm7572_vm1, %v7571_v59  ;;  %7240 = vmatprep.mubr.msk.f32.mxu1 %vm7572_vm1, %v7571_v59 }
 0xf75   :  { %7236 = vmatmul.mubr.msk.f32.vlgmr.msra.gmra.mrb[36].mxu0 %vm1274_vm2, %v5169_v30  ;;  %7241 = vmatmul.mubr.msk.f32.vlgmr.msra.gmra.mrb[42].mxu1 %vm1274_vm2, %v5171_v33 }
 0xff9   :  { %v5241_v60 = vpop.f32.mrb[30].mxu0 }
 0xffa   :  { %v7207_v2 = vpop.f32.mrb[31].mxu0 }
 0xffd   :  { %v5387_v17 = vpop.f32.mrb[32].mxu0 }
 0xffe   :  { %v5314_v4 = vpop.f32.mrb[36].mxu1  ;;  %v5756_v34 = vcombine.low %v5241_v60, %v5387_v17  ;;  %v5757_v48 = vcombine.high %v5241_v60, %v5387_v17  ;;  %v7217_v36 = vpop.f32.mrb[33].mxu0 }
 0xfff   :  { %v7212_v24 = vpop.f32.mrb[37].mxu1  ;;  %v6783_v36 = vld [vmem:[%s8836_s10 + $0x28] sm:$0xff] }
0x1000   :  { %v5764_v52 = vrot.slane %v5756_v34, %v7816_v7  ;;  %v5771_v6 = vrot.slane %v5757_v48, %v7816_v7  ;;  %v6782_v48 = vld [vmem:[%s8836_s10 + $0x20] sm:$0xff] }
0x1006   :  { %v5460_v20 = vpop.f32.mrb[38].mxu1 }
0x1007   :  { %v5772_v56 = vcombine.low %v5314_v4, %v5460_v20  ;;  %v5773_v25 = vcombine.high %v5314_v4, %v5460_v20  ;;  %v7222_v5 = vpop.f32.mrb[39].mxu1 }
0x1008   :  { %v7386_v5 = vpack.c.bf16 %v6783_v36, %v6782_v48  ;;  %v6796_v36 = vld [vmem:[%s8840_s14 + $0x30] sm:$0xff] }
0x1009   :  { %v5780_v22 = vrot.slane %v5772_v56, %v7816_v7  ;;  %v5787_v57 = vrot.slane %v5773_v25, %v7816_v7 }
0x100a   :  { %7387 = vmatprep.subr.bf16.mxu0 %v7386_v5 }
0x100b   :  { %v5788_v31 = vcombine.low %v5764_v52, %v5780_v22  ;;  %v5789_v40 = vcombine.high %v5764_v52, %v5780_v22  ;;  %v5804_v42 = vcombine.low %v5771_v6, %v5787_v57  ;;  %v5805_v43 = vcombine.high %v5771_v6, %v5787_v57  ;;  %7389 = vmatpush3.bf16.msra.mxu0 %v7386_v5 }
0x100d   :  { %v5796_v38 = vrot.slane %v5788_v31, %v7818_v14  ;;  %v5803_v44 = vrot.slane %v5789_v40, %v7818_v14  ;;  %v5812_v45 = vrot.slane %v5804_v42, %v7818_v14  ;;  %v5819_v32 = vrot.slane %v5805_v43, %v7818_v14  ;;  %v6784_v31 = vld [vmem:[%s8836_s10 + $0x30] sm:$0xff]  ;;  %v6785_v40 = vld [vmem:[%s8836_s10 + $0x38] sm:$0xff] }
0x100f   :  { %v5892_v47 = vcombine.low %v5796_v38, %v5803_v44  ;;  %v6778_v49 = vcombine.high %v5796_v38, %v5803_v44  ;;  %v5908_v51 = vcombine.low %v5812_v45, %v5819_v32  ;;  %v6779_v58 = vcombine.high %v5812_v45, %v5819_v32 }
0x1010   :  { %v7390_v45 = vpack.c.bf16 %v6785_v40, %v6784_v31  ;;  %v6792_v31 = vld [vmem:[%s8838_s12 + $0x1] ss:$0 sm:$0xff] }
0x1011   :  { %v5899_v55 = vrot.slane %v5892_v47, %v7816_v7  ;;  %v5907_v46 = vrot.slane %v6778_v49, %v7816_v7  ;;  %v5915_v61 = vrot.slane %v5908_v51, %v7816_v7  ;;  %v5923_v63 = vrot.slane %v6779_v58, %v7816_v7 }
0x1012   :  { %7391 = vmatprep.subr.bf16.mxu0 %v7390_v45 }
0x1013   :  { %v5925_v0 = vcombine.high %v5899_v55, %v5907_v46  ;;  %v5941_v1 = vcombine.high %v5915_v61, %v5923_v63  ;;  %v5924_v3 = vcombine.low %v5899_v55, %v5907_v46  ;;  %v5940_v53 = vcombine.low %v5915_v61, %v5923_v63  ;;  %7393 = vmatpush3.bf16.msra.mxu0 %v7390_v45 }
0x1015   :  { %v5939_v62 = vrot.slane %v5925_v0, %v7818_v14  ;;  %v5955_v8 = vrot.slane %v5941_v1, %v7818_v14  ;;  %v8653_v10 = vrot.slane %v5924_v3, %v7818_v14  ;;  %v8656_v39 = vrot.slane %v5940_v53, %v7818_v14 }
0x1017   :  { %v5958_v12 = vcombine.low %v5939_v62, %v5955_v8  ;;  %v5957_v13 = vcombine.high %v8653_v10, %v8656_v39  ;;  %v5959_v15 = vcombine.high %v5939_v62, %v5955_v8  ;;  %v5956_v16 = vcombine.low %v8653_v10, %v8656_v39  ;;  %v6787_v10 = vld [vmem:[%s8837_s11 + $0x1] ss:$0 sm:$0xff] }
0x1019   :  { %6038 = vrot.lane.b32.xlu0 %v5958_v12, %s8894_s3  ;;  %6030 = vrot.lane.b32.xlu1 %v5957_v13, %s8895_s4 }
0x101d   :  { %6046 = vrot.lane.b32.xlu0 %v5959_v15, %s8896_s2 }
0x1044   :  { %v5533_v18 = vpop.f32.mrb[34].mxu0  ;;  %v5606_v19 = vpop.f32.mrb[40].mxu1 }
0x1045   :  { %v7227_v41 = vpop.f32.mrb[35].mxu0  ;;  %v7232_v21 = vpop.f32.mrb[41].mxu1 }
0x1048   :  { %v5679_v9 = vpop.f32.mrb[36].mxu0  ;;  %v5752_v23 = vpop.f32.mrb[42].mxu1 }
0x1049   :  { %v5824_v26 = vcombine.low %v5533_v18, %v5679_v9  ;;  %v5825_v50 = vcombine.high %v5533_v18, %v5679_v9  ;;  %v5840_v27 = vcombine.low %v5606_v19, %v5752_v23  ;;  %v5841_v54 = vcombine.high %v5606_v19, %v5752_v23  ;;  %v7237_v35 = vpop.f32.mrb[37].mxu0  ;;  %v7242_v28 = vpop.f32.mrb[43].mxu1 }
0x104b   :  { %v5832_v29 = vrot.slane %v5824_v26, %v7816_v7  ;;  %v5839_v30 = vrot.slane %v5825_v50, %v7816_v7  ;;  %v5848_v33 = vrot.slane %v5840_v27, %v7816_v7  ;;  %v5855_v60 = vrot.slane %v5841_v54, %v7816_v7 }
0x104d   :  { %v5856_v2 = vcombine.low %v5832_v29, %v5848_v33  ;;  %v5857_v17 = vcombine.high %v5832_v29, %v5848_v33  ;;  %v5872_v4 = vcombine.low %v5839_v30, %v5855_v60  ;;  %v5873_v34 = vcombine.high %v5839_v30, %v5855_v60 }
0x104f   :  { %v5864_v24 = vrot.slane %v5856_v2, %v7818_v14  ;;  %v5871_v20 = vrot.slane %v5857_v17, %v7818_v14  ;;  %v5880_v56 = vrot.slane %v5872_v4, %v7818_v14  ;;  %v5887_v25 = vrot.slane %v5873_v34, %v7818_v14  ;;  %v6795_v34 = vld [vmem:[%s8840_s14 + $0x28] sm:$0xff] }
0x1051   :  { %v5960_v52 = vcombine.low %v5864_v24, %v5871_v20  ;;  %v6780_v6 = vcombine.high %v5864_v24, %v5871_v20  ;;  %v5976_v22 = vcombine.low %v5880_v56, %v5887_v25  ;;  %v6781_v57 = vcombine.high %v5880_v56, %v5887_v25  ;;  %v6797_v24 = vld [vmem:[%s8840_s14 + $0x38] sm:$0xff] }
0x1052   :  { %v7398_v20 = vpack.c.bf16 %v6797_v24, %v6796_v36 }
0x1053   :  { %v5967_v42 = vrot.slane %v5960_v52, %v7816_v7  ;;  %v5975_v43 = vrot.slane %v6780_v6, %v7816_v7  ;;  %v5983_v38 = vrot.slane %v5976_v22, %v7816_v7  ;;  %v5991_v44 = vrot.slane %v6781_v57, %v7816_v7 }
0x1055   :  { %v5992_v32 = vcombine.low %v5967_v42, %v5975_v43  ;;  %v6008_v47 = vcombine.low %v5983_v38, %v5991_v44  ;;  %v5993_v49 = vcombine.high %v5967_v42, %v5975_v43  ;;  %v6009_v51 = vcombine.high %v5983_v38, %v5991_v44  ;;  %v6793_v42 = vld [vmem:[%s8839_s13 + $0x1] ss:$0 sm:$0xff] }
0x1057   :  { %v6000_v58 = vrot.slane %v5992_v32, %v7818_v14  ;;  %v6016_v55 = vrot.slane %v6008_v47, %v7818_v14  ;;  %v6007_v46 = vrot.slane %v5993_v49, %v7818_v14  ;;  %v6023_v61 = vrot.slane %v6009_v51, %v7818_v14  ;;  %v6802_v49 = vld [vmem:[%s8842_s16 + $0x40] sm:$0xff]  ;;  %v6803_v51 = vld [vmem:[%s8842_s16 + $0x48] sm:$0xff] }
0x1059   :  { %v6025_v63 = vcombine.high %v6000_v58, %v6016_v55  ;;  %v6026_v0 = vcombine.low %v6007_v46, %v6023_v61  ;;  %v6027_v1 = vcombine.high %v6007_v46, %v6023_v61  ;;  %v6024_v7 = vcombine.low %v6000_v58, %v6016_v55  ;;  %v6804_v55 = vld [vmem:[%s8842_s16 + $0x50] sm:$0xff]  ;;  %v6805_v46 = vld [vmem:[%s8842_s16 + $0x58] sm:$0xff] }
0x105a   :  { %v7402_v58 = vpack.c.bf16 %v6803_v51, %v6802_v49  ;;  %v7406_v61 = vpack.c.bf16 %v6805_v46, %v6804_v55 }
0x105b   :  { %6032 = vrot.lane.b32.xlu1 %v6025_v63, %s8895_s4  ;;  %v6806_v63 = vld [vmem:[%s8842_s16 + $0x60] sm:$0xff] }
0x105c   :  { %7403 = vmatprep.subr.bf16.mxu0 %v7402_v58 }
0x105f   :  { %6040 = vrot.lane.b32.xlu1 %v6026_v0, %s8894_s3  ;;  %v6807_v0 = vld [vmem:[%s8842_s16 + $0x68] sm:$0xff] }
0x1063   :  { %6048 = vrot.lane.b32.xlu1 %v6027_v1, %s8896_s2  ;;  %v7410_v1 = vpack.c.bf16 %v6807_v0, %v6806_v63 }
0x108b   :  { %v6039_v3 = vpop.permute.xlu0 %6038  ;;  %v6031_v53 = vpop.permute.xlu1 %6030 }
0x108c   :  { %v6052_v62 = vsel %vm1274_vm2, %v5956_v16, %v6031_v53 }
0x108d   :  { %v6054_v14 = vsel %vm2917_vm3, %v6052_v62, %v6039_v3  ;;  %v6809_v3 = vld [vmem:[%s8842_s16 + $0x78] sm:$0xff]  ;;  %v6799_v62 = vld [vmem:[%s8841_s15 + $0x1] ss:$0 sm:$0xff] }
0x108f   :  { %v6047_v8 = vpop.permute.xlu0 %6046 }
0x1090   :  { %v6056_v12 = vsel %vm2920_vm4, %v6054_v14, %v6047_v8 }
0x1091   :  { %7251 = vmatprep.mubr.msk.f32.mxu0 %vm82_vm0, %v6056_v12 }
0x10cd   :  { %v6033_v13 = vpop.permute.xlu1 %6032 }
0x10ce   :  { %v6053_v18 = vsel %vm1274_vm2, %v6024_v7, %v6033_v13  ;;  %v6808_v7 = vld [vmem:[%s8842_s16 + $0x70] sm:$0xff] }
0x10cf   :  { %v7414_v53 = vpack.c.bf16 %v6809_v3, %v6808_v7  ;;  %v6817_v7 = vld [vmem:[%s8845_s19 + $0x1] ss:$0 sm:$0xff] }
0x10d1   :  { %v6041_v15 = vpop.permute.xlu1 %6040 }
0x10d2   :  { %v6055_v19 = vsel %vm2917_vm3, %v6053_v18, %v6041_v15 }
0x10d5   :  { %v6049_v41 = vpop.permute.xlu1 %6048 }
0x10d6   :  { %v6057_v21 = vsel %vm2920_vm4, %v6055_v19, %v6049_v41 }
0x10d7   :  { %7252 = vmatmul.mubr.msk.f32.vlgmr.msra.gmra.mrb[38].mxu0 %vm82_vm0, %v6057_v21 }
0x10d8   :  { %7405 = vmatpush3.bf16.msra.mxu0 %v7402_v58 }
0x10d9   :  { %7407 = vmatprep.subr.bf16.mxu0 %v7406_v61 }
0x10dc   :  { %7409 = vmatpush3.bf16.msra.mxu0 %v7406_v61  ;;  %v6816_v61 = vld [vmem:[%s8844_s18 + $0x1] ss:$0 sm:$0xff] }
0x10dd   :  { %7411 = vmatprep.subr.bf16.mxu0 %v7410_v1 }
0x10e0   :  { %7413 = vmatpush3.bf16.msra.mxu0 %v7410_v1 }
0x10e1   :  { %7415 = vmatprep.subr.bf16.mxu0 %v7414_v53 }
0x10e4   :  { %7417 = vmatpush3.bf16.msra.mxu0 %v7414_v53 }
0x11aa   :  { %v7253_v39 = vpop.f32.mrb[38].mxu0 }
0x11ab   :  { %v6149_v16 = vadd.f32 %v7253_v39, %v6787_v10  ;;  %v6143_v9 = vpop.f32.mrb[39].mxu0 }
0x11ac   :  { %v6144_v23 = vadd.f32 %v6787_v10, %v6143_v9 }
0x11ad   :  { %v6153_v26 = vadd.f32 %v6149_v16, %v8285_v11 }
0x11ae   :  { %v6152_v50 = vadd.f32 %v6144_v23, %v8283_v37  ;;  %v6794_v37 = vld [vmem:[%s8840_s14 + $0x20] sm:$0xff] }
0x11af   :  { %v6161_v27 = vsel %vm82_vm0, %v6153_v26, 0.0  ;;  %v7394_v48 = vpack.c.bf16 %v6795_v34, %v6794_v37 }
0x11b0   :  { %6162 = vadd.xlane.f32.xlu1 %v6161_v27  ;;  %v6158_v54 = vsel %vm82_vm0, %v6152_v50, 0.0 }
0x11b1   :  { %6159 = vadd.xlane.f32.xlu0 %v6158_v54  ;;  %7395 = vmatprep.subr.bf16.mxu1 %v7394_v48 }
0x11b2   :  { %7397 = vmatpush3.bf16.msra.mxu1 %v7394_v48 }
0x11b3   :  { %7399 = vmatprep.subr.bf16.mxu1 %v7398_v20 }
0x11b6   :  { %7401 = vmatpush3.bf16.msra.mxu1 %v7398_v20 }
0x123d   :  { %v6163_v35 = vpop.xlane.xlu1 %6162 }
0x123e   :  { %v6165_v28 = vmul.f32 0.03125, %v6163_v35  ;;  %v6160_v29 = vpop.xlane.xlu0 %6159 }
0x123f   :  { %v6164_v30 = vmul.f32 0.03125, %v6160_v29 }
0x1240   :  { %v6167_v33 = vsub.f32 %v6153_v26, %v6165_v28 }
0x1241   :  { %v6166_v60 = vsub.f32 %v6152_v50, %v6164_v30 }
0x1242   :  { %v6169_v4 = vmul.f32 %v6167_v33, %v6167_v33 }
0x1243   :  { %v6168_v2 = vmul.f32 %v6166_v60, %v6166_v60 }
0x1244   :  { %v6173_v11 = vsel %vm82_vm0, %v6169_v4, 0.0 }
0x1245   :  { %v6170_v17 = vsel %vm82_vm0, %v6168_v2, 0.0 }
0x1246   :  { %6171 = vadd.xlane.f32.xlu0 %v6170_v17 }
0x124a   :  { %6174 = vadd.xlane.f32.xlu0 %v6173_v11 }
0x12d3   :  { %v6172_v56 = vpop.xlane.xlu0 %6171 }
0x12d4   :  { %v6176_v25 = vmul.f32 0.03125, %v6172_v56 }
0x12d6   :  { %v6178_v5 = vadd.f32 1e-12, %v6176_v25 }
0x12d7   :  { %v6175_v52 = vpop.xlane.xlu0 %6174 }
0x12d8   :  { %7522 = vrsqrt.f32 %v6178_v5  ;;  %v6177_v6 = vmul.f32 0.03125, %v6175_v52 }
0x12da   :  { %v6179_v22 = vadd.f32 1e-12, %v6177_v6 }
0x12dc   :  { %7524 = vrsqrt.f32 %v6179_v22 }
0x12e2   :  { %v7523_v57 = vpop.eup %7522 }
0x12e3   :  { %v6182_v40 = vmul.f32 %v7523_v57, %v6166_v60 }
0x12e5   :  { %v6190_v43 = vmul.f32 %v6792_v31, %v6182_v40  ;;  %v6459_v40 = vld [vmem:[%s8846_s20 + $0x8] sm:$0xff] }
0x12e6   :  { %v7525_v38 = vpop.eup %7524 }
0x12e7   :  { %v6183_v44 = vmul.f32 %v7525_v38, %v6167_v33  ;;  %v6198_v45 = vadd.f32 %v6793_v42, %v6190_v43  ;;  %v6811_v33 = vld [vmem:[%s8843_s17 + $0x1] ss:$0 sm:$0xff]  ;;  %v7578_v43 = vmov 0.0|0.0  }
0x12e8   :  { %7418 = vmatprep.subr.bf16.mxu1 %v7578_v43 }
0x12e9   :  { %v6191_v32 = vmul.f32 %v6792_v31, %v6183_v44  ;;  %7262 = vmatprep.mubr.msk.f32.mxu1 %vm82_vm0, %v6198_v45  ;;  %v6458_v31 = vld [vmem:[%s8846_s20] sm:$0xff]  ;;  %v6461_v44 = vld [vmem:[%s8846_s20 + $0x18] sm:$0xff] }
0x12ea   :  { %v7419_v38 = vpack.c.bf16 %v6459_v40, %v6458_v31 }
0x12eb   :  { %v6199_v47 = vadd.f32 %v6793_v42, %v6191_v32  ;;  %v6460_v42 = vld [vmem:[%s8846_s20 + $0x10] sm:$0xff] }
0x12ed   :  { %7263 = vmatmul.mubr.msk.f32.vlgmr.msra.gmra.mrb[44].mxu1 %vm82_vm0, %v6199_v47 }
0x12ee   :  { %7292 = vmatprep.mubr.msk.f32.mxu1 %vm7572_vm1, %v7571_v59  ;;  %7420 = vmatpush3.bf16.msra.mxu1 %v7419_v38 }
0x12ef   :  { %7421 = vmatprep.subr.bf16.mxu1 %v7578_v43 }
0x13c0   :  { %v7264_v8 = vpop.f32.mrb[44].mxu1 }
0x13c1   :  { %v6291_v14 = vadd.f32 %v7264_v8, %v6799_v62  ;;  %v6285_v12 = vpop.f32.mrb[45].mxu1 }
0x13c2   :  { %v6286_v13 = vadd.f32 %v6799_v62, %v6285_v12 }
0x13c3   :  { %v6295_v15 = vmul.f32 %v6291_v14, %v6291_v14 }
0x13c4   :  { %v6294_v18 = vmul.f32 %v6286_v13, %v6286_v13 }
0x13c5   :  { %v6297_v19 = vmul.f32 %v6295_v15, %v6291_v14  ;;  %v6548_v15 = vld [vmem:[%s8848_s22 + $0x8] sm:$0xff] }
0x13c6   :  { %v6296_v41 = vmul.f32 %v6294_v18, %v6286_v13  ;;  %v6549_v18 = vld [vmem:[%s8848_s22 + $0x10] sm:$0xff] }
0x13c7   :  { %v6299_v21 = vmul.f32 0.044715, %v6297_v19 }
0x13c8   :  { %v6298_v10 = vmul.f32 0.044715, %v6296_v41  ;;  %v6550_v41 = vld [vmem:[%s8848_s22 + $0x18] sm:$0xff] }
0x13c9   :  { %v6301_v39 = vadd.f32 %v6299_v21, %v6291_v14  ;;  %v7428_v21 = vpack.c.bf16 %v6550_v41, %v6549_v18 }
0x13ca   :  { %v6300_v16 = vadd.f32 %v6298_v10, %v6286_v13 }
0x13cb   :  { %v6303_v9 = vmul.f32 0.7978846, %v6301_v39 }
0x13cc   :  { %v6302_v23 = vmul.f32 0.7978846, %v6300_v16 }
0x13cd   :  { %7526 = vtanh.f32 %v6303_v9 }
0x13ce   :  { %7528 = vtanh.f32 %v6302_v23  ;;  %v6820_v23 = vld [vmem:[%s8897_s6] ss:$0 sm:$0xff] }
0x13d7   :  { %v7527_v26 = vpop.eup %7526 }
0x13d8   :  { %v7529_v50 = vpop.eup %7528  ;;  %v6307_v27 = vadd.f32 1.0, %v7527_v26 }
0x13d9   :  { %v6306_v54 = vadd.f32 1.0, %v7529_v50 }
0x13da   :  { %v6309_v35 = vmul.f32 0.5, %v6307_v27 }
0x13db   :  { %v6308_v28 = vmul.f32 0.5, %v6306_v54 }
0x13dc   :  { %v6311_v30 = vmul.f32 %v6309_v35, %v6291_v14 }
0x13dd   :  { %v6310_v29 = vmul.f32 %v6308_v28, %v6286_v13  ;;  %v6547_v13 = vld [vmem:[%s8848_s22] sm:$0xff]  ;;  %s7579_s22 = smov [#allocation2]  }
0x13de   :  { %v7425_v19 = vpack.c.bf16 %v6548_v15, %v6547_v13  ;;  %s6638_s9 = sshll.u32 %s7579_s22, 4  ;;  %s6639_s9 = int_to_ptr.vmem [resolvable:$true] %s6638_s9 }
0x13df   :  { %7281 = vmatprep.mubr.msk.f32.mxu0 %vm3186_vm5, %v6310_v29  ;;  %s7544_s24 = scalar_lea.vmem %s6639_s9, 32  ;;  %p7549_p1 = scmp.lt.s32.totalorder %s6639_s9, %s6639_s9 }
0x13e0   :  { %7282 = vmatmul.mubr.msk.f32.vlgmr.msra.gmra.mrb[40].mxu0 %vm3186_vm5, %v6311_v30  ;;  %p7545_p0 = scmp.ne.s32.totalorder %s6639_s9, %s7544_s24  ;;  %p7550_p2 = scmp.lt.s32.totalorder %s7544_s24, %s7544_s24 }
0x13e2   :  { %p7551_p3 = por %p7550_p2, %p7549_p1 }
0x13e4   :  { %p7552_p4 = pnand %p7551_p3, %p7545_p0 }
0x14b3   :  { %v7283_v60 = vpop.f32.mrb[40].mxu0 }
0x14b4   :  { %v6407_v2 = vadd.f32 %v7283_v60, %v6811_v33  ;;  %v6401_v17 = vpop.f32.mrb[41].mxu0 }
0x14b5   :  { %v6402_v4 = vadd.f32 %v6811_v33, %v6401_v17 }
0x14b6   :  { %v6411_v11 = vadd.f32 %v6407_v2, %v6199_v47 }
0x14b7   :  { %v6410_v37 = vadd.f32 %v6402_v4, %v6198_v45  ;;  %v7422_v45 = vpack.c.bf16 %v6461_v44, %v6460_v42 }
0x14b8   :  { %v6419_v34 = vsel %vm82_vm0, %v6411_v11, 0.0 }
0x14b9   :  { %6420 = vadd.xlane.f32.xlu0 %v6419_v34  ;;  %v6416_v48 = vsel %vm82_vm0, %v6410_v37, 0.0  ;;  %7423 = vmatpush3.bf16.msra.mxu1 %v7422_v45 }
0x14ba   :  { %6417 = vadd.xlane.f32.xlu1 %v6416_v48  ;;  %7424 = vmatprep.subr.bf16.mxu1 %v7578_v43 }
0x1546   :  { %v6421_v36 = vpop.xlane.xlu0 %6420 }
0x1547   :  { %v6423_v24 = vmul.f32 0.03125, %v6421_v36  ;;  %v6418_v20 = vpop.xlane.xlu1 %6417 }
0x1548   :  { %v6422_v56 = vmul.f32 0.03125, %v6418_v20 }
0x1549   :  { %v6425_v25 = vsub.f32 %v6411_v11, %v6423_v24 }
0x154a   :  { %v6424_v5 = vsub.f32 %v6410_v37, %v6422_v56 }
0x154b   :  { %v6427_v52 = vmul.f32 %v6425_v25, %v6425_v25 }
0x154c   :  { %v6426_v6 = vmul.f32 %v6424_v5, %v6424_v5 }
0x154d   :  { %v6431_v22 = vsel %vm82_vm0, %v6427_v52, 0.0 }
0x154e   :  { %6432 = vadd.xlane.f32.xlu0 %v6431_v22  ;;  %v6428_v57 = vsel %vm82_vm0, %v6426_v6, 0.0 }
0x154f   :  { %6429 = vadd.xlane.f32.xlu1 %v6428_v57 }
0x15db   :  { %v6433_v32 = vpop.xlane.xlu0 %6432 }
0x15dc   :  { %v6435_v47 = vmul.f32 0.03125, %v6433_v32  ;;  %v6430_v49 = vpop.xlane.xlu1 %6429 }
0x15dd   :  { %v6434_v51 = vmul.f32 0.03125, %v6430_v49 }
0x15de   :  { %v6437_v58 = vadd.f32 1e-12, %v6435_v47 }
0x15df   :  { %v6436_v55 = vadd.f32 1e-12, %v6434_v51 }
0x15e0   :  { %7530 = vrsqrt.f32 %v6437_v58 }
0x15e1   :  { %7532 = vrsqrt.f32 %v6436_v55 }
0x15ea   :  { %v7531_v46 = vpop.eup %7530 }
0x15eb   :  { %v7533_v63 = vpop.eup %7532  ;;  %v6441_v0 = vmul.f32 %v7531_v46, %v6425_v25 }
0x15ec   :  { %v6440_v1 = vmul.f32 %v7533_v63, %v6424_v5 }
0x15ed   :  { %v6449_v3 = vmul.f32 %v6816_v61, %v6441_v0 }
0x15ee   :  { %v6448_v53 = vmul.f32 %v6816_v61, %v6440_v1 }
0x15ef   :  { %v6457_v62 = vadd.f32 %v6817_v7, %v6449_v3 }
0x15f0   :  { %v6456_v8 = vadd.f32 %v6817_v7, %v6448_v53 }
0x15f1   :  { %v6471_v14 = vrot.slane %v6457_v62, 7 }
0x15f3   :  { %v6473_v12 = vsel %vm6472_vm6, %v6471_v14, %v6456_v8 }
0x15f4   :  { %7293 = vmatmul.mubr.msk.f32.vlgmr.msra.gmra.mrb[46].mxu1 %vm82_vm0, %v6473_v12 }
0x15f5   :  { %7303 = vmatprep.mubr.msk.f32.mxu1 %vm7572_vm1, %v7571_v59  ;;  %7426 = vmatpush3.bf16.msra.mxu1 %v7425_v19  ;;  %v6818_v59 = vld [vmem:[%s8847_s21] ss:$0 sm:$0xff] }
0x15f6   :  { %7427 = vmatprep.subr.bf16.mxu1 %v7578_v43 }
0x15f9   :  { %7429 = vmatpush3.bf16.msra.mxu1 %v7428_v21 }
0x16c7   :  { %v6542_v10 = vpop.f32.mrb[46].mxu1 }
0x16c8   :  { %v6543_v39 = vadd.f32 %v6818_v59, %v6542_v10  ;;  %v7294_v16 = vpop.f32.mrb[47].mxu1 }
0x16ca   :  { %7534 = vtanh.f32 %v6543_v39 }
0x16d4   :  { %v7535_v9 = vpop.eup %7534 }
0x16d5   :  { %7304 = vmatmul.mubr.msk.f32.vlgmr.msra.gmra.mrb[48].mxu1 %vm82_vm0, %v7535_v9 }
0x17a8   :  { %v6627_v26 = vpop.f32.mrb[48].mxu1 }
0x17a9   :  { %v6628_v50 = vadd.f32 %v6820_v23, %v6627_v26  ;;  %v7305_v27 = vpop.f32.mrb[49].mxu1 }
0x17ab   :  { %6631 = vst [vmem:[#allocation2] sm:$0x3] %v6628_v50 }
0x17ac   :  { %7555 = shalt.err (!%p7552_p4)
}
0x17ad   :  { %s8898_s16 = sld [smem:[#allocation15_spill]] }
0x17b3   :  { %s7556_s17 = scalar_lea.hbm %s8898_s16, 32 }
0x17b4   :  { %p7557_p5 = scmp.ne.s32.totalorder %s8898_s16, %s7556_s17  ;;  %p7560_p6 = scmp.lt.u32.totalorder %s7556_s17, %s8898_s16 }
0x17b6   :  { %p7562_p7 = pnand %p7560_p6, %p7557_p5 }
0x17b8   :  { %7565 = shalt.err (!%p7562_p7)
}
0x17b9   :  { %6641 = dma.vmem_to_hbm [thread:$0]  %s6639_s9, 32, %s8898_s16, [#allocation3]  }
0x17ba   :  { %7566 = dma.done.wait [#allocation3], 32  }
0x17bb   :  { %7567 = vsyncadd [#allocation3], 4294967264 }
0x17bc   :  { %6645 = vsyncpa [#allocation3], 1 }

</bundles_post_ra>
